<compile_context>
chip_gen: v6e
topology: v6e:2x2x1
jax: 0.10.0
libtpu: 0.0.40
codegen_flags: <defaults>
</compile_context>

<pallas_src>
import math
from functools import partial

import jax
import jax.numpy as jnp
from jax.experimental import pallas as pl
from jax.experimental.pallas import tpu as pltpu


# ----------------------------------------------------------------------------
# Kernel factory: one grid step == (one batch element, one query tile).
# ----------------------------------------------------------------------------
def _make_kernel(*, nhead, head_dim, d_model, q_tile, has_pos, has_mask,
                 sa_val_has_pos_emb, negative_slope):
    q_scale = 1.0 / math.sqrt(head_dim)
    # K always uses src+pos; V uses src+pos only if sa_val_has_pos_emb.
    fuse_kv = (not has_pos) or sa_val_has_pos_emb

    def kernel(*refs):
        it = iter(refs)
        x_ref = next(it)
        pos_ref = next(it) if has_pos else None
        mask_ref = next(it) if has_mask else None
        (wq_ref, bq_ref, wkv_ref, bkv_ref, wo_ref, bo_ref,
         wlin_ref, bns_ref, bnb_ref, o_ref, kv_sc, o_sc) = it

        cdt = wq_ref.dtype                      # MXU compute dtype (bf16)
        qi = pl.program_id(1)

        # --- K/V projection: once per batch element, cached in VMEM scratch
        #     and re-used by every query tile of this batch element. ---------
        @pl.when(qi == 0)
        def _project_kv():
            x_all = x_ref[0].astype(jnp.float32)                       # [N, D]
            xp_all = (x_all + pos_ref[0].astype(jnp.float32)) if has_pos else x_all
            if fuse_kv:
                kv = jnp.dot(xp_all.astype(cdt), wkv_ref[...],
                             preferred_element_type=jnp.float32) + bkv_ref[...]
                kv_sc[...] = kv.astype(cdt)
            else:
                k = jnp.dot(xp_all.astype(cdt), wkv_ref[:, :d_model],
                            preferred_element_type=jnp.float32) + bkv_ref[:, :d_model]
                v = jnp.dot(x_all.astype(cdt), wkv_ref[:, d_model:],
                            preferred_element_type=jnp.float32) + bkv_ref[:, d_model:]
                kv_sc[:, :d_model] = k.astype(cdt)
                kv_sc[:, d_model:] = v.astype(cdt)

        # --- Q projection for this query tile. ------------------------------
        row0 = pl.multiple_of(qi * q_tile, q_tile)
        x_q = x_ref[0, pl.ds(row0, q_tile), :].astype(jnp.float32)     # [tq, D]
        if has_pos:
            xp_q = x_q + pos_ref[0, pl.ds(row0, q_tile), :].astype(jnp.float32)
        else:
            xp_q = x_q
        q = jnp.dot(xp_q.astype(cdt), wq_ref[...],
                    preferred_element_type=jnp.float32) + bq_ref[...]  # [tq, D]

        mask = mask_ref[0].astype(jnp.float32) if has_mask else None   # [tq, N]

        # --- Per-head attention; head outputs stored at their lane offset so
        #     the output projection is a single K=D matmul. ------------------
        for h in range(nhead):                  # unrolled; nhead is small
            lo = h * head_dim
            qh = (q[:, lo:lo + head_dim] * q_scale).astype(cdt)        # scale folded
            kh = kv_sc[:, lo:lo + head_dim]                            # [N, hd]
            vh = kv_sc[:, d_model + lo:d_model + lo + head_dim]
            s = jnp.einsum("qd,kd->qk", qh, kh,
                           preferred_element_type=jnp.float32)         # [tq, N]
            if has_mask:
                s = s + mask
            m = jnp.max(s, axis=-1, keepdims=True)
            p = jnp.exp(s - m)
            p = p * pl.reciprocal(jnp.sum(p, axis=-1, keepdims=True), approx=True)
            oh = jnp.dot(p.astype(cdt), vh, preferred_element_type=jnp.float32)
            o_sc[:, lo:lo + head_dim] = oh.astype(cdt)

        attn = jnp.dot(o_sc[...], wo_ref[...],
                       preferred_element_type=jnp.float32) + bo_ref[...]

        # src = src - dropout(src2); dropout is identity in eval mode.
        # TODO(synk): nn.Dropout in training mode is not modelled.
        y = x_q - attn

        # Conv1d(k=1, bias=False) + BatchNorm1d (eval, folded) + LeakyReLU(0.2)
        z = jnp.dot(y.astype(cdt), wlin_ref[...], preferred_element_type=jnp.float32)
        z = z * bns_ref[...] + bnb_ref[...]
        o_ref[0] = jnp.where(z >= 0.0, z, negative_slope * z).astype(o_ref.dtype)

    return kernel


# ----------------------------------------------------------------------------
# Wrapper
# ----------------------------------------------------------------------------
@partial(jax.jit, static_argnames=("nhead", "negative_slope", "sa_val_has_pos_emb",
                                   "q_tile", "seq_first", "single_buffer_weights"))
def template_self_layer_forward(params, src, src_pos=None, src_mask=None, *,
                                nhead, negative_slope=0.2,
                                sa_val_has_pos_emb=False, q_tile=None,
                                seq_first=True, single_buffer_weights=True):
    """TemplateSelfLayer.forward (eval).

    src / src_pos: [N, B, D] if seq_first (nn.MultiheadAttention layout) else
    [B, N, D] (batch-first; avoids the wrapper transposes entirely).
    src_mask: optional attention mask shared across heads — either an additive
    float mask or a PyTorch-style boolean mask (True = blocked); shape [N, N]
    (shared across batch, never re-DMA'd) or [B, N, N].  Fully-masked rows
    yield a uniform distribution (finite -1e9), not PyTorch's NaNs.
    Returns the same layout as the input (matches `src.permute(2, 0, 1)`).

    TODO(synk): src_key_padding_mask is not implemented (fold it into the
    additive src_mask); attention weights (satt_weights) are not returned.
    """
    if seq_first:
        x = jnp.transpose(src, (1, 0, 2))               # [B, N, D]
        pos = None if src_pos is None else jnp.transpose(src_pos, (1, 0, 2))
    else:
        x = src
        pos = src_pos
    B, N, D = x.shape
    assert D % nhead == 0
    head_dim = D // nhead
    assert head_dim % 8 == 0            # head slices / o_sc lane stores
    # (head_dim and D as multiples of 128 give aligned, lane-dense layouts.)

    # Query-tile size (grid axis 1).  Fall back to full N if it doesn't divide.
    if q_tile is None:
        q_tile = 128 if N % 128 == 0 else N
    q_tile = min(q_tile, N)
    if N % q_tile != 0:                 # TODO(synk): ragged last query tile
        q_tile = N
    if q_tile != N:
        assert q_tile % 8 == 0

    has_pos = pos is not None
    has_mask = src_mask is not None

    mask = None
    mask_shared = True
    if has_mask:
        m = src_mask
        if m.dtype == jnp.bool_:        # explicit PyTorch bool-mask conversion
            m = jnp.where(m, jnp.float32(-1e9), jnp.float32(0.0))
        if m.ndim == 2:
            m = m[None]                 # [1, N, N]  (shared across batch)
        mask_shared = (m.shape[0] == 1)
        mask = m.astype(jnp.bfloat16)   # halves the dominant DMA stream

    cdt = params["w_q"].dtype

    kernel = _make_kernel(nhead=nhead, head_dim=head_dim, d_model=D,
                          q_tile=q_tile, has_pos=has_pos, has_mask=has_mask,
                          sa_val_has_pos_emb=bool(sa_val_has_pos_emb),
                          negative_slope=float(negative_slope))

    act_spec = pl.BlockSpec((1, N, D), lambda b, q: (b, 0, 0))

    def w_spec(shape):                  # grid-invariant resident weight block
        if single_buffer_weights:       # one pipeline buffer is enough
            return pl.BlockSpec(shape, lambda b, q: (0, 0),
                                pipeline_mode=pl.Buffered(1))
        return pl.BlockSpec(shape, lambda b, q: (0, 0))

    operands = [x]
    in_specs = [act_spec]
    if has_pos:
        operands.append(pos)
        in_specs.append(act_spec)
    if has_mask:
        operands.append(mask)
        in_specs.append(pl.BlockSpec(
            (1, q_tile, N),
            (lambda b, q: (0, q, 0)) if mask_shared else (lambda b, q: (b, q, 0))))
    weight_keys = ("w_q", "b_q", "w_kv", "b_kv", "w_o", "b_o",
                   "w_lin", "bn_scale", "bn_shift")
    for k in weight_keys:
        operands.append(params[k])
        in_specs.append(w_spec(params[k].shape))

    # Explicit VMEM budget (default scoped limit is only 16/32 MiB).
    xs = jnp.dtype(x.dtype).itemsize
    cs = jnp.dtype(cdt).itemsize
    est = 2 * N * D * xs                                        # x (double-buffered)
    if has_pos:
        est += 2 * N * D * jnp.dtype(pos.dtype).itemsize
    if has_mask:
        est += 2 * q_tile * N * jnp.dtype(mask.dtype).itemsize
    est += 2 * q_tile * D * xs                                  # output block
    wbuf = 1 if single_buffer_weights else 2
    est += wbuf * sum(int(math.prod(params[k].shape)) *
                      jnp.dtype(params[k].dtype).itemsize for k in weight_keys)
    est += (N * 2 * D + q_tile * D) * cs                        # kv / o_all scratch
    est += 4 * q_tile * N * 4 + 8 * q_tile * D * 4 + 2 * N * 2 * D * 4  # f32 temps
    vmem_limit = int(min(max(est, 32 << 20), 64 << 20))         # <= v7x physical

    out = pl.pallas_call(
        kernel,
        out_shape=jax.ShapeDtypeStruct((B, N, D), x.dtype),
        grid=(B, N // q_tile),
        in_specs=in_specs,
        out_specs=pl.BlockSpec((1, q_tile, D), lambda b, q: (b, q, 0)),
        scratch_shapes=[pltpu.VMEM((N, 2 * D), cdt),            # cached K | V proj
                        pltpu.VMEM((q_tile, D), cdt)],          # concat head outputs
        compiler_params=pltpu.CompilerParams(
            dimension_semantics=("parallel", "arbitrary"),
            vmem_limit_bytes=vmem_limit),
    )(*operands)

    return jnp.transpose(out, (1, 0, 2)) if seq_first else out


# ----------------------------------------------------------------------------
# Parameters: PyTorch layout -> folded / pre-transposed kernel layout (once).
# ----------------------------------------------------------------------------
def init_raw_params(key, d_model, w_scale=0.06):
    ks = jax.random.split(key, 9)
    nrm = lambda k, shape, s=w_scale: s * jax.random.normal(k, shape, jnp.float32)
    return {
        # nn.MultiheadAttention
        "in_proj_weight": nrm(ks[0], (3 * d_model, d_model)),
        "in_proj_bias": nrm(ks[1], (3 * d_model,), 0.05),
        "out_proj_weight": nrm(ks[2], (d_model, d_model)),
        "out_proj_bias": nrm(ks[3], (d_model,), 0.05),
        # nn.Conv1d(d_model, d_model, kernel_size=1, bias=False)
        "conv_weight": nrm(ks[4], (d_model, d_model, 1)),
        # nn.BatchNorm1d(d_model) eval-mode running statistics + affine
        "bn_gamma": 1.0 + nrm(ks[5], (d_model,), 0.05),
        "bn_beta": nrm(ks[6], (d_model,), 0.05),
        "bn_mean": nrm(ks[7], (d_model,), 0.05),
        "bn_var": 1.0 + 0.1 * jax.random.uniform(ks[8], (d_model,), jnp.float32),
    }


def prepare_params(raw, eps=1e-5, compute_dtype=jnp.bfloat16):
    """Fold BN and pre-transpose weights ONCE into the kernel's MXU layout.
    TODO(synk): on v7x, compute_dtype could be an fp8 type for the big weights.
    TODO(synk): BatchNorm1d training-mode batch statistics are not modelled."""
    D = raw["out_proj_weight"].shape[0]
    Wq, Wk, Wv = (raw["in_proj_weight"][:D], raw["in_proj_weight"][D:2 * D],
                  raw["in_proj_weight"][2 * D:])
    bq, bk, bv = (raw["in_proj_bias"][:D], raw["in_proj_bias"][D:2 * D],
                  raw["in_proj_bias"][2 * D:])
    bn_scale = raw["bn_gamma"] / jnp.sqrt(raw["bn_var"] + eps)
    bn_shift = raw["bn_beta"] - raw["bn_mean"] * bn_scale
    return {
        "w_q": Wq.T.astype(compute_dtype),                                   # [D, D]
        "b_q": bq.reshape(1, D).astype(jnp.float32),
        "w_kv": jnp.concatenate([Wk.T, Wv.T], axis=1).astype(compute_dtype), # [D, 2D]
        "b_kv": jnp.concatenate([bk, bv]).reshape(1, 2 * D).astype(jnp.float32),
        "w_o": raw["out_proj_weight"].T.astype(compute_dtype),               # [D, D]
        "b_o": raw["out_proj_bias"].reshape(1, D).astype(jnp.float32),
        "w_lin": raw["conv_weight"][:, :, 0].T.astype(compute_dtype),        # [D, D]
        "bn_scale": bn_scale.reshape(1, D).astype(jnp.float32),
        "bn_shift": bn_shift.reshape(1, D).astype(jnp.float32),
    }


# ----------------------------------------------------------------------------
# Pure-jnp f32 reference of TemplateSelfLayer.forward (for a loose check).
# ----------------------------------------------------------------------------
def reference_forward(raw, src, src_pos, src_mask, nhead, eps=1e-5,
                      negative_slope=0.2, sa_val_has_pos_emb=False):
    N, B, D = src.shape
    hd = D // nhead
    xp = src if src_pos is None else src + src_pos
    lin = lambda t, w, b: jnp.einsum("nbd,ed->nbe", t, w) + b
    q = lin(xp, raw["in_proj_weight"][:D], raw["in_proj_bias"][:D])
    k = lin(xp, raw["in_proj_weight"][D:2 * D], raw["in_proj_bias"][D:2 * D])
    v_in = xp if sa_val_has_pos_emb else src
    v = lin(v_in, raw["in_proj_weight"][2 * D:], raw["in_proj_bias"][2 * D:])
    heads = lambda t: t.reshape(N, B, nhead, hd).transpose(1, 2, 0, 3)  # [B,H,N,hd]
    s = jnp.einsum("bhqd,bhkd->bhqk", heads(q) / math.sqrt(hd), heads(k))
    if src_mask is not None:
        am = src_mask
        if am.dtype == jnp.bool_:
            am = jnp.where(am, -1e9, 0.0)
        if am.ndim == 2:
            am = am[None]
        s = s + am[:, None, :, :].astype(s.dtype)
    p = jax.nn.softmax(s, axis=-1)
    o = jnp.einsum("bhqk,bhkd->bhqd", p, heads(v)).transpose(2, 0, 1, 3).reshape(N, B, D)
    y = src - lin(o, raw["out_proj_weight"], raw["out_proj_bias"])
    z = jnp.einsum("nbd,ed->nbe", y, raw["conv_weight"][:, :, 0])
    scale = raw["bn_gamma"] / jnp.sqrt(raw["bn_var"] + eps)
    z = (z - raw["bn_mean"]) * scale + raw["bn_beta"]
    return jnp.where(z >= 0, z, negative_slope * z)


# ----------------------------------------------------------------------------
if __name__ == "__main__":
    # D multiple of 128 (lane-dense stores), head_dim = 128 (aligned, MXU-filling
    # head slices), N = 128 with q_tile = 64 so the KV-cache-in-scratch path is
    # exercised across two query tiles per batch element.
    d_model, nhead, N, B = 256, 2, 128, 2

    key = jax.random.PRNGKey(0)
    k_src, k_pos, k_mask, k_par = jax.random.split(key, 4)
    src = jax.random.normal(k_src, (N, B, d_model), jnp.float32)
    src_pos = jax.random.normal(k_pos, (N, B, d_model), jnp.float32)

    # PyTorch-style boolean mask (True = blocked), shared across batch & heads;
    # the diagonal stays unmasked so no row is fully blocked.
    blocked = jax.random.bernoulli(k_mask, 0.3, (N, N))
    src_mask = jnp.logical_and(blocked, jnp.logical_not(jnp.eye(N, dtype=bool)))

    raw = init_raw_params(k_par, d_model)
    params = prepare_params(raw)

    fwd = partial(template_self_layer_forward, nhead=nhead, q_tile=64)
    try:
        out = jax.block_until_ready(fwd(params, src, src_pos, src_mask))
    except Exception:
        # Fallback for JAX versions without pl.Buffered pipeline_mode support
        # on pallas_call (double-buffered weights instead).
        out = jax.block_until_ready(
            fwd(params, src, src_pos, src_mask, single_buffer_weights=False))

    assert out.shape == (N, B, d_model)
    assert bool(jnp.all(jnp.isfinite(out)))

    # Loose numerical check vs the f32 reference (kernel matmuls run in bf16,
    # the mask is stored in bf16 and the softmax denominator uses the approx
    # reciprocal).
    ref = reference_forward(raw, src, src_pos, src_mask, nhead)
    max_err = float(jnp.max(jnp.abs(out - ref)))
    mean_err = float(jnp.mean(jnp.abs(out - ref)))
    assert bool(jnp.allclose(out, ref, atol=2e-1, rtol=2e-1)), (max_err, mean_err)
    assert mean_err < 3e-2, (max_err, mean_err)

    print("KERNEL_OK")
</pallas_src>

<mosaic_0001>
module attributes {stable_mosaic.version = 11 : i64} {
  func.func @kernel(%arg0: i32, %arg1: i32, %arg2: memref<1x128x256xf32, #tpu.memory_space<vmem>>, %arg3: memref<1x128x256xf32, #tpu.memory_space<vmem>>, %arg4: memref<1x64x128xbf16, #tpu.memory_space<vmem>>, %arg5: memref<256x256xbf16, #tpu.memory_space<vmem>>, %arg6: memref<1x256xf32, #tpu.memory_space<vmem>>, %arg7: memref<256x512xbf16, #tpu.memory_space<vmem>>, %arg8: memref<1x512xf32, #tpu.memory_space<vmem>>, %arg9: memref<256x256xbf16, #tpu.memory_space<vmem>>, %arg10: memref<1x256xf32, #tpu.memory_space<vmem>>, %arg11: memref<256x256xbf16, #tpu.memory_space<vmem>>, %arg12: memref<1x256xf32, #tpu.memory_space<vmem>>, %arg13: memref<1x256xf32, #tpu.memory_space<vmem>>, %arg14: memref<1x64x256xf32, #tpu.memory_space<vmem>>, %arg15: memref<128x512xbf16, #tpu.memory_space<vmem>>, %arg16: memref<64x256xbf16, #tpu.memory_space<vmem>>) attributes {dimension_semantics = [#tpu.dimension_semantics<parallel>, #tpu.dimension_semantics<arbitrary>], iteration_bounds = array<i64: 2, 2>, scalar_prefetch = 0 : i64, scratch_operands = 2 : i64, tpu.core_type = #tpu.core_type<tc>, window_params = [{transform_indices = @transform_0, window_bounds = array<i64: 1, 128, 256>}, {transform_indices = @transform_1, window_bounds = array<i64: 1, 128, 256>}, {transform_indices = @transform_2, window_bounds = array<i64: 1, 64, 128>}, {pipeline_mode = #tpu.pipeline_mode<synchronous>, transform_indices = @transform_3, window_bounds = array<i64: 256, 256>}, {pipeline_mode = #tpu.pipeline_mode<synchronous>, transform_indices = @transform_4, window_bounds = array<i64: 1, 256>}, {pipeline_mode = #tpu.pipeline_mode<synchronous>, transform_indices = @transform_5, window_bounds = array<i64: 256, 512>}, {pipeline_mode = #tpu.pipeline_mode<synchronous>, transform_indices = @transform_6, window_bounds = array<i64: 1, 512>}, {pipeline_mode = #tpu.pipeline_mode<synchronous>, transform_indices = @transform_7, window_bounds = array<i64: 256, 256>}, {pipeline_mode = #tpu.pipeline_mode<synchronous>, transform_indices = @transform_8, window_bounds = array<i64: 1, 256>}, {pipeline_mode = #tpu.pipeline_mode<synchronous>, transform_indices = @transform_9, window_bounds = array<i64: 256, 256>}, {pipeline_mode = #tpu.pipeline_mode<synchronous>, transform_indices = @transform_10, window_bounds = array<i64: 1, 256>}, {pipeline_mode = #tpu.pipeline_mode<synchronous>, transform_indices = @transform_11, window_bounds = array<i64: 1, 256>}, {transform_indices = @transform_12, window_bounds = array<i64: 1, 64, 256>}]} {
    %c0_i32 = arith.constant 0 : i32
    %0 = arith.cmpi eq, %arg1, %c0_i32 : i32
    %1 = arith.extui %0 : i1 to i32
    %c0_i32_0 = arith.constant 0 : i32
    %2 = arith.cmpi ne, %1, %c0_i32_0 : i32
    scf.if %2 {
      %c0_49 = arith.constant 0 : index
      %c0_50 = arith.constant 0 : index
      %c0_51 = arith.constant 0 : index
      %89 = vector.load %arg2[%c0_49, %c0_50, %c0_51] : memref<1x128x256xf32, #tpu.memory_space<vmem>>, vector<1x128x256xf32>
      %90 = vector.shape_cast %89 : vector<1x128x256xf32> to vector<128x256xf32>
      %c0_52 = arith.constant 0 : index
      %c0_53 = arith.constant 0 : index
      %c0_54 = arith.constant 0 : index
      %91 = vector.load %arg3[%c0_52, %c0_53, %c0_54] : memref<1x128x256xf32, #tpu.memory_space<vmem>>, vector<1x128x256xf32>
      %92 = vector.shape_cast %91 : vector<1x128x256xf32> to vector<128x256xf32>
      %93 = arith.addf %90, %92 : vector<128x256xf32>
      %94 = arith.truncf %93 : vector<128x256xf32> to vector<128x256xbf16>
      %c0_55 = arith.constant 0 : index
      %c0_56 = arith.constant 0 : index
      %95 = vector.load %arg7[%c0_55, %c0_56] : memref<256x512xbf16, #tpu.memory_space<vmem>>, vector<256x256xbf16>
      %cst_57 = arith.constant dense<0.000000e+00> : vector<128x256xf32>
      %96 = tpu.matmul %94, %95, %cst_57 {dimension_numbers = #tpu.dot_dimension_numbers<[1], [0], [0], [1], [0, 0, 1, 1], [], []>} : vector<128x256xbf16>, vector<256x256xbf16>, vector<128x256xf32> -> vector<128x256xf32>
      %c0_58 = arith.constant 0 : index
      %c0_59 = arith.constant 0 : index
      %97 = vector.load %arg8[%c0_58, %c0_59] : memref<1x512xf32, #tpu.memory_space<vmem>>, vector<1x256xf32>
      %98 = vector.broadcast %97 : vector<1x256xf32> to vector<128x256xf32>
      %99 = arith.addf %96, %98 : vector<128x256xf32>
      %100 = arith.truncf %90 : vector<128x256xf32> to vector<128x256xbf16>
      %c0_60 = arith.constant 0 : index
      %c256_61 = arith.constant 256 : index
      %101 = vector.load %arg7[%c0_60, %c256_61] : memref<256x512xbf16, #tpu.memory_space<vmem>>, vector<256x256xbf16>
      %cst_62 = arith.constant dense<0.000000e+00> : vector<128x256xf32>
      %102 = tpu.matmul %100, %101, %cst_62 {dimension_numbers = #tpu.dot_dimension_numbers<[1], [0], [0], [1], [0, 0, 1, 1], [], []>} : vector<128x256xbf16>, vector<256x256xbf16>, vector<128x256xf32> -> vector<128x256xf32>
      %c0_63 = arith.constant 0 : index
      %c256_64 = arith.constant 256 : index
      %103 = vector.load %arg8[%c0_63, %c256_64] : memref<1x512xf32, #tpu.memory_space<vmem>>, vector<1x256xf32>
      %104 = vector.broadcast %103 : vector<1x256xf32> to vector<128x256xf32>
      %105 = arith.addf %102, %104 : vector<128x256xf32>
      %106 = arith.truncf %99 : vector<128x256xf32> to vector<128x256xbf16>
      %c0_65 = arith.constant 0 : index
      %c0_66 = arith.constant 0 : index
      %107 = vector.load %arg15[%c0_65, %c0_66] : memref<128x512xbf16, #tpu.memory_space<vmem>>, vector<128x256xbf16>
      tpu.vector_store %arg15[%c0_65, %c0_66], %106 {strides = array<i32>} : memref<128x512xbf16, #tpu.memory_space<vmem>>, vector<128x256xbf16>,
      %108 = arith.truncf %105 : vector<128x256xf32> to vector<128x256xbf16>
      %c0_67 = arith.constant 0 : index
      %c256_68 = arith.constant 256 : index
      %109 = vector.load %arg15[%c0_67, %c256_68] : memref<128x512xbf16, #tpu.memory_space<vmem>>, vector<128x256xbf16>
      tpu.vector_store %arg15[%c0_67, %c256_68], %108 {strides = array<i32>} : memref<128x512xbf16, #tpu.memory_space<vmem>>, vector<128x256xbf16>,
    } else {
    }
    %c64_i32 = arith.constant 64 : i32
    %3 = arith.muli %arg1, %c64_i32 : i32
    %4 = tpu.assume_multiple %3, 64 : i32
    %c0 = arith.constant 0 : index
    %5 = arith.index_cast %4 : i32 to index
    %c0_1 = arith.constant 0 : index
    %6 = vector.load %arg2[%c0, %5, %c0_1] : memref<1x128x256xf32, #tpu.memory_space<vmem>>, vector<1x64x256xf32>
    %7 = vector.shape_cast %6 : vector<1x64x256xf32> to vector<64x256xf32>
    %c0_2 = arith.constant 0 : index
    %8 = arith.index_cast %4 : i32 to index
    %c0_3 = arith.constant 0 : index
    %9 = vector.load %arg3[%c0_2, %8, %c0_3] : memref<1x128x256xf32, #tpu.memory_space<vmem>>, vector<1x64x256xf32>
    %10 = vector.shape_cast %9 : vector<1x64x256xf32> to vector<64x256xf32>
    %11 = arith.addf %7, %10 : vector<64x256xf32>
    %12 = arith.truncf %11 : vector<64x256xf32> to vector<64x256xbf16>
    %c0_4 = arith.constant 0 : index
    %c0_5 = arith.constant 0 : index
    %13 = vector.load %arg5[%c0_4, %c0_5] : memref<256x256xbf16, #tpu.memory_space<vmem>>, vector<256x256xbf16>
    %cst = arith.constant dense<0.000000e+00> : vector<64x256xf32>
    %14 = tpu.matmul %12, %13, %cst {dimension_numbers = #tpu.dot_dimension_numbers<[1], [0], [0], [1], [0, 0, 1, 1], [], []>} : vector<64x256xbf16>, vector<256x256xbf16>, vector<64x256xf32> -> vector<64x256xf32>
    %c0_6 = arith.constant 0 : index
    %c0_7 = arith.constant 0 : index
    %15 = vector.load %arg6[%c0_6, %c0_7] : memref<1x256xf32, #tpu.memory_space<vmem>>, vector<1x256xf32>
    %16 = vector.broadcast %15 : vector<1x256xf32> to vector<64x256xf32>
    %17 = arith.addf %14, %16 : vector<64x256xf32>
    %c0_8 = arith.constant 0 : index
    %c0_9 = arith.constant 0 : index
    %c0_10 = arith.constant 0 : index
    %18 = vector.load %arg4[%c0_8, %c0_9, %c0_10] : memref<1x64x128xbf16, #tpu.memory_space<vmem>>, vector<1x64x128xbf16>
    %19 = vector.shape_cast %18 : vector<1x64x128xbf16> to vector<64x128xbf16>
    %20 = arith.extf %19 : vector<64x128xbf16> to vector<64x128xf32>
    %21 = vector.extract_strided_slice %17 {offsets = [0, 0], sizes = [64, 128], strides = [1, 1]} : vector<64x256xf32> to vector<64x128xf32>
    %cst_11 = arith.constant 0.0883883461 : f32
    %22 = vector.broadcast %cst_11 : f32 to vector<64x128xf32>
    %23 = arith.mulf %21, %22 : vector<64x128xf32>
    %24 = arith.truncf %23 : vector<64x128xf32> to vector<64x128xbf16>
    %c0_12 = arith.constant 0 : index
    %c0_13 = arith.constant 0 : index
    %25 = vector.load %arg15[%c0_12, %c0_13] : memref<128x512xbf16, #tpu.memory_space<vmem>>, vector<128x128xbf16>
    %c0_14 = arith.constant 0 : index
    %c256 = arith.constant 256 : index
    %26 = vector.load %arg15[%c0_14, %c256] : memref<128x512xbf16, #tpu.memory_space<vmem>>, vector<128x128xbf16>
    "tpu.trace_start"() <{level = 10 : i32, message = "qd,kd->qk"}> : () -> ()
    %cst_15 = arith.constant dense<0.000000e+00> : vector<64x128xf32>
    %27 = tpu.matmul %24, %25, %cst_15 {dimension_numbers = #tpu.dot_dimension_numbers<[1], [1], [0], [0], [0, 0, 1, 0], [], []>} : vector<64x128xbf16>, vector<128x128xbf16>, vector<64x128xf32> -> vector<64x128xf32>
    "tpu.trace_stop"() : () -> ()
    %28 = arith.addf %27, %20 : vector<64x128xf32>
    %cst_16 = arith.constant dense<0xFF800000> : vector<64xf32>
    %29 = vector.multi_reduction <maximumf>, %28, %cst_16 [1] : vector<64x128xf32> to vector<64xf32>
    %30 = vector.shape_cast %29 : vector<64xf32> to vector<64x1xf32>
    %31 = vector.broadcast %30 : vector<64x1xf32> to vector<64x128xf32>
    %32 = arith.subf %28, %31 : vector<64x128xf32>
    %33 = math.exp %32 : vector<64x128xf32>
    %cst_17 = arith.constant dense<0.000000e+00> : vector<64xf32>
    %34 = vector.multi_reduction <add>, %33, %cst_17 [1] : vector<64x128xf32> to vector<64xf32>
    %35 = vector.shape_cast %34 : vector<64xf32> to vector<64x1xf32>
    %36 = tpu.reciprocal %35 {approx = true} : vector<64x1xf32> -> vector<64x1xf32>
    %37 = vector.broadcast %36 : vector<64x1xf32> to vector<64x128xf32>
    %38 = arith.mulf %33, %37 : vector<64x128xf32>
    %39 = arith.truncf %38 : vector<64x128xf32> to vector<64x128xbf16>
    %cst_18 = arith.constant dense<0.000000e+00> : vector<64x128xf32>
    %40 = tpu.matmul %39, %26, %cst_18 {dimension_numbers = #tpu.dot_dimension_numbers<[1], [0], [0], [1], [0, 0, 1, 1], [], []>} : vector<64x128xbf16>, vector<128x128xbf16>, vector<64x128xf32> -> vector<64x128xf32>
    %41 = arith.truncf %40 : vector<64x128xf32> to vector<64x128xbf16>
    %c0_19 = arith.constant 0 : index
    %c0_20 = arith.constant 0 : index
    %42 = vector.load %arg16[%c0_19, %c0_20] : memref<64x256xbf16, #tpu.memory_space<vmem>>, vector<64x128xbf16>
    tpu.vector_store %arg16[%c0_19, %c0_20], %41 {strides = array<i32>} : memref<64x256xbf16, #tpu.memory_space<vmem>>, vector<64x128xbf16>,
    %43 = vector.extract_strided_slice %17 {offsets = [0, 128], sizes = [64, 128], strides = [1, 1]} : vector<64x256xf32> to vector<64x128xf32>
    %cst_21 = arith.constant 0.0883883461 : f32
    %44 = vector.broadcast %cst_21 : f32 to vector<64x128xf32>
    %45 = arith.mulf %43, %44 : vector<64x128xf32>
    %46 = arith.truncf %45 : vector<64x128xf32> to vector<64x128xbf16>
    %c0_22 = arith.constant 0 : index
    %c128 = arith.constant 128 : index
    %47 = vector.load %arg15[%c0_22, %c128] : memref<128x512xbf16, #tpu.memory_space<vmem>>, vector<128x128xbf16>
    %c0_23 = arith.constant 0 : index
    %c384 = arith.constant 384 : index
    %48 = vector.load %arg15[%c0_23, %c384] : memref<128x512xbf16, #tpu.memory_space<vmem>>, vector<128x128xbf16>
    "tpu.trace_start"() <{level = 10 : i32, message = "qd,kd->qk"}> : () -> ()
    %cst_24 = arith.constant dense<0.000000e+00> : vector<64x128xf32>
    %49 = tpu.matmul %46, %47, %cst_24 {dimension_numbers = #tpu.dot_dimension_numbers<[1], [1], [0], [0], [0, 0, 1, 0], [], []>} : vector<64x128xbf16>, vector<128x128xbf16>, vector<64x128xf32> -> vector<64x128xf32>
    "tpu.trace_stop"() : () -> ()
    %50 = arith.addf %49, %20 : vector<64x128xf32>
    %cst_25 = arith.constant dense<0xFF800000> : vector<64xf32>
    %51 = vector.multi_reduction <maximumf>, %50, %cst_25 [1] : vector<64x128xf32> to vector<64xf32>
    %52 = vector.shape_cast %51 : vector<64xf32> to vector<64x1xf32>
    %53 = vector.broadcast %52 : vector<64x1xf32> to vector<64x128xf32>
    %54 = arith.subf %50, %53 : vector<64x128xf32>
    %55 = math.exp %54 : vector<64x128xf32>
    %cst_26 = arith.constant dense<0.000000e+00> : vector<64xf32>
    %56 = vector.multi_reduction <add>, %55, %cst_26 [1] : vector<64x128xf32> to vector<64xf32>
    %57 = vector.shape_cast %56 : vector<64xf32> to vector<64x1xf32>
    %58 = tpu.reciprocal %57 {approx = true} : vector<64x1xf32> -> vector<64x1xf32>
    %59 = vector.broadcast %58 : vector<64x1xf32> to vector<64x128xf32>
    %60 = arith.mulf %55, %59 : vector<64x128xf32>
    %61 = arith.truncf %60 : vector<64x128xf32> to vector<64x128xbf16>
    %cst_27 = arith.constant dense<0.000000e+00> : vector<64x128xf32>
    %62 = tpu.matmul %61, %48, %cst_27 {dimension_numbers = #tpu.dot_dimension_numbers<[1], [0], [0], [1], [0, 0, 1, 1], [], []>} : vector<64x128xbf16>, vector<128x128xbf16>, vector<64x128xf32> -> vector<64x128xf32>
    %63 = arith.truncf %62 : vector<64x128xf32> to vector<64x128xbf16>
    %c0_28 = arith.constant 0 : index
    %c128_29 = arith.constant 128 : index
    %64 = vector.load %arg16[%c0_28, %c128_29] : memref<64x256xbf16, #tpu.memory_space<vmem>>, vector<64x128xbf16>
    tpu.vector_store %arg16[%c0_28, %c128_29], %63 {strides = array<i32>} : memref<64x256xbf16, #tpu.memory_space<vmem>>, vector<64x128xbf16>,
    %c0_30 = arith.constant 0 : index
    %c0_31 = arith.constant 0 : index
    %65 = vector.load %arg16[%c0_30, %c0_31] : memref<64x256xbf16, #tpu.memory_space<vmem>>, vector<64x256xbf16>
    %c0_32 = arith.constant 0 : index
    %c0_33 = arith.constant 0 : index
    %66 = vector.load %arg9[%c0_32, %c0_33] : memref<256x256xbf16, #tpu.memory_space<vmem>>, vector<256x256xbf16>
    %cst_34 = arith.constant dense<0.000000e+00> : vector<64x256xf32>
    %67 = tpu.matmul %65, %66, %cst_34 {dimension_numbers = #tpu.dot_dimension_numbers<[1], [0], [0], [1], [0, 0, 1, 1], [], []>} : vector<64x256xbf16>, vector<256x256xbf16>, vector<64x256xf32> -> vector<64x256xf32>
    %c0_35 = arith.constant 0 : index
    %c0_36 = arith.constant 0 : index
    %68 = vector.load %arg10[%c0_35, %c0_36] : memref<1x256xf32, #tpu.memory_space<vmem>>, vector<1x256xf32>
    %69 = vector.broadcast %68 : vector<1x256xf32> to vector<64x256xf32>
    %70 = arith.addf %67, %69 : vector<64x256xf32>
    %71 = arith.subf %7, %70 : vector<64x256xf32>
    %72 = arith.truncf %71 : vector<64x256xf32> to vector<64x256xbf16>
    %c0_37 = arith.constant 0 : index
    %c0_38 = arith.constant 0 : index
    %73 = vector.load %arg11[%c0_37, %c0_38] : memref<256x256xbf16, #tpu.memory_space<vmem>>, vector<256x256xbf16>
    %cst_39 = arith.constant dense<0.000000e+00> : vector<64x256xf32>
    %74 = tpu.matmul %72, %73, %cst_39 {dimension_numbers = #tpu.dot_dimension_numbers<[1], [0], [0], [1], [0, 0, 1, 1], [], []>} : vector<64x256xbf16>, vector<256x256xbf16>, vector<64x256xf32> -> vector<64x256xf32>
    %c0_40 = arith.constant 0 : index
    %c0_41 = arith.constant 0 : index
    %75 = vector.load %arg12[%c0_40, %c0_41] : memref<1x256xf32, #tpu.memory_space<vmem>>, vector<1x256xf32>
    %76 = vector.broadcast %75 : vector<1x256xf32> to vector<64x256xf32>
    %77 = arith.mulf %74, %76 : vector<64x256xf32>
    %c0_42 = arith.constant 0 : index
    %c0_43 = arith.constant 0 : index
    %78 = vector.load %arg13[%c0_42, %c0_43] : memref<1x256xf32, #tpu.memory_space<vmem>>, vector<1x256xf32>
    %79 = vector.broadcast %78 : vector<1x256xf32> to vector<64x256xf32>
    %80 = arith.addf %77, %79 : vector<64x256xf32>
    %cst_44 = arith.constant 0.000000e+00 : f32
    %81 = vector.broadcast %cst_44 : f32 to vector<64x256xf32>
    %82 = arith.cmpf oge, %80, %81 : vector<64x256xf32>
    %cst_45 = arith.constant 2.000000e-01 : f32
    %83 = vector.broadcast %cst_45 : f32 to vector<64x256xf32>
    %84 = arith.mulf %83, %80 : vector<64x256xf32>
    %85 = arith.select %82, %80, %84 : vector<64x256xi1>, vector<64x256xf32>
    %c0_46 = arith.constant 0 : index
    %c0_47 = arith.constant 0 : index
    %c0_48 = arith.constant 0 : index
    %86 = vector.load %arg14[%c0_46, %c0_47, %c0_48] : memref<1x64x256xf32, #tpu.memory_space<vmem>>, vector<1x64x256xf32>
    %87 = vector.shape_cast %86 : vector<1x64x256xf32> to vector<64x256xf32>
    %88 = vector.shape_cast %85 : vector<64x256xf32> to vector<1x64x256xf32>
    tpu.vector_store %arg14[%c0_46, %c0_47, %c0_48], %88 {strides = array<i32>} : memref<1x64x256xf32, #tpu.memory_space<vmem>>, vector<1x64x256xf32>,
    return
  }
  func.func @transform_0(%arg0: i32, %arg1: i32) -> (i32, i32, i32) {
    %c0_i32 = arith.constant 0 : i32
    %c0_i32_0 = arith.constant 0 : i32
    %c0_i32_1 = arith.constant 0 : i32
    return %arg0, %c0_i32, %c0_i32_0 : i32, i32, i32
  }
  func.func @transform_1(%arg0: i32, %arg1: i32) -> (i32, i32, i32) {
    %c0_i32 = arith.constant 0 : i32
    %c0_i32_0 = arith.constant 0 : i32
    %c0_i32_1 = arith.constant 0 : i32
    return %arg0, %c0_i32, %c0_i32_0 : i32, i32, i32
  }
  func.func @transform_2(%arg0: i32, %arg1: i32) -> (i32, i32, i32) {
    %c0_i32 = arith.constant 0 : i32
    %c0_i32_0 = arith.constant 0 : i32
    %c0_i32_1 = arith.constant 0 : i32
    return %c0_i32, %arg1, %c0_i32_0 : i32, i32, i32
  }
  func.func @transform_3(%arg0: i32, %arg1: i32) -> (i32, i32) {
    %c0_i32 = arith.constant 0 : i32
    %c0_i32_0 = arith.constant 0 : i32
    %c0_i32_1 = arith.constant 0 : i32
    return %c0_i32, %c0_i32_0 : i32, i32
  }
  func.func @transform_4(%arg0: i32, %arg1: i32) -> (i32, i32) {
    %c0_i32 = arith.constant 0 : i32
    %c0_i32_0 = arith.constant 0 : i32
    %c0_i32_1 = arith.constant 0 : i32
    return %c0_i32, %c0_i32_0 : i32, i32
  }
  func.func @transform_5(%arg0: i32, %arg1: i32) -> (i32, i32) {
    %c0_i32 = arith.constant 0 : i32
    %c0_i32_0 = arith.constant 0 : i32
    %c0_i32_1 = arith.constant 0 : i32
    return %c0_i32, %c0_i32_0 : i32, i32
  }
  func.func @transform_6(%arg0: i32, %arg1: i32) -> (i32, i32) {
    %c0_i32 = arith.constant 0 : i32
    %c0_i32_0 = arith.constant 0 : i32
    %c0_i32_1 = arith.constant 0 : i32
    return %c0_i32, %c0_i32_0 : i32, i32
  }
  func.func @transform_7(%arg0: i32, %arg1: i32) -> (i32, i32) {
    %c0_i32 = arith.constant 0 : i32
    %c0_i32_0 = arith.constant 0 : i32
    %c0_i32_1 = arith.constant 0 : i32
    return %c0_i32, %c0_i32_0 : i32, i32
  }
  func.func @transform_8(%arg0: i32, %arg1: i32) -> (i32, i32) {
    %c0_i32 = arith.constant 0 : i32
    %c0_i32_0 = arith.constant 0 : i32
    %c0_i32_1 = arith.constant 0 : i32
    return %c0_i32, %c0_i32_0 : i32, i32
  }
  func.func @transform_9(%arg0: i32, %arg1: i32) -> (i32, i32) {
    %c0_i32 = arith.constant 0 : i32
    %c0_i32_0 = arith.constant 0 : i32
    %c0_i32_1 = arith.constant 0 : i32
    return %c0_i32, %c0_i32_0 : i32, i32
  }
  func.func @transform_10(%arg0: i32, %arg1: i32) -> (i32, i32) {
    %c0_i32 = arith.constant 0 : i32
    %c0_i32_0 = arith.constant 0 : i32
    %c0_i32_1 = arith.constant 0 : i32
    return %c0_i32, %c0_i32_0 : i32, i32
  }
  func.func @transform_11(%arg0: i32, %arg1: i32) -> (i32, i32) {
    %c0_i32 = arith.constant 0 : i32
    %c0_i32_0 = arith.constant 0 : i32
    %c0_i32_1 = arith.constant 0 : i32
    return %c0_i32, %c0_i32_0 : i32, i32
  }
  func.func @transform_12(%arg0: i32, %arg1: i32) -> (i32, i32, i32) {
    %c0_i32 = arith.constant 0 : i32
    %c0_i32_0 = arith.constant 0 : i32
    return %arg0, %arg1, %c0_i32 : i32, i32, i32
  }
}

module attributes {stable_mosaic.version = 11 : i64} {
  func.func @kernel(%arg0: i32, %arg1: i32, %arg2: memref<1x128x256xf32, #tpu.memory_space<vmem>>, %arg3: memref<1x128x256xf32, #tpu.memory_space<vmem>>, %arg4: memref<1x64x128xbf16, #tpu.memory_space<vmem>>, %arg5: memref<256x256xbf16, #tpu.memory_space<vmem>>, %arg6: memref<1x256xf32, #tpu.memory_space<vmem>>, %arg7: memref<256x512xbf16, #tpu.memory_space<vmem>>, %arg8: memref<1x512xf32, #tpu.memory_space<vmem>>, %arg9: memref<256x256xbf16, #tpu.memory_space<vmem>>, %arg10: memref<1x256xf32, #tpu.memory_space<vmem>>, %arg11: memref<256x256xbf16, #tpu.memory_space<vmem>>, %arg12: memref<1x256xf32, #tpu.memory_space<vmem>>, %arg13: memref<1x256xf32, #tpu.memory_space<vmem>>, %arg14: memref<1x64x256xf32, #tpu.memory_space<vmem>>, %arg15: memref<128x512xbf16, #tpu.memory_space<vmem>>, %arg16: memref<64x256xbf16, #tpu.memory_space<vmem>>) attributes {dimension_semantics = [#tpu.dimension_semantics<parallel>, #tpu.dimension_semantics<arbitrary>], iteration_bounds = array<i64: 2, 2>, scalar_prefetch = 0 : i64, scratch_operands = 2 : i64, tpu.core_type = #tpu.core_type<tc>, window_params = [{transform_indices = @transform_0, window_bounds = array<i64: 1, 128, 256>}, {transform_indices = @transform_1, window_bounds = array<i64: 1, 128, 256>}, {transform_indices = @transform_2, window_bounds = array<i64: 1, 64, 128>}, {pipeline_mode = #tpu.pipeline_mode<synchronous>, transform_indices = @transform_3, window_bounds = array<i64: 256, 256>}, {pipeline_mode = #tpu.pipeline_mode<synchronous>, transform_indices = @transform_4, window_bounds = array<i64: 1, 256>}, {pipeline_mode = #tpu.pipeline_mode<synchronous>, transform_indices = @transform_5, window_bounds = array<i64: 256, 512>}, {pipeline_mode = #tpu.pipeline_mode<synchronous>, transform_indices = @transform_6, window_bounds = array<i64: 1, 512>}, {pipeline_mode = #tpu.pipeline_mode<synchronous>, transform_indices = @transform_7, window_bounds = array<i64: 256, 256>}, {pipeline_mode = #tpu.pipeline_mode<synchronous>, transform_indices = @transform_8, window_bounds = array<i64: 1, 256>}, {pipeline_mode = #tpu.pipeline_mode<synchronous>, transform_indices = @transform_9, window_bounds = array<i64: 256, 256>}, {pipeline_mode = #tpu.pipeline_mode<synchronous>, transform_indices = @transform_10, window_bounds = array<i64: 1, 256>}, {pipeline_mode = #tpu.pipeline_mode<synchronous>, transform_indices = @transform_11, window_bounds = array<i64: 1, 256>}, {transform_indices = @transform_12, window_bounds = array<i64: 1, 64, 256>}]} {
    %c0_i32 = arith.constant 0 : i32
    %0 = arith.cmpi eq, %arg1, %c0_i32 : i32
    %1 = arith.extui %0 : i1 to i32
    %c0_i32_0 = arith.constant 0 : i32
    %2 = arith.cmpi ne, %1, %c0_i32_0 : i32
    scf.if %2 {
      %c0_49 = arith.constant 0 : index
      %c0_50 = arith.constant 0 : index
      %c0_51 = arith.constant 0 : index
      %89 = vector.load %arg2[%c0_49, %c0_50, %c0_51] : memref<1x128x256xf32, #tpu.memory_space<vmem>>, vector<1x128x256xf32>
      %90 = vector.shape_cast %89 : vector<1x128x256xf32> to vector<128x256xf32>
      %c0_52 = arith.constant 0 : index
      %c0_53 = arith.constant 0 : index
      %c0_54 = arith.constant 0 : index
      %91 = vector.load %arg3[%c0_52, %c0_53, %c0_54] : memref<1x128x256xf32, #tpu.memory_space<vmem>>, vector<1x128x256xf32>
      %92 = vector.shape_cast %91 : vector<1x128x256xf32> to vector<128x256xf32>
      %93 = arith.addf %90, %92 : vector<128x256xf32>
      %94 = arith.truncf %93 : vector<128x256xf32> to vector<128x256xbf16>
      %c0_55 = arith.constant 0 : index
      %c0_56 = arith.constant 0 : index
      %95 = vector.load %arg7[%c0_55, %c0_56] : memref<256x512xbf16, #tpu.memory_space<vmem>>, vector<256x256xbf16>
      %cst_57 = arith.constant dense<0.000000e+00> : vector<128x256xf32>
      %96 = tpu.matmul %94, %95, %cst_57 {dimension_numbers = #tpu.dot_dimension_numbers<[1], [0], [0], [1], [0, 0, 1, 1], [], []>} : vector<128x256xbf16>, vector<256x256xbf16>, vector<128x256xf32> -> vector<128x256xf32>
      %c0_58 = arith.constant 0 : index
      %c0_59 = arith.constant 0 : index
      %97 = vector.load %arg8[%c0_58, %c0_59] : memref<1x512xf32, #tpu.memory_space<vmem>>, vector<1x256xf32>
      %98 = vector.broadcast %97 : vector<1x256xf32> to vector<128x256xf32>
      %99 = arith.addf %96, %98 : vector<128x256xf32>
      %100 = arith.truncf %90 : vector<128x256xf32> to vector<128x256xbf16>
      %c0_60 = arith.constant 0 : index
      %c256_61 = arith.constant 256 : index
      %101 = vector.load %arg7[%c0_60, %c256_61] : memref<256x512xbf16, #tpu.memory_space<vmem>>, vector<256x256xbf16>
      %cst_62 = arith.constant dense<0.000000e+00> : vector<128x256xf32>
      %102 = tpu.matmul %100, %101, %cst_62 {dimension_numbers = #tpu.dot_dimension_numbers<[1], [0], [0], [1], [0, 0, 1, 1], [], []>} : vector<128x256xbf16>, vector<256x256xbf16>, vector<128x256xf32> -> vector<128x256xf32>
      %c0_63 = arith.constant 0 : index
      %c256_64 = arith.constant 256 : index
      %103 = vector.load %arg8[%c0_63, %c256_64] : memref<1x512xf32, #tpu.memory_space<vmem>>, vector<1x256xf32>
      %104 = vector.broadcast %103 : vector<1x256xf32> to vector<128x256xf32>
      %105 = arith.addf %102, %104 : vector<128x256xf32>
      %106 = arith.truncf %99 : vector<128x256xf32> to vector<128x256xbf16>
      %c0_65 = arith.constant 0 : index
      %c0_66 = arith.constant 0 : index
      %107 = vector.load %arg15[%c0_65, %c0_66] : memref<128x512xbf16, #tpu.memory_space<vmem>>, vector<128x256xbf16>
      tpu.vector_store %arg15[%c0_65, %c0_66], %106 {strides = array<i32>} : memref<128x512xbf16, #tpu.memory_space<vmem>>, vector<128x256xbf16>,
      %108 = arith.truncf %105 : vector<128x256xf32> to vector<128x256xbf16>
      %c0_67 = arith.constant 0 : index
      %c256_68 = arith.constant 256 : index
      %109 = vector.load %arg15[%c0_67, %c256_68] : memref<128x512xbf16, #tpu.memory_space<vmem>>, vector<128x256xbf16>
      tpu.vector_store %arg15[%c0_67, %c256_68], %108 {strides = array<i32>} : memref<128x512xbf16, #tpu.memory_space<vmem>>, vector<128x256xbf16>,
    } else {
    }
    %c64_i32 = arith.constant 64 : i32
    %3 = arith.muli %arg1, %c64_i32 : i32
    %4 = tpu.assume_multiple %3, 64 : i32
    %c0 = arith.constant 0 : index
    %5 = arith.index_cast %4 : i32 to index
    %c0_1 = arith.constant 0 : index
    %6 = vector.load %arg2[%c0, %5, %c0_1] : memref<1x128x256xf32, #tpu.memory_space<vmem>>, vector<1x64x256xf32>
    %7 = vector.shape_cast %6 : vector<1x64x256xf32> to vector<64x256xf32>
    %c0_2 = arith.constant 0 : index
    %8 = arith.index_cast %4 : i32 to index
    %c0_3 = arith.constant 0 : index
    %9 = vector.load %arg3[%c0_2, %8, %c0_3] : memref<1x128x256xf32, #tpu.memory_space<vmem>>, vector<1x64x256xf32>
    %10 = vector.shape_cast %9 : vector<1x64x256xf32> to vector<64x256xf32>
    %11 = arith.addf %7, %10 : vector<64x256xf32>
    %12 = arith.truncf %11 : vector<64x256xf32> to vector<64x256xbf16>
    %c0_4 = arith.constant 0 : index
    %c0_5 = arith.constant 0 : index
    %13 = vector.load %arg5[%c0_4, %c0_5] : memref<256x256xbf16, #tpu.memory_space<vmem>>, vector<256x256xbf16>
    %cst = arith.constant dense<0.000000e+00> : vector<64x256xf32>
    %14 = tpu.matmul %12, %13, %cst {dimension_numbers = #tpu.dot_dimension_numbers<[1], [0], [0], [1], [0, 0, 1, 1], [], []>} : vector<64x256xbf16>, vector<256x256xbf16>, vector<64x256xf32> -> vector<64x256xf32>
    %c0_6 = arith.constant 0 : index
    %c0_7 = arith.constant 0 : index
    %15 = vector.load %arg6[%c0_6, %c0_7] : memref<1x256xf32, #tpu.memory_space<vmem>>, vector<1x256xf32>
    %16 = vector.broadcast %15 : vector<1x256xf32> to vector<64x256xf32>
    %17 = arith.addf %14, %16 : vector<64x256xf32>
    %c0_8 = arith.constant 0 : index
    %c0_9 = arith.constant 0 : index
    %c0_10 = arith.constant 0 : index
    %18 = vector.load %arg4[%c0_8, %c0_9, %c0_10] : memref<1x64x128xbf16, #tpu.memory_space<vmem>>, vector<1x64x128xbf16>
    %19 = vector.shape_cast %18 : vector<1x64x128xbf16> to vector<64x128xbf16>
    %20 = arith.extf %19 : vector<64x128xbf16> to vector<64x128xf32>
    %21 = vector.extract_strided_slice %17 {offsets = [0, 0], sizes = [64, 128], strides = [1, 1]} : vector<64x256xf32> to vector<64x128xf32>
    %cst_11 = arith.constant 0.0883883461 : f32
    %22 = vector.broadcast %cst_11 : f32 to vector<64x128xf32>
    %23 = arith.mulf %21, %22 : vector<64x128xf32>
    %24 = arith.truncf %23 : vector<64x128xf32> to vector<64x128xbf16>
    %c0_12 = arith.constant 0 : index
    %c0_13 = arith.constant 0 : index
    %25 = vector.load %arg15[%c0_12, %c0_13] : memref<128x512xbf16, #tpu.memory_space<vmem>>, vector<128x128xbf16>
    %c0_14 = arith.constant 0 : index
    %c256 = arith.constant 256 : index
    %26 = vector.load %arg15[%c0_14, %c256] : memref<128x512xbf16, #tpu.memory_space<vmem>>, vector<128x128xbf16>
    "tpu.trace_start"() <{level = 10 : i32, message = "qd,kd->qk"}> : () -> ()
    %cst_15 = arith.constant dense<0.000000e+00> : vector<64x128xf32>
    %27 = tpu.matmul %24, %25, %cst_15 {dimension_numbers = #tpu.dot_dimension_numbers<[1], [1], [0], [0], [0, 0, 1, 0], [], []>} : vector<64x128xbf16>, vector<128x128xbf16>, vector<64x128xf32> -> vector<64x128xf32>
    "tpu.trace_stop"() : () -> ()
    %28 = arith.addf %27, %20 : vector<64x128xf32>
    %cst_16 = arith.constant dense<0xFF800000> : vector<64xf32>
    %29 = vector.multi_reduction <maximumf>, %28, %cst_16 [1] : vector<64x128xf32> to vector<64xf32>
    %30 = vector.shape_cast %29 : vector<64xf32> to vector<64x1xf32>
    %31 = vector.broadcast %30 : vector<64x1xf32> to vector<64x128xf32>
    %32 = arith.subf %28, %31 : vector<64x128xf32>
    %33 = math.exp %32 : vector<64x128xf32>
    %cst_17 = arith.constant dense<0.000000e+00> : vector<64xf32>
    %34 = vector.multi_reduction <add>, %33, %cst_17 [1] : vector<64x128xf32> to vector<64xf32>
    %35 = vector.shape_cast %34 : vector<64xf32> to vector<64x1xf32>
    %36 = tpu.reciprocal %35 {approx = true} : vector<64x1xf32> -> vector<64x1xf32>
    %37 = vector.broadcast %36 : vector<64x1xf32> to vector<64x128xf32>
    %38 = arith.mulf %33, %37 : vector<64x128xf32>
    %39 = arith.truncf %38 : vector<64x128xf32> to vector<64x128xbf16>
    %cst_18 = arith.constant dense<0.000000e+00> : vector<64x128xf32>
    %40 = tpu.matmul %39, %26, %cst_18 {dimension_numbers = #tpu.dot_dimension_numbers<[1], [0], [0], [1], [0, 0, 1, 1], [], []>} : vector<64x128xbf16>, vector<128x128xbf16>, vector<64x128xf32> -> vector<64x128xf32>
    %41 = arith.truncf %40 : vector<64x128xf32> to vector<64x128xbf16>
    %c0_19 = arith.constant 0 : index
    %c0_20 = arith.constant 0 : index
    %42 = vector.load %arg16[%c0_19, %c0_20] : memref<64x256xbf16, #tpu.memory_space<vmem>>, vector<64x128xbf16>
    tpu.vector_store %arg16[%c0_19, %c0_20], %41 {strides = array<i32>} : memref<64x256xbf16, #tpu.memory_space<vmem>>, vector<64x128xbf16>,
    %43 = vector.extract_strided_slice %17 {offsets = [0, 128], sizes = [64, 128], strides = [1, 1]} : vector<64x256xf32> to vector<64x128xf32>
    %cst_21 = arith.constant 0.0883883461 : f32
    %44 = vector.broadcast %cst_21 : f32 to vector<64x128xf32>
    %45 = arith.mulf %43, %44 : vector<64x128xf32>
    %46 = arith.truncf %45 : vector<64x128xf32> to vector<64x128xbf16>
    %c0_22 = arith.constant 0 : index
    %c128 = arith.constant 128 : index
    %47 = vector.load %arg15[%c0_22, %c128] : memref<128x512xbf16, #tpu.memory_space<vmem>>, vector<128x128xbf16>
    %c0_23 = arith.constant 0 : index
    %c384 = arith.constant 384 : index
    %48 = vector.load %arg15[%c0_23, %c384] : memref<128x512xbf16, #tpu.memory_space<vmem>>, vector<128x128xbf16>
    "tpu.trace_start"() <{level = 10 : i32, message = "qd,kd->qk"}> : () -> ()
    %cst_24 = arith.constant dense<0.000000e+00> : vector<64x128xf32>
    %49 = tpu.matmul %46, %47, %cst_24 {dimension_numbers = #tpu.dot_dimension_numbers<[1], [1], [0], [0], [0, 0, 1, 0], [], []>} : vector<64x128xbf16>, vector<128x128xbf16>, vector<64x128xf32> -> vector<64x128xf32>
    "tpu.trace_stop"() : () -> ()
    %50 = arith.addf %49, %20 : vector<64x128xf32>
    %cst_25 = arith.constant dense<0xFF800000> : vector<64xf32>
    %51 = vector.multi_reduction <maximumf>, %50, %cst_25 [1] : vector<64x128xf32> to vector<64xf32>
    %52 = vector.shape_cast %51 : vector<64xf32> to vector<64x1xf32>
    %53 = vector.broadcast %52 : vector<64x1xf32> to vector<64x128xf32>
    %54 = arith.subf %50, %53 : vector<64x128xf32>
    %55 = math.exp %54 : vector<64x128xf32>
    %cst_26 = arith.constant dense<0.000000e+00> : vector<64xf32>
    %56 = vector.multi_reduction <add>, %55, %cst_26 [1] : vector<64x128xf32> to vector<64xf32>
    %57 = vector.shape_cast %56 : vector<64xf32> to vector<64x1xf32>
    %58 = tpu.reciprocal %57 {approx = true} : vector<64x1xf32> -> vector<64x1xf32>
    %59 = vector.broadcast %58 : vector<64x1xf32> to vector<64x128xf32>
    %60 = arith.mulf %55, %59 : vector<64x128xf32>
    %61 = arith.truncf %60 : vector<64x128xf32> to vector<64x128xbf16>
    %cst_27 = arith.constant dense<0.000000e+00> : vector<64x128xf32>
    %62 = tpu.matmul %61, %48, %cst_27 {dimension_numbers = #tpu.dot_dimension_numbers<[1], [0], [0], [1], [0, 0, 1, 1], [], []>} : vector<64x128xbf16>, vector<128x128xbf16>, vector<64x128xf32> -> vector<64x128xf32>
    %63 = arith.truncf %62 : vector<64x128xf32> to vector<64x128xbf16>
    %c0_28 = arith.constant 0 : index
    %c128_29 = arith.constant 128 : index
    %64 = vector.load %arg16[%c0_28, %c128_29] : memref<64x256xbf16, #tpu.memory_space<vmem>>, vector<64x128xbf16>
    tpu.vector_store %arg16[%c0_28, %c128_29], %63 {strides = array<i32>} : memref<64x256xbf16, #tpu.memory_space<vmem>>, vector<64x128xbf16>,
    %c0_30 = arith.constant 0 : index
    %c0_31 = arith.constant 0 : index
    %65 = vector.load %arg16[%c0_30, %c0_31] : memref<64x256xbf16, #tpu.memory_space<vmem>>, vector<64x256xbf16>
    %c0_32 = arith.constant 0 : index
    %c0_33 = arith.constant 0 : index
    %66 = vector.load %arg9[%c0_32, %c0_33] : memref<256x256xbf16, #tpu.memory_space<vmem>>, vector<256x256xbf16>
    %cst_34 = arith.constant dense<0.000000e+00> : vector<64x256xf32>
    %67 = tpu.matmul %65, %66, %cst_34 {dimension_numbers = #tpu.dot_dimension_numbers<[1], [0], [0], [1], [0, 0, 1, 1], [], []>} : vector<64x256xbf16>, vector<256x256xbf16>, vector<64x256xf32> -> vector<64x256xf32>
    %c0_35 = arith.constant 0 : index
    %c0_36 = arith.constant 0 : index
    %68 = vector.load %arg10[%c0_35, %c0_36] : memref<1x256xf32, #tpu.memory_space<vmem>>, vector<1x256xf32>
    %69 = vector.broadcast %68 : vector<1x256xf32> to vector<64x256xf32>
    %70 = arith.addf %67, %69 : vector<64x256xf32>
    %71 = arith.subf %7, %70 : vector<64x256xf32>
    %72 = arith.truncf %71 : vector<64x256xf32> to vector<64x256xbf16>
    %c0_37 = arith.constant 0 : index
    %c0_38 = arith.constant 0 : index
    %73 = vector.load %arg11[%c0_37, %c0_38] : memref<256x256xbf16, #tpu.memory_space<vmem>>, vector<256x256xbf16>
    %cst_39 = arith.constant dense<0.000000e+00> : vector<64x256xf32>
    %74 = tpu.matmul %72, %73, %cst_39 {dimension_numbers = #tpu.dot_dimension_numbers<[1], [0], [0], [1], [0, 0, 1, 1], [], []>} : vector<64x256xbf16>, vector<256x256xbf16>, vector<64x256xf32> -> vector<64x256xf32>
    %c0_40 = arith.constant 0 : index
    %c0_41 = arith.constant 0 : index
    %75 = vector.load %arg12[%c0_40, %c0_41] : memref<1x256xf32, #tpu.memory_space<vmem>>, vector<1x256xf32>
    %76 = vector.broadcast %75 : vector<1x256xf32> to vector<64x256xf32>
    %77 = arith.mulf %74, %76 : vector<64x256xf32>
    %c0_42 = arith.constant 0 : index
    %c0_43 = arith.constant 0 : index
    %78 = vector.load %arg13[%c0_42, %c0_43] : memref<1x256xf32, #tpu.memory_space<vmem>>, vector<1x256xf32>
    %79 = vector.broadcast %78 : vector<1x256xf32> to vector<64x256xf32>
    %80 = arith.addf %77, %79 : vector<64x256xf32>
    %cst_44 = arith.constant 0.000000e+00 : f32
    %81 = vector.broadcast %cst_44 : f32 to vector<64x256xf32>
    %82 = arith.cmpf oge, %80, %81 : vector<64x256xf32>
    %cst_45 = arith.constant 2.000000e-01 : f32
    %83 = vector.broadcast %cst_45 : f32 to vector<64x256xf32>
    %84 = arith.mulf %83, %80 : vector<64x256xf32>
    %85 = arith.select %82, %80, %84 : vector<64x256xi1>, vector<64x256xf32>
    %c0_46 = arith.constant 0 : index
    %c0_47 = arith.constant 0 : index
    %c0_48 = arith.constant 0 : index
    %86 = vector.load %arg14[%c0_46, %c0_47, %c0_48] : memref<1x64x256xf32, #tpu.memory_space<vmem>>, vector<1x64x256xf32>
    %87 = vector.shape_cast %86 : vector<1x64x256xf32> to vector<64x256xf32>
    %88 = vector.shape_cast %85 : vector<64x256xf32> to vector<1x64x256xf32>
    tpu.vector_store %arg14[%c0_46, %c0_47, %c0_48], %88 {strides = array<i32>} : memref<1x64x256xf32, #tpu.memory_space<vmem>>, vector<1x64x256xf32>,
    return
  }
  func.func @transform_0(%arg0: i32, %arg1: i32) -> (i32, i32, i32) {
    %c0_i32 = arith.constant 0 : i32
    %c0_i32_0 = arith.constant 0 : i32
    %c0_i32_1 = arith.constant 0 : i32
    return %arg0, %c0_i32, %c0_i32_0 : i32, i32, i32
  }
  func.func @transform_1(%arg0: i32, %arg1: i32) -> (i32, i32, i32) {
    %c0_i32 = arith.constant 0 : i32
    %c0_i32_0 = arith.constant 0 : i32
    %c0_i32_1 = arith.constant 0 : i32
    return %arg0, %c0_i32, %c0_i32_0 : i32, i32, i32
  }
  func.func @transform_2(%arg0: i32, %arg1: i32) -> (i32, i32, i32) {
    %c0_i32 = arith.constant 0 : i32
    %c0_i32_0 = arith.constant 0 : i32
    %c0_i32_1 = arith.constant 0 : i32
    return %c0_i32, %arg1, %c0_i32_0 : i32, i32, i32
  }
  func.func @transform_3(%arg0: i32, %arg1: i32) -> (i32, i32) {
    %c0_i32 = arith.constant 0 : i32
    %c0_i32_0 = arith.constant 0 : i32
    %c0_i32_1 = arith.constant 0 : i32
    return %c0_i32, %c0_i32_0 : i32, i32
  }
  func.func @transform_4(%arg0: i32, %arg1: i32) -> (i32, i32) {
    %c0_i32 = arith.constant 0 : i32
    %c0_i32_0 = arith.constant 0 : i32
    %c0_i32_1 = arith.constant 0 : i32
    return %c0_i32, %c0_i32_0 : i32, i32
  }
  func.func @transform_5(%arg0: i32, %arg1: i32) -> (i32, i32) {
    %c0_i32 = arith.constant 0 : i32
    %c0_i32_0 = arith.constant 0 : i32
    %c0_i32_1 = arith.constant 0 : i32
    return %c0_i32, %c0_i32_0 : i32, i32
  }
  func.func @transform_6(%arg0: i32, %arg1: i32) -> (i32, i32) {
    %c0_i32 = arith.constant 0 : i32
    %c0_i32_0 = arith.constant 0 : i32
    %c0_i32_1 = arith.constant 0 : i32
    return %c0_i32, %c0_i32_0 : i32, i32
  }
  func.func @transform_7(%arg0: i32, %arg1: i32) -> (i32, i32) {
    %c0_i32 = arith.constant 0 : i32
    %c0_i32_0 = arith.constant 0 : i32
    %c0_i32_1 = arith.constant 0 : i32
    return %c0_i32, %c0_i32_0 : i32, i32
  }
  func.func @transform_8(%arg0: i32, %arg1: i32) -> (i32, i32) {
    %c0_i32 = arith.constant 0 : i32
    %c0_i32_0 = arith.constant 0 : i32
    %c0_i32_1 = arith.constant 0 : i32
    return %c0_i32, %c0_i32_0 : i32, i32
  }
  func.func @transform_9(%arg0: i32, %arg1: i32) -> (i32, i32) {
    %c0_i32 = arith.constant 0 : i32
    %c0_i32_0 = arith.constant 0 : i32
    %c0_i32_1 = arith.constant 0 : i32
    return %c0_i32, %c0_i32_0 : i32, i32
  }
  func.func @transform_10(%arg0: i32, %arg1: i32) -> (i32, i32) {
    %c0_i32 = arith.constant 0 : i32
    %c0_i32_0 = arith.constant 0 : i32
    %c0_i32_1 = arith.constant 0 : i32
    return %c0_i32, %c0_i32_0 : i32, i32
  }
  func.func @transform_11(%arg0: i32, %arg1: i32) -> (i32, i32) {
    %c0_i32 = arith.constant 0 : i32
    %c0_i32_0 = arith.constant 0 : i32
    %c0_i32_1 = arith.constant 0 : i32
    return %c0_i32, %c0_i32_0 : i32, i32
  }
  func.func @transform_12(%arg0: i32, %arg1: i32) -> (i32, i32, i32) {
    %c0_i32 = arith.constant 0 : i32
    %c0_i32_0 = arith.constant 0 : i32
    return %arg0, %arg1, %c0_i32 : i32, i32, i32
  }
}

</mosaic_0001>

<bundles_post_ra>
// kernel: template_self_layer_forward.1
= control target key start
LH: loop header
LB: loop body
LE: loop exit
PB: predicated region body
PF: predicated region fallthrough
CT: control target
= control target key end

     0   :  { %s4447_s21 = smov 0   ;;  %s4449_s22 = smov 0   ;;  %s5421_s0 = inlined_call_operand.vmem [shape: f32[2,128,256], index: 0, kind: input, shape index: {}]   ;;  %s5422_s1 = inlined_call_operand.vmem [shape: f32[2,128,256], index: 1, kind: input, shape index: {}]   ;;  %s5423_s2 = inlined_call_operand.vmem [shape: bf16[1,128,128], index: 2, kind: input, shape index: {}]   ;;  %s5424_s3 = inlined_call_operand.vmem [shape: bf16[256,256], index: 3, kind: input, shape index: {}]   ;;  %s5425_s4 = inlined_call_operand.vmem [shape: f32[1,256], index: 4, kind: input, shape index: {}]   ;;  %s5426_s5 = inlined_call_operand.vmem [shape: bf16[256,512], index: 5, kind: input, shape index: {}]   ;;  %s5427_s6 = inlined_call_operand.vmem [shape: f32[1,512], index: 6, kind: input, shape index: {}]   ;;  %s5428_s7 = inlined_call_operand.vmem [shape: bf16[256,256], index: 7, kind: input, shape index: {}]   ;;  %s5429_s8 = inlined_call_operand.vmem [shape: f32[1,256], index: 8, kind: input, shape index: {}]   ;;  %s5430_s9 = inlined_call_operand.vmem [shape: bf16[256,256], index: 9, kind: input, shape index: {}]   ;;  %s5431_s10 = inlined_call_operand.vmem [shape: f32[1,256], index: 10, kind: input, shape index: {}]   ;;  %s5432_s11 = inlined_call_operand.vmem [shape: f32[1,256], index: 11, kind: input, shape index: {}]   ;;  %s5433_s12 = inlined_call_operand.vmem [shape: f32[2,128,256], index: 12, kind: output, shape index: {}]  }
   0x1   :  { %5437 = sst [smem:[#allocation9_spill]] %s5432_s11  ;;  %s4451_s23 = smov 0  }
   0x2   :  { %s4453_s24 = smov 0   ;;  %s4455_s25 = smov 0  }
   0x3 LB: > { %5438 = sst [smem:[#allocation4_spill]] %s4372_s23  ;;  %s31_s26 = sadd.s32 1, %s4372_s23  ;;  %s4380_s25 = sphi %s4455_s25, %s22_s25   ;;  %s4376_s24 = sphi %s4453_s24, %s5448_s24   ;;  %s4372_s23 = sphi %s4451_s23, %s5447_s23   ;;  %s4368_s22 = sphi %s4449_s22, %s5446_s22   ;;  %s4364_s21 = sphi %s4447_s21, %s5445_s21  }
   0x4   : > { %5439 = sst [smem:[#allocation5_spill]] %s4376_s24  ;;  %s34_s27 = sadd.s32 1, %s4376_s24 }
   0x5   : > { %5440 = sst [smem:[#allocation6_spill]] %s4380_s25  ;;  %p32_p0 = scmp.ge.s32.totalorder %s31_s26, 2 }
   0x6   : > { %p3457_p1 = scmp.ge.s32.totalorder %s4380_s25, 1  ;;  %p397_p2 = scmp.lt.s32.totalorder %s4380_s25, 5 }
   0x7   : > { %s5450_s26 = smov (%p32_p0, %s31_s26), 0  ;;  %s5452_s27 = smov (!%p32_p0, %s34_s27), %s4376_s24 }
   0x8   : > { %5441 = sst [smem:[#allocation7_spill]] %s5450_s26  ;;  %p398_p3 = pnand %p3457_p1, %p397_p2 }
   0x9   : > { %p36_p4 = scmp.ge.s32.totalorder %s5452_s27, 2  ;;  %p454_p5 = scmp.lt.s32.totalorder (!%p398_p3), %s4368_s22, 1 }
   0xa   : > { %401 = sbr.rel (%p398_p3) target bundleno = 1855 (0x73f), region = 68  ;;  %s3462_s28 = sshll.u32 (!%p398_p3), %s4364_s21, 3 }
   0xb   : > { %s5454_s27 = smov (%p36_p4, %s5452_s27), 0  ;;  %p465_p6 = scmp.lt.s32.totalorder (!%p398_p3), %s3462_s28, 15 }
   0xc   : > { %5442 = sst [smem:[#allocation8_spill]] %s5454_s27  ;;  %p3468_p7 = scmp.ne.s32.totalorder (!%p398_p3), %s4364_s21, 0 }
   0xf   : > { %s5456_s22 = smov (!%p454_p5, %s4368_s22), 1  ;;  %s5458_s28 = smov (!%p465_p6, %s3462_s28), 15 }
  0x10   : > { %s3723_s29 = sshll.u32 %s5456_s22, 8  ;;  %s3466_s30 = sshll.u32 %s5456_s22, 5 }
  0x11   : > { %s4483_s15 = scalar_lea.vmem %s5421_s0, %s3723_s29  ;;  %s4488_s18 = scalar_lea.vmem %s5422_s1, %s3723_s29 }
  0x12   : > { %s3463_s19 = sshll.u32 %s5458_s28, 2  ;;  %s3465_s20 = sshll.u32 %s5458_s28, 1 }
  0x13   : > { %s4493_s24 = scalar_lea.vmem %s5423_s2, %s3463_s19  ;;  %s477_s23 = sadd.s32 %s3466_s30, %s3465_s20 }
  0x14   : > { %s3467_s25 = sshll.u32 %s477_s23, 3  ;;  %485 = sbr.rel (%p3468_p7) target bundleno = 350 (0x15e), region = 72 }
  0x15   : > { %s4498_s13 = scalar_lea.vmem %s5433_s12, %s3467_s25 }
  0x19   : > { %v3978_v0 = vld [vmem:[%s5426_s5 + $0xe4] ss:$16 sps:$4 sm:$0xff]   ;;  %v3980_v1 = vld [vmem:[%s5426_s5 + $0xec] ss:$16 sps:$4 sm:$0xff]   ;;  %v3982_v2 = vld [vmem:[%s5426_s5 + $0xe0] ss:$16 sps:$4 sm:$0xff]  }
  0x1a   : > { %802 = vmatprep.subr.bf16.mxu0 %v3978_v0  ;;  %v3983_v3 = vld [vmem:[%s5426_s5 + $0xe8] ss:$16 sps:$4 sm:$0xff]   ;;  %1135 = vmatprep.subr.bf16.mxu1 %v3980_v1  ;;  %v3984_v4 = vld [vmem:[%s5426_s5 + $0xc4] ss:$16 sps:$4 sm:$0xff]   ;;  %v3986_v5 = vld [vmem:[%s5426_s5 + $0xcc] ss:$16 sps:$4 sm:$0xff]  }
  0x1b   : > { %803 = vmatpush1.bf16.msra.mxu0 %v3982_v2  ;;  %1136 = vmatpush1.bf16.msra.mxu1 %v3983_v3  ;;  %v3988_v6 = vld [vmem:[%s5426_s5 + $0xc0] ss:$16 sps:$4 sm:$0xff]   ;;  %v3989_v7 = vld [vmem:[%s5426_s5 + $0xc8] ss:$16 sps:$4 sm:$0xff]   ;;  %v3990_v8 = vld [vmem:[%s5426_s5 + $0xa4] ss:$16 sps:$4 sm:$0xff]  }
  0x1c   : > { %804 = vmatprep.subr.bf16.mxu0 %v3984_v4  ;;  %1137 = vmatprep.subr.bf16.mxu1 %v3986_v5  ;;  %v3992_v9 = vld [vmem:[%s5426_s5 + $0xac] ss:$16 sps:$4 sm:$0xff]   ;;  %v3994_v10 = vld [vmem:[%s5426_s5 + $0xa0] ss:$16 sps:$4 sm:$0xff]   ;;  %v3995_v11 = vld [vmem:[%s5426_s5 + $0xa8] ss:$16 sps:$4 sm:$0xff]  }
  0x1d   : > { %v3996_v12 = vld [vmem:[%s5426_s5 + $0x84] ss:$16 sps:$4 sm:$0xff]   ;;  %v3998_v13 = vld [vmem:[%s5426_s5 + $0x8c] ss:$16 sps:$4 sm:$0xff]   ;;  %v4000_v14 = vld [vmem:[%s5426_s5 + $0x80] ss:$16 sps:$4 sm:$0xff]  }
  0x1e   : > { %v4001_v15 = vld [vmem:[%s5426_s5 + $0x88] ss:$16 sps:$4 sm:$0xff]   ;;  %v4002_v16 = vld [vmem:[%s5426_s5 + $0x64] ss:$16 sps:$4 sm:$0xff]   ;;  %v4004_v17 = vld [vmem:[%s5426_s5 + $0x6c] ss:$16 sps:$4 sm:$0xff]  }
  0x1f   : > { %805 = vmatpush1.bf16.msra.mxu0 %v3988_v6  ;;  %1138 = vmatpush1.bf16.msra.mxu1 %v3989_v7  ;;  %v4006_v18 = vld [vmem:[%s5426_s5 + $0x60] ss:$16 sps:$4 sm:$0xff]   ;;  %v4007_v19 = vld [vmem:[%s5426_s5 + $0x68] ss:$16 sps:$4 sm:$0xff]   ;;  %v4008_v20 = vld [vmem:[%s5426_s5 + $0x44] ss:$16 sps:$4 sm:$0xff]  }
  0x20   : > { %806 = vmatprep.subr.bf16.mxu0 %v3990_v8  ;;  %1139 = vmatprep.subr.bf16.mxu1 %v3992_v9  ;;  %v4010_v21 = vld [vmem:[%s5426_s5 + $0x4c] ss:$16 sps:$4 sm:$0xff]   ;;  %v4012_v22 = vld [vmem:[%s5426_s5 + $0x40] ss:$16 sps:$4 sm:$0xff]   ;;  %v4013_v23 = vld [vmem:[%s5426_s5 + $0x48] ss:$16 sps:$4 sm:$0xff]  }
  0x21   : > { %v4014_v24 = vld [vmem:[%s5426_s5 + $0x24] ss:$16 sps:$4 sm:$0xff]   ;;  %v4016_v25 = vld [vmem:[%s5426_s5 + $0x2c] ss:$16 sps:$4 sm:$0xff]   ;;  %v4018_v26 = vld [vmem:[%s5426_s5 + $0x20] ss:$16 sps:$4 sm:$0xff]  }
  0x22   : > { %v4019_v27 = vld [vmem:[%s5426_s5 + $0x28] ss:$16 sps:$4 sm:$0xff]   ;;  %v4020_v28 = vld [vmem:[%s5426_s5 + $0x4] ss:$16 sps:$4 sm:$0xff]   ;;  %v4022_v29 = vld [vmem:[%s5426_s5 + $0xc] ss:$16 sps:$4 sm:$0xff]  }
  0x23   : > { %807 = vmatpush1.bf16.msra.mxu0 %v3994_v10  ;;  %1140 = vmatpush1.bf16.msra.mxu1 %v3995_v11  ;;  %v4024_v30 = vld [vmem:[%s5426_s5] ss:$16 sps:$4 sm:$0xff]   ;;  %v4025_v31 = vld [vmem:[%s5426_s5 + $0x8] ss:$16 sps:$4 sm:$0xff]   ;;  %v4026_v32 = vld [vmem:[%s5426_s5 + $0x1e4] ss:$16 sps:$4 sm:$0xff]  }
  0x24   : > { %808 = vmatprep.subr.bf16.mxu0 %v3996_v12  ;;  %1141 = vmatprep.subr.bf16.mxu1 %v3998_v13  ;;  %v4028_v33 = vld [vmem:[%s5426_s5 + $0x1ec] ss:$16 sps:$4 sm:$0xff]   ;;  %v4030_v34 = vld [vmem:[%s5426_s5 + $0x1e0] ss:$16 sps:$4 sm:$0xff]   ;;  %v4031_v35 = vld [vmem:[%s5426_s5 + $0x1e8] ss:$16 sps:$4 sm:$0xff]  }
  0x25   : > { %v4032_v36 = vld [vmem:[%s5426_s5 + $0x1c4] ss:$16 sps:$4 sm:$0xff]   ;;  %v4034_v37 = vld [vmem:[%s5426_s5 + $0x1cc] ss:$16 sps:$4 sm:$0xff]   ;;  %v4036_v38 = vld [vmem:[%s5426_s5 + $0x1c0] ss:$16 sps:$4 sm:$0xff]  }
  0x26   : > { %v4037_v39 = vld [vmem:[%s5426_s5 + $0x1c8] ss:$16 sps:$4 sm:$0xff]   ;;  %v4038_v40 = vld [vmem:[%s5426_s5 + $0x1a4] ss:$16 sps:$4 sm:$0xff]   ;;  %v4040_v41 = vld [vmem:[%s5426_s5 + $0x1ac] ss:$16 sps:$4 sm:$0xff]  }
  0x27   : > { %809 = vmatpush1.bf16.msra.mxu0 %v4000_v14  ;;  %1142 = vmatpush1.bf16.msra.mxu1 %v4001_v15  ;;  %v4042_v42 = vld [vmem:[%s5426_s5 + $0x1a0] ss:$16 sps:$4 sm:$0xff]   ;;  %v4043_v43 = vld [vmem:[%s5426_s5 + $0x1a8] ss:$16 sps:$4 sm:$0xff]   ;;  %v4044_v44 = vld [vmem:[%s5426_s5 + $0x184] ss:$16 sps:$4 sm:$0xff]  }
  0x28   : > { %810 = vmatprep.subr.bf16.mxu0 %v4002_v16  ;;  %1143 = vmatprep.subr.bf16.mxu1 %v4004_v17  ;;  %v4046_v45 = vld [vmem:[%s5426_s5 + $0x18c] ss:$16 sps:$4 sm:$0xff]   ;;  %v4048_v50 = vld [vmem:[%s5426_s5 + $0x180] ss:$16 sps:$4 sm:$0xff]   ;;  %v4049_v51 = vld [vmem:[%s5426_s5 + $0x188] ss:$16 sps:$4 sm:$0xff]  }
  0x29   : > { %v487_v46 = vld [vmem:[%s4483_s15 + $0x8] sm:$0xff]  ;;  %v489_v47 = vld [vmem:[%s4483_s15 + $0x18] sm:$0xff]  ;;  %v4050_v55 = vld [vmem:[%s5426_s5 + $0x164] ss:$16 sps:$4 sm:$0xff]  }
  0x2a   : > { %v519_v48 = vld [vmem:[%s4488_s18 + $0x8] sm:$0xff]  ;;  %v521_v49 = vld [vmem:[%s4488_s18 + $0x18] sm:$0xff]  ;;  %v916_v54 = vpack.c.bf16 %v489_v47, %v487_v46  ;;  %v4054_v58 = vld [vmem:[%s5426_s5 + $0x160] ss:$16 sps:$4 sm:$0xff]  }
  0x2b   : > { %811 = vmatpush1.bf16.msra.mxu0 %v4006_v18  ;;  %1144 = vmatpush1.bf16.msra.mxu1 %v4007_v19  ;;  %v551_v52 = vadd.f32 %v519_v48, %v487_v46  ;;  %v553_v53 = vadd.f32 %v521_v49, %v489_v47  ;;  %v4052_v56 = vld [vmem:[%s5426_s5 + $0x16c] ss:$16 sps:$4 sm:$0xff]   ;;  %v4055_v59 = vld [vmem:[%s5426_s5 + $0x168] ss:$16 sps:$4 sm:$0xff]   ;;  %v4056_v60 = vld [vmem:[%s5426_s5 + $0x144] ss:$16 sps:$4 sm:$0xff]  }
  0x2c   : > { %812 = vmatprep.subr.bf16.mxu0 %v4008_v20  ;;  %1145 = vmatprep.subr.bf16.mxu1 %v4010_v21  ;;  %v4058_v61 = vld [vmem:[%s5426_s5 + $0x14c] ss:$16 sps:$4 sm:$0xff]   ;;  %v4060_v62 = vld [vmem:[%s5426_s5 + $0x140] ss:$16 sps:$4 sm:$0xff]   ;;  %v4061_v63 = vld [vmem:[%s5426_s5 + $0x148] ss:$16 sps:$4 sm:$0xff]  }
  0x2d   : > { %v583_v57 = vpack.c.bf16 %v553_v53, %v551_v52  ;;  %1167 = vmatprep.mubr.bf16.mxu1 %v916_v54  ;;  %v4062_v0 = vld [vmem:[%s5426_s5 + $0x124] ss:$16 sps:$4 sm:$0xff]   ;;  %v4064_v1 = vld [vmem:[%s5426_s5 + $0x12c] ss:$16 sps:$4 sm:$0xff]   ;;  %v4066_v2 = vld [vmem:[%s5426_s5 + $0x120] ss:$16 sps:$4 sm:$0xff]  }
  0x2e   : > { %v4067_v3 = vld [vmem:[%s5426_s5 + $0x128] ss:$16 sps:$4 sm:$0xff]   ;;  %v4068_v4 = vld [vmem:[%s5426_s5 + $0x104] ss:$16 sps:$4 sm:$0xff]   ;;  %v4070_v5 = vld [vmem:[%s5426_s5 + $0x10c] ss:$16 sps:$4 sm:$0xff]  }
  0x2f   : > { %813 = vmatpush1.bf16.msra.mxu0 %v4012_v22  ;;  %1146 = vmatpush1.bf16.msra.mxu1 %v4013_v23  ;;  %v486_v6 = vld [vmem:[%s4483_s15] sm:$0xff]  ;;  %v488_v7 = vld [vmem:[%s4483_s15 + $0x10] sm:$0xff]  ;;  %v491_v10 = vld [vmem:[%s4483_s15 + $0x28] sm:$0xff] }
  0x30   : > { %814 = vmatprep.subr.bf16.mxu0 %v4014_v24  ;;  %1147 = vmatprep.subr.bf16.mxu1 %v4016_v25  ;;  %v518_v8 = vld [vmem:[%s4488_s18] sm:$0xff]  ;;  %v520_v9 = vld [vmem:[%s4488_s18 + $0x10] sm:$0xff]  ;;  %v493_v11 = vld [vmem:[%s4483_s15 + $0x38] sm:$0xff]  ;;  %v915_v21 = vpack.c.bf16 %v488_v7, %v486_v6 }
  0x31   : > { %834 = vmatprep.mubr.bf16.mxu0 %v583_v57  ;;  %v523_v12 = vld [vmem:[%s4488_s18 + $0x28] sm:$0xff]  ;;  %v525_v13 = vld [vmem:[%s4488_s18 + $0x38] sm:$0xff]  ;;  %v550_v14 = vadd.f32 %v518_v8, %v486_v6  ;;  %v552_v15 = vadd.f32 %v520_v9, %v488_v7  ;;  %v4072_v16 = vld [vmem:[%s5426_s5 + $0x100] ss:$16 sps:$4 sm:$0xff]   ;;  %v918_v25 = vpack.c.bf16 %v493_v11, %v491_v10 }
  0x32   : > { %v4073_v17 = vld [vmem:[%s5426_s5 + $0x108] ss:$16 sps:$4 sm:$0xff]   ;;  %v555_v18 = vadd.f32 %v523_v12, %v491_v10  ;;  %v557_v19 = vadd.f32 %v525_v13, %v493_v11  ;;  %v490_v22 = vld [vmem:[%s4483_s15 + $0x20] sm:$0xff]  ;;  %v492_v23 = vld [vmem:[%s4483_s15 + $0x30] sm:$0xff] }
  0x33   : > { %815 = vmatpush1.bf16.msra.mxu0 %v4018_v26  ;;  %1148 = vmatpush1.bf16.msra.mxu1 %v4019_v27  ;;  %v582_v20 = vpack.c.bf16 %v552_v15, %v550_v14  ;;  %v522_v26 = vld [vmem:[%s4488_s18 + $0x20] sm:$0xff]  ;;  %v524_v27 = vld [vmem:[%s4488_s18 + $0x30] sm:$0xff]  ;;  %v531_v46 = vld [vmem:[%s4488_s18 + $0x68] sm:$0xff] }
  0x34   : > { %816 = vmatprep.subr.bf16.mxu0 %v4020_v28  ;;  %1149 = vmatprep.subr.bf16.mxu1 %v4022_v29  ;;  %v585_v24 = vpack.c.bf16 %v557_v19, %v555_v18  ;;  %v495_v28 = vld [vmem:[%s4483_s15 + $0x48] sm:$0xff]  ;;  %v497_v29 = vld [vmem:[%s4483_s15 + $0x58] sm:$0xff]  ;;  %v498_v54 = vld [vmem:[%s4483_s15 + $0x60] sm:$0xff] }
  0x35   : > { %v533_v47 = vld [vmem:[%s4488_s18 + $0x78] sm:$0xff]  ;;  %v502_v6 = vld [vmem:[%s4483_s15 + $0x80] sm:$0xff]  ;;  %v504_v7 = vld [vmem:[%s4483_s15 + $0x90] sm:$0xff] }
  0x36   : > { %v534_v10 = vld [vmem:[%s4488_s18 + $0x80] sm:$0xff]  ;;  %v536_v11 = vld [vmem:[%s4488_s18 + $0x90] sm:$0xff]  ;;  %v507_v12 = vld [vmem:[%s4483_s15 + $0xa8] sm:$0xff] }
  0x37   : > { %817 = vmatpush1.bf16.msra.mxu0 %v4024_v30  ;;  %1150 = vmatpush1.bf16.msra.mxu1 %v4025_v31  ;;  %v527_v30 = vld [vmem:[%s4488_s18 + $0x48] sm:$0xff]  ;;  %v529_v31 = vld [vmem:[%s4488_s18 + $0x58] sm:$0xff] }
  0x38   : > { %818 = vmatprep.subr.bf16.mxu0 %v4026_v32  ;;  %1151 = vmatprep.subr.bf16.mxu1 %v4028_v33  ;;  %v554_v32 = vadd.f32 %v522_v26, %v490_v22  ;;  %v556_v33 = vadd.f32 %v524_v27, %v492_v23  ;;  %v509_v13 = vld [vmem:[%s4483_s15 + $0xb8] sm:$0xff]  ;;  %v539_v14 = vld [vmem:[%s4488_s18 + $0xa8] sm:$0xff]  ;;  %v538_v26 = vld [vmem:[%s4488_s18 + $0xa0] sm:$0xff] }
  0x39   : > { %v541_v15 = vld [vmem:[%s4488_s18 + $0xb8] sm:$0xff]  ;;  %v571_v18 = vadd.f32 %v539_v14, %v507_v12  ;;  %v540_v27 = vld [vmem:[%s4488_s18 + $0xb0] sm:$0xff] }
  0x3a   : > { %v573_v19 = vadd.f32 %v541_v15, %v509_v13 }
  0x3b   : > { %819 = vmatpush2.bf16.msra.mxu0 %v4030_v34  ;;  %1152 = vmatpush2.bf16.msra.mxu1 %v4031_v35  ;;  %v559_v34 = vadd.f32 %v527_v30, %v495_v28  ;;  %v561_v35 = vadd.f32 %v529_v31, %v497_v29  ;;  %v543_v30 = vld [vmem:[%s4488_s18 + $0xc8] sm:$0xff]  ;;  %v545_v31 = vld [vmem:[%s4488_s18 + $0xd8] sm:$0xff] }
  0x3c   : > { %820 = vmatprep.subr.bf16.mxu0 %v4032_v36  ;;  %1153 = vmatprep.subr.bf16.mxu1 %v4034_v37  ;;  %v584_v36 = vpack.c.bf16 %v556_v33, %v554_v32  ;;  %v917_v37 = vpack.c.bf16 %v492_v23, %v490_v22  ;;  %v506_v22 = vld [vmem:[%s4483_s15 + $0xa0] sm:$0xff]  ;;  %v508_v23 = vld [vmem:[%s4483_s15 + $0xb0] sm:$0xff] }
  0x3d   : > { %v570_v32 = vadd.f32 %v538_v26, %v506_v22  ;;  %v572_v33 = vadd.f32 %v540_v27, %v508_v23 }
  0x3f   : > { %821 = vmatpush2.bf16.msra.mxu0 %v4036_v38  ;;  %1154 = vmatpush2.bf16.msra.mxu1 %v4037_v39  ;;  %v494_v38 = vld [vmem:[%s4483_s15 + $0x40] sm:$0xff]  ;;  %v496_v39 = vld [vmem:[%s4483_s15 + $0x50] sm:$0xff] }
  0x40   : > { %822 = vmatprep.subr.bf16.mxu0 %v4038_v40  ;;  %1155 = vmatprep.subr.bf16.mxu1 %v4040_v41  ;;  %v587_v40 = vpack.c.bf16 %v561_v35, %v559_v34  ;;  %v920_v41 = vpack.c.bf16 %v497_v29, %v495_v28  ;;  %v919_v53 = vpack.c.bf16 %v496_v39, %v494_v38  ;;  %v511_v28 = vld [vmem:[%s4483_s15 + $0xc8] sm:$0xff]  ;;  %v513_v29 = vld [vmem:[%s4483_s15 + $0xd8] sm:$0xff] }
  0x41   : > { %v575_v34 = vadd.f32 %v543_v30, %v511_v28  ;;  %v577_v35 = vadd.f32 %v545_v31, %v513_v29 }
  0x43   : > { %823 = vmatpush2.bf16.msra.mxu0 %v4042_v42  ;;  %1156 = vmatpush2.bf16.msra.mxu1 %v4043_v43  ;;  %v526_v42 = vld [vmem:[%s4488_s18 + $0x40] sm:$0xff]  ;;  %v528_v43 = vld [vmem:[%s4488_s18 + $0x50] sm:$0xff] }
  0x44   : > { %824 = vmatprep.subr.bf16.mxu0 %v4044_v44  ;;  %1157 = vmatprep.subr.bf16.mxu1 %v4046_v45  ;;  %v499_v44 = vld [vmem:[%s4483_s15 + $0x68] sm:$0xff]  ;;  %v501_v45 = vld [vmem:[%s4483_s15 + $0x78] sm:$0xff]  ;;  %v558_v48 = vadd.f32 %v526_v42, %v494_v38  ;;  %v560_v49 = vadd.f32 %v528_v43, %v496_v39  ;;  %v510_v38 = vld [vmem:[%s4483_s15 + $0xc0] sm:$0xff] }
  0x45   : > { %v922_v57 = vpack.c.bf16 %v501_v45, %v499_v44  ;;  %v512_v39 = vld [vmem:[%s4483_s15 + $0xd0] sm:$0xff]  ;;  %v542_v42 = vld [vmem:[%s4488_s18 + $0xc0] sm:$0xff] }
  0x46   : > { %v586_v52 = vpack.c.bf16 %v560_v49, %v558_v48  ;;  %v544_v43 = vld [vmem:[%s4488_s18 + $0xd0] sm:$0xff]  ;;  %v574_v48 = vadd.f32 %v542_v42, %v510_v38 }
  0x47   : > { %825 = vmatpush2.bf16.msra.mxu0 %v4048_v50  ;;  %1158 = vmatpush2.bf16.msra.mxu1 %v4049_v51  ;;  %v563_v50 = vadd.f32 %v531_v46, %v499_v44  ;;  %v565_v51 = vadd.f32 %v533_v47, %v501_v45  ;;  %v515_v44 = vld [vmem:[%s4483_s15 + $0xe8] sm:$0xff]  ;;  %v517_v45 = vld [vmem:[%s4483_s15 + $0xf8] sm:$0xff]  ;;  %v576_v49 = vadd.f32 %v544_v43, %v512_v39 }
  0x48   : > { %826 = vmatprep.subr.bf16.mxu0 %v4050_v55  ;;  %1159 = vmatprep.subr.bf16.mxu1 %v4052_v56  ;;  %v500_v55 = vld [vmem:[%s4483_s15 + $0x70] sm:$0xff]  ;;  %v547_v46 = vld [vmem:[%s4488_s18 + $0xe8] sm:$0xff]  ;;  %v549_v47 = vld [vmem:[%s4488_s18 + $0xf8] sm:$0xff] }
  0x49   : > { %v589_v56 = vpack.c.bf16 %v565_v51, %v563_v50  ;;  %v579_v50 = vadd.f32 %v547_v46, %v515_v44  ;;  %v581_v51 = vadd.f32 %v549_v47, %v517_v45 }
  0x4b   : > { %827 = vmatpush2.bf16.msra.mxu0 %v4054_v58  ;;  %1160 = vmatpush2.bf16.msra.mxu1 %v4055_v59  ;;  %v530_v58 = vld [vmem:[%s4488_s18 + $0x60] sm:$0xff]  ;;  %v532_v59 = vld [vmem:[%s4488_s18 + $0x70] sm:$0xff] }
  0x4c   : > { %828 = vmatprep.subr.bf16.mxu0 %v4056_v60  ;;  %1161 = vmatprep.subr.bf16.mxu1 %v4058_v61  ;;  %v503_v60 = vld [vmem:[%s4483_s15 + $0x88] sm:$0xff]  ;;  %v505_v61 = vld [vmem:[%s4483_s15 + $0x98] sm:$0xff] }
  0x4d   : > { %v924_v9 = vpack.c.bf16 %v505_v61, %v503_v60 }
  0x4f   : > { %829 = vmatpush2.bf16.msra.mxu0 %v4060_v62  ;;  %1162 = vmatpush2.bf16.msra.mxu1 %v4061_v63  ;;  %v535_v62 = vld [vmem:[%s4488_s18 + $0x88] sm:$0xff]  ;;  %v537_v63 = vld [vmem:[%s4488_s18 + $0x98] sm:$0xff] }
  0x50   : > { %830 = vmatprep.subr.bf16.mxu0 %v4062_v0  ;;  %1163 = vmatprep.subr.bf16.mxu1 %v4064_v1  ;;  %v562_v0 = vadd.f32 %v530_v58, %v498_v54  ;;  %v564_v1 = vadd.f32 %v532_v59, %v500_v55  ;;  %v546_v58 = vld [vmem:[%s4488_s18 + $0xe0] sm:$0xff]  ;;  %v548_v59 = vld [vmem:[%s4488_s18 + $0xf0] sm:$0xff] }
  0x53   : > { %831 = vmatpush2.bf16.msra.mxu0 %v4066_v2  ;;  %1164 = vmatpush2.bf16.msra.mxu1 %v4067_v3  ;;  %v567_v2 = vadd.f32 %v535_v62, %v503_v60  ;;  %v569_v3 = vadd.f32 %v537_v63, %v505_v61 }
  0x54   : > { %832 = vmatprep.subr.bf16.mxu0 %v4068_v4  ;;  %1165 = vmatprep.subr.bf16.mxu1 %v4070_v5  ;;  %v588_v4 = vpack.c.bf16 %v564_v1, %v562_v0  ;;  %v921_v5 = vpack.c.bf16 %v500_v55, %v498_v54  ;;  %v514_v54 = vld [vmem:[%s4483_s15 + $0xe0] sm:$0xff]  ;;  %v597_v55 = vpack.c.bf16 %v581_v51, %v579_v50  ;;  %v632_v0 = vlaneseq }
  0x55   : > { %v591_v8 = vpack.c.bf16 %v569_v3, %v567_v2  ;;  %v578_v60 = vadd.f32 %v546_v58, %v514_v54 }
  0x56   : > { %v633_v1 = vshrl.u32 %v632_v0, 7 }
  0x57   : > { %833 = vmatpush2.bf16.msra.mxu0 %v4072_v16  ;;  %1166 = vmatpush2.bf16.msra.mxu1 %v4073_v17  ;;  %v566_v16 = vadd.f32 %v534_v10, %v502_v6  ;;  %v568_v17 = vadd.f32 %v536_v11, %v504_v7 }
  0x58   : > { %v634_v2 = vsub.s32 0, %v633_v1  ;;  %v638_v3 = vsub.s32 1, %v633_v1 }
  0x5a   : > { %835 = vmatmul.mubr.bf16.vlgmr.msra.gmra.mxu0 %v582_v20  ;;  %1168 = vmatmul.mubr.bf16.vlgmr.msra.gmra.mxu1 %v915_v21  ;;  %v590_v20 = vpack.c.bf16 %v568_v17, %v566_v16  ;;  %v923_v21 = vpack.c.bf16 %v504_v7, %v502_v6 }
  0x5b   : > { %844 = vmatprep.mubr.bf16.mxu0 %v585_v24  ;;  %1177 = vmatprep.mubr.bf16.mxu1 %v918_v25  ;;  %v593_v24 = vpack.c.bf16 %v573_v19, %v571_v18  ;;  %v926_v25 = vpack.c.bf16 %v509_v13, %v507_v12 }
  0x62   : > { %845 = vmatmul.mubr.bf16.gmra.mxu0 %v584_v36  ;;  %1178 = vmatmul.mubr.bf16.gmra.mxu1 %v917_v37  ;;  %v592_v36 = vpack.c.bf16 %v572_v33, %v570_v32  ;;  %v925_v37 = vpack.c.bf16 %v508_v23, %v506_v22 }
  0x63   : > { %854 = vmatprep.mubr.bf16.mxu0 %v587_v40  ;;  %1187 = vmatprep.mubr.bf16.mxu1 %v920_v41  ;;  %v595_v40 = vpack.c.bf16 %v577_v35, %v575_v34  ;;  %v928_v41 = vpack.c.bf16 %v513_v29, %v511_v28 }
  0x6a   : > { %855 = vmatmul.mubr.bf16.gmra.mxu0 %v586_v52  ;;  %1188 = vmatmul.mubr.bf16.gmra.mxu1 %v919_v53  ;;  %v594_v52 = vpack.c.bf16 %v576_v49, %v574_v48  ;;  %v927_v53 = vpack.c.bf16 %v512_v39, %v510_v38 }
  0x6b   : > { %864 = vmatprep.mubr.bf16.mxu0 %v589_v56  ;;  %1197 = vmatprep.mubr.bf16.mxu1 %v922_v57  ;;  %v930_v56 = vpack.c.bf16 %v517_v45, %v515_v44  ;;  %v516_v57 = vld [vmem:[%s4483_s15 + $0xf0] sm:$0xff] }
  0x6c   : > { %v580_v61 = vadd.f32 %v548_v59, %v516_v57  ;;  %v929_v63 = vpack.c.bf16 %v516_v57, %v514_v54 }
  0x6e   : > { %v596_v62 = vpack.c.bf16 %v580_v61, %v578_v60 }
  0x72   : > { %865 = vmatmul.mubr.bf16.gmra.mxu0 %v588_v4  ;;  %1198 = vmatmul.mubr.bf16.gmra.mxu1 %v921_v5  ;;  %v630_v4 = vld [vmem:[%s5427_s6] sm:$0x3]  ;;  %v963_v5 = vld [vmem:[%s5427_s6 + $0x2] sm:$0x3] }
  0x73   : > { %874 = vmatprep.mubr.bf16.mxu0 %v591_v8  ;;  %1207 = vmatprep.mubr.bf16.mxu1 %v924_v9  ;;  %v4763_v6 = vrot.slane %v630_v4, %v634_v2  ;;  %v4765_v7 = vrot.slane %v963_v5, %v634_v2  ;;  %v4767_v8 = vrot.slane %v630_v4, %v638_v3 }
  0x74   : > { %v4769_v9 = vrot.slane %v963_v5, %v638_v3 }
  0x7a   : > { %875 = vmatmul.mubr.bf16.gmra.mxu0 %v590_v20  ;;  %1208 = vmatmul.mubr.bf16.gmra.mxu1 %v923_v21 }
  0x7b   : > { %884 = vmatprep.mubr.bf16.mxu0 %v593_v24  ;;  %1217 = vmatprep.mubr.bf16.mxu1 %v926_v25 }
  0x82   : > { %885 = vmatmul.mubr.bf16.gmra.mxu0 %v592_v36  ;;  %1218 = vmatmul.mubr.bf16.gmra.mxu1 %v925_v37 }
  0x83   : > { %894 = vmatprep.mubr.bf16.mxu0 %v595_v40  ;;  %1227 = vmatprep.mubr.bf16.mxu1 %v928_v41 }
  0x8a   : > { %895 = vmatmul.mubr.bf16.gmra.mxu0 %v594_v52  ;;  %1228 = vmatmul.mubr.bf16.gmra.mxu1 %v927_v53 }
  0x8b   : > { %904 = vmatprep.mubr.bf16.mxu0 %v597_v55  ;;  %1237 = vmatprep.mubr.bf16.mxu1 %v930_v56 }
  0x92   : > { %905 = vmatmul.mubr.bf16.gmra.mxu0 %v596_v62  ;;  %1238 = vmatmul.mubr.bf16.gmra.mxu1 %v929_v63 }
 0x11a   : > { %v836_v10 = vpop.f32.mrf.mxu0  ;;  %v1169_v11 = vpop.f32.mrf.mxu1 }
 0x11b   : > { %v837_v14 = vadd.f32 %v836_v10, %v4763_v6  ;;  %v1170_v15 = vadd.f32 %v1169_v11, %v4765_v7 }
 0x11c   : > { %v838_v12 = vpop.f32.mrf.mxu0  ;;  %v1171_v13 = vpop.f32.mrf.mxu1 }
 0x11d   : > { %v839_v16 = vadd.f32 %v838_v12, %v4767_v8  ;;  %v1172_v17 = vadd.f32 %v1171_v13, %v4769_v9 }
 0x11e   : > { %v840_v18 = vpop.f32.mrf.mxu0  ;;  %v1173_v19 = vpop.f32.mrf.mxu1 }
 0x11f   : > { %v3725_v20 = vpack.c.bf16 %v839_v16, %v837_v14  ;;  %v3741_v21 = vpack.c.bf16 %v1172_v17, %v1170_v15  ;;  %v841_v24 = vadd.f32 %v840_v18, %v4763_v6  ;;  %v1174_v25 = vadd.f32 %v1173_v19, %v4765_v7 }
 0x120   : > { %v842_v22 = vpop.f32.mrf.mxu0  ;;  %v1175_v23 = vpop.f32.mrf.mxu1 }
 0x121   : > { %1344 = vst [vmem:[#allocation2] sm:$0xff] %v3725_v20  ;;  %1456 = vst [vmem:[#allocation2 + $0x8] sm:$0xff] %v3741_v21  ;;  %v843_v26 = vadd.f32 %v842_v22, %v4767_v8  ;;  %v1176_v27 = vadd.f32 %v1175_v23, %v4769_v9 }
 0x122   : > { %v846_v28 = vpop.f32.mrf.mxu0  ;;  %v1179_v29 = vpop.f32.mrf.mxu1 }
 0x123   : > { %v3726_v30 = vpack.c.bf16 %v843_v26, %v841_v24  ;;  %v3742_v31 = vpack.c.bf16 %v1176_v27, %v1174_v25  ;;  %v847_v34 = vadd.f32 %v846_v28, %v4763_v6  ;;  %v1180_v35 = vadd.f32 %v1179_v29, %v4765_v7 }
 0x124   : > { %v848_v32 = vpop.f32.mrf.mxu0  ;;  %v1181_v33 = vpop.f32.mrf.mxu1 }
 0x125   : > { %1345 = vst [vmem:[#allocation2 + $0x10] sm:$0xff] %v3726_v30  ;;  %1457 = vst [vmem:[#allocation2 + $0x18] sm:$0xff] %v3742_v31  ;;  %v849_v36 = vadd.f32 %v848_v32, %v4767_v8  ;;  %v1182_v37 = vadd.f32 %v1181_v33, %v4769_v9 }
 0x126   : > { %v850_v38 = vpop.f32.mrf.mxu0  ;;  %v1183_v39 = vpop.f32.mrf.mxu1 }
 0x127   : > { %v3727_v40 = vpack.c.bf16 %v849_v36, %v847_v34  ;;  %v3743_v41 = vpack.c.bf16 %v1182_v37, %v1180_v35  ;;  %v851_v44 = vadd.f32 %v850_v38, %v4763_v6  ;;  %v1184_v45 = vadd.f32 %v1183_v39, %v4765_v7 }
 0x128   : > { %v852_v42 = vpop.f32.mrf.mxu0  ;;  %v1185_v43 = vpop.f32.mrf.mxu1 }
 0x129   : > { %1346 = vst [vmem:[#allocation2 + $0x20] sm:$0xff] %v3727_v40  ;;  %1458 = vst [vmem:[#allocation2 + $0x28] sm:$0xff] %v3743_v41  ;;  %v853_v46 = vadd.f32 %v852_v42, %v4767_v8  ;;  %v1186_v47 = vadd.f32 %v1185_v43, %v4769_v9 }
 0x12a   : > { %v856_v48 = vpop.f32.mrf.mxu0  ;;  %v1189_v49 = vpop.f32.mrf.mxu1 }
 0x12b   : > { %v3728_v50 = vpack.c.bf16 %v853_v46, %v851_v44  ;;  %v3744_v51 = vpack.c.bf16 %v1186_v47, %v1184_v45  ;;  %v857_v54 = vadd.f32 %v856_v48, %v4763_v6  ;;  %v1190_v55 = vadd.f32 %v1189_v49, %v4765_v7 }
 0x12c   : > { %v858_v52 = vpop.f32.mrf.mxu0  ;;  %v1191_v53 = vpop.f32.mrf.mxu1 }
 0x12d   : > { %1347 = vst [vmem:[#allocation2 + $0x30] sm:$0xff] %v3728_v50  ;;  %1459 = vst [vmem:[#allocation2 + $0x38] sm:$0xff] %v3744_v51  ;;  %v859_v56 = vadd.f32 %v858_v52, %v4767_v8  ;;  %v1192_v57 = vadd.f32 %v1191_v53, %v4769_v9 }
 0x12e   : > { %v860_v58 = vpop.f32.mrf.mxu0  ;;  %v1193_v59 = vpop.f32.mrf.mxu1 }
 0x12f   : > { %v3729_v60 = vpack.c.bf16 %v859_v56, %v857_v54  ;;  %v3745_v61 = vpack.c.bf16 %v1192_v57, %v1190_v55  ;;  %v861_v0 = vadd.f32 %v860_v58, %v4763_v6  ;;  %v1194_v1 = vadd.f32 %v1193_v59, %v4765_v7 }
 0x130   : > { %v862_v62 = vpop.f32.mrf.mxu0  ;;  %v1195_v63 = vpop.f32.mrf.mxu1 }
 0x131   : > { %1348 = vst [vmem:[#allocation2 + $0x40] sm:$0xff] %v3729_v60  ;;  %1460 = vst [vmem:[#allocation2 + $0x48] sm:$0xff] %v3745_v61  ;;  %v863_v2 = vadd.f32 %v862_v62, %v4767_v8  ;;  %v1196_v3 = vadd.f32 %v1195_v63, %v4769_v9 }
 0x132   : > { %v866_v4 = vpop.f32.mrf.mxu0  ;;  %v1199_v5 = vpop.f32.mrf.mxu1 }
 0x133   : > { %v3730_v10 = vpack.c.bf16 %v863_v2, %v861_v0  ;;  %v3746_v11 = vpack.c.bf16 %v1196_v3, %v1194_v1  ;;  %v867_v14 = vadd.f32 %v866_v4, %v4763_v6  ;;  %v1200_v15 = vadd.f32 %v1199_v5, %v4765_v7 }
 0x134   : > { %v868_v12 = vpop.f32.mrf.mxu0  ;;  %v1201_v13 = vpop.f32.mrf.mxu1 }
 0x135   : > { %1349 = vst [vmem:[#allocation2 + $0x50] sm:$0xff] %v3730_v10  ;;  %1461 = vst [vmem:[#allocation2 + $0x58] sm:$0xff] %v3746_v11  ;;  %v869_v16 = vadd.f32 %v868_v12, %v4767_v8  ;;  %v1202_v17 = vadd.f32 %v1201_v13, %v4769_v9 }
 0x136   : > { %v870_v18 = vpop.f32.mrf.mxu0  ;;  %v1203_v19 = vpop.f32.mrf.mxu1 }
 0x137   : > { %v3731_v20 = vpack.c.bf16 %v869_v16, %v867_v14  ;;  %v3747_v21 = vpack.c.bf16 %v1202_v17, %v1200_v15  ;;  %v871_v24 = vadd.f32 %v870_v18, %v4763_v6  ;;  %v1204_v25 = vadd.f32 %v1203_v19, %v4765_v7 }
 0x138   : > { %v872_v22 = vpop.f32.mrf.mxu0  ;;  %v1205_v23 = vpop.f32.mrf.mxu1 }
 0x139   : > { %1350 = vst [vmem:[#allocation2 + $0x60] sm:$0xff] %v3731_v20  ;;  %1462 = vst [vmem:[#allocation2 + $0x68] sm:$0xff] %v3747_v21  ;;  %v873_v26 = vadd.f32 %v872_v22, %v4767_v8  ;;  %v1206_v27 = vadd.f32 %v1205_v23, %v4769_v9 }
 0x13a   : > { %v876_v28 = vpop.f32.mrf.mxu0  ;;  %v1209_v29 = vpop.f32.mrf.mxu1 }
 0x13b   : > { %v3732_v30 = vpack.c.bf16 %v873_v26, %v871_v24  ;;  %v3748_v31 = vpack.c.bf16 %v1206_v27, %v1204_v25  ;;  %v877_v34 = vadd.f32 %v876_v28, %v4763_v6  ;;  %v1210_v35 = vadd.f32 %v1209_v29, %v4765_v7 }
 0x13c   : > { %v878_v32 = vpop.f32.mrf.mxu0  ;;  %v1211_v33 = vpop.f32.mrf.mxu1 }
 0x13d   : > { %1351 = vst [vmem:[#allocation2 + $0x70] sm:$0xff] %v3732_v30  ;;  %1463 = vst [vmem:[#allocation2 + $0x78] sm:$0xff] %v3748_v31  ;;  %v879_v36 = vadd.f32 %v878_v32, %v4767_v8  ;;  %v1212_v37 = vadd.f32 %v1211_v33, %v4769_v9 }
 0x13e   : > { %v880_v38 = vpop.f32.mrf.mxu0  ;;  %v1213_v39 = vpop.f32.mrf.mxu1 }
 0x13f   : > { %v3733_v40 = vpack.c.bf16 %v879_v36, %v877_v34  ;;  %v3749_v41 = vpack.c.bf16 %v1212_v37, %v1210_v35  ;;  %v881_v44 = vadd.f32 %v880_v38, %v4763_v6  ;;  %v1214_v45 = vadd.f32 %v1213_v39, %v4765_v7 }
 0x140   : > { %v882_v42 = vpop.f32.mrf.mxu0  ;;  %v1215_v43 = vpop.f32.mrf.mxu1 }
 0x141   : > { %1352 = vst [vmem:[#allocation2 + $0x80] sm:$0xff] %v3733_v40  ;;  %1464 = vst [vmem:[#allocation2 + $0x88] sm:$0xff] %v3749_v41  ;;  %v883_v46 = vadd.f32 %v882_v42, %v4767_v8  ;;  %v1216_v47 = vadd.f32 %v1215_v43, %v4769_v9 }
 0x142   : > { %v886_v48 = vpop.f32.mrf.mxu0  ;;  %v1219_v49 = vpop.f32.mrf.mxu1 }
 0x143   : > { %v3734_v50 = vpack.c.bf16 %v883_v46, %v881_v44  ;;  %v3750_v51 = vpack.c.bf16 %v1216_v47, %v1214_v45  ;;  %v887_v54 = vadd.f32 %v886_v48, %v4763_v6  ;;  %v1220_v55 = vadd.f32 %v1219_v49, %v4765_v7 }
 0x144   : > { %v888_v52 = vpop.f32.mrf.mxu0  ;;  %v1221_v53 = vpop.f32.mrf.mxu1 }
 0x145   : > { %1353 = vst [vmem:[#allocation2 + $0x90] sm:$0xff] %v3734_v50  ;;  %1465 = vst [vmem:[#allocation2 + $0x98] sm:$0xff] %v3750_v51  ;;  %v889_v56 = vadd.f32 %v888_v52, %v4767_v8  ;;  %v1222_v57 = vadd.f32 %v1221_v53, %v4769_v9 }
 0x146   : > { %v890_v58 = vpop.f32.mrf.mxu0  ;;  %v1223_v59 = vpop.f32.mrf.mxu1 }
 0x147   : > { %v3735_v60 = vpack.c.bf16 %v889_v56, %v887_v54  ;;  %v3751_v61 = vpack.c.bf16 %v1222_v57, %v1220_v55  ;;  %v891_v0 = vadd.f32 %v890_v58, %v4763_v6  ;;  %v1224_v1 = vadd.f32 %v1223_v59, %v4765_v7 }
 0x148   : > { %v892_v62 = vpop.f32.mrf.mxu0  ;;  %v1225_v63 = vpop.f32.mrf.mxu1 }
 0x149   : > { %1354 = vst [vmem:[#allocation2 + $0xa0] sm:$0xff] %v3735_v60  ;;  %1466 = vst [vmem:[#allocation2 + $0xa8] sm:$0xff] %v3751_v61  ;;  %v893_v2 = vadd.f32 %v892_v62, %v4767_v8  ;;  %v1226_v3 = vadd.f32 %v1225_v63, %v4769_v9 }
 0x14a   : > { %v896_v4 = vpop.f32.mrf.mxu0  ;;  %v1229_v5 = vpop.f32.mrf.mxu1 }
 0x14b   : > { %v3736_v10 = vpack.c.bf16 %v893_v2, %v891_v0  ;;  %v3752_v11 = vpack.c.bf16 %v1226_v3, %v1224_v1  ;;  %v897_v14 = vadd.f32 %v896_v4, %v4763_v6  ;;  %v1230_v15 = vadd.f32 %v1229_v5, %v4765_v7 }
 0x14c   : > { %v898_v12 = vpop.f32.mrf.mxu0  ;;  %v1231_v13 = vpop.f32.mrf.mxu1 }
 0x14d   : > { %1355 = vst [vmem:[#allocation2 + $0xb0] sm:$0xff] %v3736_v10  ;;  %1467 = vst [vmem:[#allocation2 + $0xb8] sm:$0xff] %v3752_v11  ;;  %v899_v16 = vadd.f32 %v898_v12, %v4767_v8  ;;  %v1232_v17 = vadd.f32 %v1231_v13, %v4769_v9 }
 0x14e   : > { %v900_v18 = vpop.f32.mrf.mxu0  ;;  %v1233_v19 = vpop.f32.mrf.mxu1 }
 0x14f   : > { %v3737_v20 = vpack.c.bf16 %v899_v16, %v897_v14  ;;  %v3753_v21 = vpack.c.bf16 %v1232_v17, %v1230_v15  ;;  %v901_v24 = vadd.f32 %v900_v18, %v4763_v6  ;;  %v1234_v25 = vadd.f32 %v1233_v19, %v4765_v7 }
 0x150   : > { %v902_v22 = vpop.f32.mrf.mxu0  ;;  %v1235_v23 = vpop.f32.mrf.mxu1 }
 0x151   : > { %1356 = vst [vmem:[#allocation2 + $0xc0] sm:$0xff] %v3737_v20  ;;  %1468 = vst [vmem:[#allocation2 + $0xc8] sm:$0xff] %v3753_v21  ;;  %v903_v26 = vadd.f32 %v902_v22, %v4767_v8  ;;  %v1236_v27 = vadd.f32 %v1235_v23, %v4769_v9 }
 0x152   : > { %v906_v28 = vpop.f32.mrf.mxu0  ;;  %v1239_v29 = vpop.f32.mrf.mxu1 }
 0x153   : > { %v3738_v30 = vpack.c.bf16 %v903_v26, %v901_v24  ;;  %v3754_v31 = vpack.c.bf16 %v1236_v27, %v1234_v25  ;;  %v907_v34 = vadd.f32 %v906_v28, %v4763_v6  ;;  %v1240_v35 = vadd.f32 %v1239_v29, %v4765_v7 }
 0x154   : > { %v908_v32 = vpop.f32.mrf.mxu0  ;;  %v1241_v33 = vpop.f32.mrf.mxu1 }
 0x155   : > { %1357 = vst [vmem:[#allocation2 + $0xd0] sm:$0xff] %v3738_v30  ;;  %1469 = vst [vmem:[#allocation2 + $0xd8] sm:$0xff] %v3754_v31  ;;  %v909_v36 = vadd.f32 %v908_v32, %v4767_v8  ;;  %v1242_v37 = vadd.f32 %v1241_v33, %v4769_v9 }
 0x156   : > { %v910_v38 = vpop.f32.mrf.mxu0  ;;  %v1243_v39 = vpop.f32.mrf.mxu1 }
 0x157   : > { %v3739_v40 = vpack.c.bf16 %v909_v36, %v907_v34  ;;  %v3755_v41 = vpack.c.bf16 %v1242_v37, %v1240_v35  ;;  %v911_v44 = vadd.f32 %v910_v38, %v4763_v6  ;;  %v1244_v45 = vadd.f32 %v1243_v39, %v4765_v7 }
 0x158   : > { %v912_v42 = vpop.f32.mrf.mxu0  ;;  %v1245_v43 = vpop.f32.mrf.mxu1 }
 0x159   : > { %1358 = vst [vmem:[#allocation2 + $0xe0] sm:$0xff] %v3739_v40  ;;  %1470 = vst [vmem:[#allocation2 + $0xe8] sm:$0xff] %v3755_v41  ;;  %v913_v46 = vadd.f32 %v912_v42, %v4767_v8  ;;  %v1246_v47 = vadd.f32 %v1245_v43, %v4769_v9 }
 0x15b   : > { %v3740_v48 = vpack.c.bf16 %v913_v46, %v911_v44  ;;  %v3756_v49 = vpack.c.bf16 %v1246_v47, %v1244_v45 }
 0x15d   : > { %1359 = vst [vmem:[#allocation2 + $0xf0] sm:$0xff] %v3740_v48  ;;  %1471 = vst [vmem:[#allocation2 + $0xf8] sm:$0xff] %v3756_v49 }
 0x15e PF: > { %v4074_v50 = vld [vmem:[%s5424_s3 + $0x74] ss:$8 sps:$4 sm:$0xff]   ;;  %v4076_v6 = vld [vmem:[%s5424_s3 + $0x70] ss:$8 sps:$4 sm:$0xff]   ;;  %v4077_v7 = vld [vmem:[%s5424_s3 + $0x64] ss:$8 sps:$4 sm:$0xff]  }
 0x15f   : > { %1740 = vmatprep.subr.bf16.mxu0 %v4074_v50  ;;  %v4079_v8 = vld [vmem:[%s5424_s3 + $0x60] ss:$8 sps:$4 sm:$0xff]   ;;  %v4080_v9 = vld [vmem:[%s5424_s3 + $0x54] ss:$8 sps:$4 sm:$0xff]   ;;  %v4082_v51 = vld [vmem:[%s5424_s3 + $0x50] ss:$8 sps:$4 sm:$0xff]  }
 0x160   : > { %1741 = vmatpush1.bf16.msra.mxu0 %v4076_v6  ;;  %v4083_v52 = vld [vmem:[%s5424_s3 + $0x44] ss:$8 sps:$4 sm:$0xff]   ;;  %s3565_s23 = sshll.u32 %s4364_s21, 6  ;;  %v4085_v53 = vld [vmem:[%s5424_s3 + $0x40] ss:$8 sps:$4 sm:$0xff]  }
 0x161   : > { %1742 = vmatprep.subr.bf16.mxu0 %v4077_v7  ;;  %v4086_v54 = vld [vmem:[%s5424_s3 + $0x34] ss:$8 sps:$4 sm:$0xff]   ;;  %s1473_s19 = sshra.s32 %s3565_s23, 3  ;;  %v4088_v55 = vld [vmem:[%s5424_s3 + $0x30] ss:$8 sps:$4 sm:$0xff]  }
 0x162   : > { %s3757_s14 = sshll.u32 %s1473_s19, 4  ;;  %v4089_v56 = vld [vmem:[%s5424_s3 + $0x24] ss:$8 sps:$4 sm:$0xff]   ;;  %v4091_v57 = vld [vmem:[%s5424_s3 + $0x20] ss:$8 sps:$4 sm:$0xff]  }
 0x163   : > { %s4870_s28 = scalar_lea.vmem %s4483_s15, %s3757_s14  ;;  %s4876_s27 = scalar_lea.vmem %s4488_s18, %s3757_s14  ;;  %v4092_v58 = vld [vmem:[%s5424_s3 + $0x14] ss:$8 sps:$4 sm:$0xff]   ;;  %v4094_v63 = vld [vmem:[%s5424_s3 + $0x10] ss:$8 sps:$4 sm:$0xff]   ;;  %v4095_v2 = vld [vmem:[%s5424_s3 + $0x4] ss:$8 sps:$4 sm:$0xff]  }
 0x164   : > { %1743 = vmatpush1.bf16.msra.mxu0 %v4079_v8  ;;  %v1479_v59 = vld [vmem:[%s4870_s28 + $0x8] sm:$0xff]  ;;  %v1481_v60 = vld [vmem:[%s4870_s28 + $0x18] sm:$0xff]  ;;  %v4122_v12 = vld [vmem:[#allocation2 + $0xe0] ss:$16 sps:$4 sm:$0xff]   ;;  %s5443_s14 = sld [smem:[#allocation9_spill]] }
 0x165   : > { %1744 = vmatprep.subr.bf16.mxu0 %v4080_v9  ;;  %v1497_v61 = vld [vmem:[%s4876_s27 + $0x8] sm:$0xff]  ;;  %v1499_v62 = vld [vmem:[%s4876_s27 + $0x18] sm:$0xff]  ;;  %v4123_v13 = vld [vmem:[#allocation2 + $0xc0] ss:$16 sps:$4 sm:$0xff]   ;;  %3842 = vmatprep.subr.bf16.mxu1 %v4122_v12 }
 0x166   : > { %v1513_v0 = vadd.f32 %v1497_v61, %v1479_v59  ;;  %v1515_v1 = vadd.f32 %v1499_v62, %v1481_v60  ;;  %v4097_v4 = vld [vmem:[%s5424_s3] ss:$8 sps:$4 sm:$0xff]   ;;  %v4098_v5 = vld [vmem:[%s5424_s3 + $0xf4] ss:$8 sps:$4 sm:$0xff]   ;;  %v4100_v10 = vld [vmem:[%s5424_s3 + $0xf0] ss:$8 sps:$4 sm:$0xff]   ;;  %3843 = vmatpush3.bf16.xpose.msra.mxu1 %v4122_v12 }
 0x167   : > { %v4101_v11 = vld [vmem:[%s5424_s3 + $0xe4] ss:$8 sps:$4 sm:$0xff]   ;;  %v4103_v14 = vld [vmem:[%s5424_s3 + $0xe0] ss:$8 sps:$4 sm:$0xff]   ;;  %v4104_v15 = vld [vmem:[%s5424_s3 + $0xd4] ss:$8 sps:$4 sm:$0xff]   ;;  %3844 = vmatprep.subr.bf16.mxu1 %v4123_v13 }
 0x168   : > { %1745 = vmatpush1.bf16.msra.mxu0 %v4082_v51  ;;  %v1529_v3 = vpack.c.bf16 %v1515_v1, %v1513_v0  ;;  %v4106_v16 = vld [vmem:[%s5424_s3 + $0xd0] ss:$8 sps:$4 sm:$0xff]   ;;  %v4107_v17 = vld [vmem:[%s5424_s3 + $0xc4] ss:$8 sps:$4 sm:$0xff]   ;;  %v4109_v19 = vld [vmem:[%s5424_s3 + $0xc0] ss:$8 sps:$4 sm:$0xff]  }
 0x169   : > { %1746 = vmatprep.subr.bf16.mxu0 %v4083_v52  ;;  %v4124_v18 = vld [vmem:[#allocation2 + $0xa0] ss:$16 sps:$4 sm:$0xff]   ;;  %v4110_v20 = vld [vmem:[%s5424_s3 + $0xb4] ss:$8 sps:$4 sm:$0xff]   ;;  %v4113_v22 = vld [vmem:[%s5424_s3 + $0xa4] ss:$8 sps:$4 sm:$0xff]  }
 0x16a   : > { %1772 = vmatprep.mubr.bf16.mxu0 %v1529_v3  ;;  %v4112_v21 = vld [vmem:[%s5424_s3 + $0xb0] ss:$8 sps:$4 sm:$0xff]   ;;  %v4115_v24 = vld [vmem:[%s5424_s3 + $0xa0] ss:$8 sps:$4 sm:$0xff]   ;;  %v4116_v25 = vld [vmem:[%s5424_s3 + $0x94] ss:$8 sps:$4 sm:$0xff]  }
 0x16b   : > { %v4125_v23 = vld [vmem:[#allocation2 + $0x80] ss:$16 sps:$4 sm:$0xff]   ;;  %v4119_v31 = vld [vmem:[%s5424_s3 + $0x84] ss:$8 sps:$4 sm:$0xff]   ;;  %v1485_v33 = vld [vmem:[%s4870_s28 + $0x38] sm:$0xff] }
 0x16c   : > { %1747 = vmatpush1.bf16.msra.mxu0 %v4085_v53  ;;  %v4118_v26 = vld [vmem:[%s5424_s3 + $0x90] ss:$8 sps:$4 sm:$0xff]   ;;  %v1478_v27 = vld [vmem:[%s4870_s28] sm:$0xff]  ;;  %v1483_v32 = vld [vmem:[%s4870_s28 + $0x28] sm:$0xff] }
 0x16d   : > { %1748 = vmatprep.subr.bf16.mxu0 %v4086_v54  ;;  %v1480_v28 = vld [vmem:[%s4870_s28 + $0x10] sm:$0xff]  ;;  %v1496_v29 = vld [vmem:[%s4876_s27] sm:$0xff]  ;;  %v1501_v34 = vld [vmem:[%s4876_s27 + $0x28] sm:$0xff] }
 0x16e   : > { %3845 = vmatpush3.bf16.xpose.msra.mxu1 %v4123_v13  ;;  %v1498_v30 = vld [vmem:[%s4876_s27 + $0x10] sm:$0xff]  ;;  %v1503_v35 = vld [vmem:[%s4876_s27 + $0x38] sm:$0xff]  ;;  %v4121_v37 = vld [vmem:[%s5424_s3 + $0x80] ss:$8 sps:$4 sm:$0xff]   ;;  %v1512_v38 = vadd.f32 %v1496_v29, %v1478_v27  ;;  %v1517_v40 = vadd.f32 %v1501_v34, %v1483_v32 }
 0x16f   : > { %3846 = vmatprep.subr.bf16.mxu1 %v4124_v18  ;;  %v4126_v36 = vld [vmem:[#allocation2 + $0x60] ss:$16 sps:$4 sm:$0xff]   ;;  %v1514_v39 = vadd.f32 %v1498_v30, %v1480_v28  ;;  %v1519_v41 = vadd.f32 %v1503_v35, %v1485_v33  ;;  %v1487_v47 = vld [vmem:[%s4870_s28 + $0x48] sm:$0xff]  ;;  %v1489_v48 = vld [vmem:[%s4870_s28 + $0x58] sm:$0xff] }
 0x170   : > { %1749 = vmatpush1.bf16.msra.mxu0 %v4088_v55  ;;  %v1482_v42 = vld [vmem:[%s4870_s28 + $0x20] sm:$0xff]  ;;  %v1484_v43 = vld [vmem:[%s4870_s28 + $0x30] sm:$0xff]  ;;  %v1505_v49 = vld [vmem:[%s4876_s27 + $0x48] sm:$0xff] }
 0x171   : > { %1750 = vmatprep.subr.bf16.mxu0 %v4089_v56  ;;  %v1500_v44 = vld [vmem:[%s4876_s27 + $0x20] sm:$0xff]  ;;  %v1502_v45 = vld [vmem:[%s4876_s27 + $0x30] sm:$0xff]  ;;  %v1528_v46 = vpack.c.bf16 %v1514_v39, %v1512_v38  ;;  %v1507_v50 = vld [vmem:[%s4876_s27 + $0x58] sm:$0xff]  ;;  %v1531_v7 = vpack.c.bf16 %v1519_v41, %v1517_v40  ;;  %v1521_v51 = vadd.f32 %v1505_v49, %v1487_v47 }
 0x172   : > { %v4127_v6 = vld [vmem:[#allocation2 + $0x40] ss:$16 sps:$4 sm:$0xff]   ;;  %v1516_v8 = vadd.f32 %v1500_v44, %v1482_v42  ;;  %v1518_v9 = vadd.f32 %v1502_v45, %v1484_v43  ;;  %v1523_v52 = vadd.f32 %v1507_v50, %v1489_v48  ;;  %v1493_v59 = vld [vmem:[%s4870_s28 + $0x78] sm:$0xff]  ;;  %v1509_v60 = vld [vmem:[%s4876_s27 + $0x68] sm:$0xff] }
 0x173   : > { %v1486_v53 = vld [vmem:[%s4870_s28 + $0x40] sm:$0xff]  ;;  %v1488_v54 = vld [vmem:[%s4870_s28 + $0x50] sm:$0xff]  ;;  %v1511_v61 = vld [vmem:[%s4876_s27 + $0x78] sm:$0xff] }
 0x174   : > { %1751 = vmatpush1.bf16.msra.mxu0 %v4091_v57  ;;  %v1504_v55 = vld [vmem:[%s4876_s27 + $0x40] sm:$0xff]  ;;  %v1506_v56 = vld [vmem:[%s4876_s27 + $0x50] sm:$0xff]  ;;  %v1530_v57 = vpack.c.bf16 %v1518_v9, %v1516_v8  ;;  %v1533_v62 = vpack.c.bf16 %v1523_v52, %v1521_v51 }
 0x175   : > { %1752 = vmatprep.subr.bf16.mxu0 %v4092_v58  ;;  %v1491_v58 = vld [vmem:[%s4870_s28 + $0x68] sm:$0xff]  ;;  %v1522_v0 = vadd.f32 %v1506_v56, %v1488_v54  ;;  %v1510_v12 = vld [vmem:[%s4876_s27 + $0x70] sm:$0xff] }
 0x176   : > { %3847 = vmatpush3.bf16.xpose.msra.mxu1 %v4124_v18  ;;  %v1525_v1 = vadd.f32 %v1509_v60, %v1491_v58  ;;  %v4130_v18 = vld [vmem:[#allocation2 + $0xe4] ss:$16 sps:$4 sm:$0xff]  }
 0x177   : > { %3848 = vmatprep.subr.bf16.mxu1 %v4125_v23  ;;  %v4131_v44 = vld [vmem:[#allocation2 + $0xc4] ss:$16 sps:$4 sm:$0xff]  }
 0x178   : > { %1753 = vmatpush1.bf16.msra.mxu0 %v4094_v63  ;;  %v1520_v63 = vadd.f32 %v1504_v55, %v1486_v53  ;;  %v4132_v52 = vld [vmem:[#allocation2 + $0xa4] ss:$16 sps:$4 sm:$0xff]  }
 0x179   : > { %1754 = vmatprep.subr.bf16.mxu0 %v4095_v2  ;;  %v1527_v2 = vadd.f32 %v1511_v61, %v1493_v59 }
 0x17a   : > { %v1532_v3 = vpack.c.bf16 %v1522_v0, %v1520_v63  ;;  %v4133_v63 = vld [vmem:[#allocation2 + $0x84] ss:$16 sps:$4 sm:$0xff]  }
 0x17c   : > { %1755 = vmatpush1.bf16.msra.mxu0 %v4097_v4  ;;  %v1490_v4 = vld [vmem:[%s4870_s28 + $0x60] sm:$0xff] }
 0x17d   : > { %1756 = vmatprep.subr.bf16.mxu0 %v4098_v5  ;;  %v1535_v5 = vpack.c.bf16 %v1527_v2, %v1525_v1  ;;  %v4134_v1 = vld [vmem:[#allocation2 + $0x64] ss:$16 sps:$4 sm:$0xff]  }
 0x17e   : > { %3849 = vmatpush3.bf16.xpose.msra.mxu1 %v4125_v23  ;;  %v4135_v2 = vld [vmem:[#allocation2 + $0x44] ss:$16 sps:$4 sm:$0xff]  }
 0x17f   : > { %3850 = vmatprep.subr.bf16.mxu1 %v4126_v36 }
 0x180   : > { %1757 = vmatpush2.bf16.msra.mxu0 %v4100_v10  ;;  %v1492_v10 = vld [vmem:[%s4870_s28 + $0x70] sm:$0xff] }
 0x181   : > { %1758 = vmatprep.subr.bf16.mxu0 %v4101_v11  ;;  %v1508_v11 = vld [vmem:[%s4876_s27 + $0x60] sm:$0xff] }
 0x182   : > { %v1524_v13 = vadd.f32 %v1508_v11, %v1490_v4  ;;  %v4137_v4 = vld [vmem:[#allocation2 + $0x4] ss:$16 sps:$4 sm:$0xff]  }
 0x184   : > { %1759 = vmatpush2.bf16.msra.mxu0 %v4103_v14  ;;  %v1526_v14 = vadd.f32 %v1510_v12, %v1492_v10 }
 0x185   : > { %1760 = vmatprep.subr.bf16.mxu0 %v4104_v15 }
 0x186   : > { %3851 = vmatpush3.bf16.xpose.msra.mxu1 %v4126_v36  ;;  %v1534_v15 = vpack.c.bf16 %v1526_v14, %v1524_v13 }
 0x187   : > { %3852 = vmatprep.subr.bf16.mxu1 %v4127_v6 }
 0x188   : > { %1761 = vmatpush2.bf16.msra.mxu0 %v4106_v16  ;;  %v4128_v16 = vld [vmem:[#allocation2 + $0x20] ss:$16 sps:$4 sm:$0xff]  }
 0x189   : > { %1762 = vmatprep.subr.bf16.mxu0 %v4107_v17  ;;  %v4129_v17 = vld [vmem:[#allocation2] ss:$16 sps:$4 sm:$0xff]  }
 0x18c   : > { %1763 = vmatpush2.bf16.msra.mxu0 %v4109_v19  ;;  %v1570_v19 = vlaneseq }
 0x18d   : > { %1764 = vmatprep.subr.bf16.mxu0 %v4110_v20 }
 0x18e   : > { %3853 = vmatpush3.bf16.xpose.msra.mxu1 %v4127_v6  ;;  %v1571_v20 = vshrl.u32 %v1570_v19, 7 }
 0x18f   : > { %3854 = vmatprep.subr.bf16.mxu1 %v4128_v16 }
 0x190   : > { %1765 = vmatpush2.bf16.msra.mxu0 %v4112_v21  ;;  %v4970_v21 = vsub.s32 0, %v1571_v20 }
 0x191   : > { %1766 = vmatprep.subr.bf16.mxu0 %v4113_v22  ;;  %v1568_v22 = vld [vmem:[%s5425_s4] sm:$0x3] }
 0x192   : > { %v1573_v23 = vrot.slane %v1568_v22, %v4970_v21 }
 0x194   : > { %1767 = vmatpush2.bf16.msra.mxu0 %v4115_v24 }
 0x195   : > { %1768 = vmatprep.subr.bf16.mxu0 %v4116_v25 }
 0x196   : > { %3855 = vmatpush3.bf16.xpose.msra.mxu1 %v4128_v16 }
 0x197   : > { %3856 = vmatprep.subr.bf16.mxu1 %v4129_v17 }
 0x198   : > { %1769 = vmatpush2.bf16.msra.mxu0 %v4118_v26 }
 0x199   : > { %1770 = vmatprep.subr.bf16.mxu0 %v4119_v31 }
 0x19c   : > { %1771 = vmatpush2.bf16.msra.mxu0 %v4121_v37 }
 0x19e   : > { %3857 = vmatpush3.bf16.xpose.msra.mxu1 %v4129_v17 }
 0x19f   : > { %1773 = vmatmul.mubr.bf16.vlgmr.msra.gmra.mxu0 %v1528_v46  ;;  %3890 = vmatprep.subr.bf16.mxu1 %v4130_v18  ;;  %v4976_v46 = vsub.s32 1, %v1571_v20 }
 0x1a0   : > { %1782 = vmatprep.mubr.bf16.mxu0 %v1531_v7 }
 0x1a1   : > { %v1577_v7 = vrot.slane %v1568_v22, %v4976_v46 }
 0x1a7   : > { %1783 = vmatmul.mubr.bf16.gmra.mxu0 %v1530_v57 }
 0x1a8   : > { %1792 = vmatprep.mubr.bf16.mxu0 %v1533_v62 }
 0x1af   : > { %1793 = vmatmul.mubr.bf16.gmra.mxu0 %v1532_v3  ;;  %v4136_v3 = vld [vmem:[#allocation2 + $0x24] ss:$16 sps:$4 sm:$0xff]  }
 0x1b0   : > { %1802 = vmatprep.mubr.bf16.mxu0 %v1535_v5 }
 0x1b7   : > { %1803 = vmatmul.mubr.bf16.gmra.mxu0 %v1534_v15 }
 0x25f   : > { %v1774_v24 = vpop.f32.mrf.mxu0 }
 0x260   : > { %v1775_v26 = vadd.f32 %v1774_v24, %v1573_v23 }
 0x261   : > { %v1776_v25 = vpop.f32.mrf.mxu0 }
 0x262   : > { %v1829_v30 = vmul.f32 0.088388346, %v1775_v26  ;;  %v1777_v55 = vadd.f32 %v1776_v25, %v1577_v7  ;;  %v3791_v26 = vld [vmem:[%s4493_s24 + $0x8] sm:$0xff]  }
 0x263   : > { %v1778_v27 = vpop.f32.mrf.mxu0 }
 0x264   : > { %v1779_v28 = vadd.f32 %v1778_v27, %v1573_v23  ;;  %v2215_v61 = vmul.f32 0.088388346, %v1777_v55  ;;  %v3776_v27 = vld [vmem:[%s4493_s24] sm:$0xff]  }
 0x265   : > { %v1780_v29 = vpop.f32.mrf.mxu0 }
 0x266   : > { %v1830_v31 = vmul.f32 0.088388346, %v1779_v28  ;;  %v1781_v53 = vadd.f32 %v1780_v29, %v1577_v7  ;;  %v3781_v28 = vunpack.c.l.bf16 %v3791_v26  ;;  %v3777_v29 = vunpack.c.l.bf16 %v3776_v27 }
 0x267   : > { %v1784_v32 = vpop.f32.mrf.mxu0 }
 0x268   : > { %v1837_v33 = vpack.c.bf16 %v1830_v31, %v1829_v30  ;;  %v1785_v35 = vadd.f32 %v1784_v32, %v1573_v23  ;;  %v2216_v59 = vmul.f32 0.088388346, %v1781_v53  ;;  %v3782_v32 = vunpack.c.h.bf16 %v3791_v26 }
 0x269   : > { %v1786_v34 = vpop.f32.mrf.mxu0 }
 0x26a   : > { %3858 = vmatprep.mubr.bf16.mxu1 %v1837_v33  ;;  %v1831_v39 = vmul.f32 0.088388346, %v1785_v35  ;;  %v2223_v0 = vpack.c.bf16 %v2216_v59, %v2215_v61  ;;  %v1787_v12 = vadd.f32 %v1786_v34, %v1577_v7  ;;  %v3778_v35 = vunpack.c.h.bf16 %v3776_v27 }
 0x26b   : > { %v1788_v36 = vpop.f32.mrf.mxu0 }
 0x26c   : > { %v1789_v37 = vadd.f32 %v1788_v36, %v1573_v23  ;;  %v2217_v17 = vmul.f32 0.088388346, %v1787_v12 }
 0x26d   : > { %v1790_v38 = vpop.f32.mrf.mxu0 }
 0x26e   : > { %v1832_v40 = vmul.f32 0.088388346, %v1789_v37  ;;  %v1791_v5 = vadd.f32 %v1790_v38, %v1577_v7 }
 0x26f   : > { %v1794_v41 = vpop.f32.mrf.mxu0 }
 0x270   : > { %v1838_v42 = vpack.c.bf16 %v1832_v40, %v1831_v39  ;;  %v1795_v43 = vadd.f32 %v1794_v41, %v1573_v23  ;;  %v2218_v13 = vmul.f32 0.088388346, %v1791_v5  ;;  %v3792_v40 = vld [vmem:[%s4493_s24 + $0x10] sm:$0xff]   ;;  %v3793_v41 = vld [vmem:[%s4493_s24 + $0x18] sm:$0xff]  }
 0x271   : > { %v1796_v45 = vpop.f32.mrf.mxu0 }
 0x272   : > { %3859 = vmatmul.mubr.bf16.vlgmr.msra.gmra.mxu1 %v1838_v42  ;;  %v1833_v48 = vmul.f32 0.088388346, %v1795_v43  ;;  %v1797_v10 = vadd.f32 %v1796_v45, %v1577_v7  ;;  %v3785_v42 = vunpack.c.l.bf16 %v3792_v40 }
 0x273   : > { %3891 = vmatpush3.bf16.xpose.msra.mxu1 %v4130_v18  ;;  %v1798_v47 = vpop.f32.mrf.mxu0  ;;  %v2224_v18 = vpack.c.bf16 %v2218_v13, %v2217_v17 }
 0x274   : > { %v1799_v49 = vadd.f32 %v1798_v47, %v1573_v23  ;;  %3892 = vmatprep.subr.bf16.mxu1 %v4131_v44  ;;  %v2219_v14 = vmul.f32 0.088388346, %v1797_v10 }
 0x275   : > { %v1800_v50 = vpop.f32.mrf.mxu0 }
 0x276   : > { %v1834_v6 = vmul.f32 0.088388346, %v1799_v49  ;;  %v1801_v11 = vadd.f32 %v1800_v50, %v1577_v7 }
 0x277   : > { %v1804_v8 = vpop.f32.mrf.mxu0 }
 0x278   : > { %v1839_v9 = vpack.c.bf16 %v1834_v6, %v1833_v48  ;;  %v1805_v51 = vadd.f32 %v1804_v8, %v1573_v23  ;;  %v2220_v15 = vmul.f32 0.088388346, %v1801_v11  ;;  %v3786_v48 = vunpack.c.h.bf16 %v3792_v40  ;;  %v4141_v40 = vld [vmem:[#allocation2 + $0x88] ss:$16 sps:$4 sm:$0xff]  }
 0x279   : > { %v1806_v54 = vpop.f32.mrf.mxu0  ;;  %v3790_v6 = vunpack.c.h.bf16 %v3793_v41 }
 0x27a   : > { %3862 = vmatprep.mubr.bf16.mxu1 %v1839_v9  ;;  %v1835_v57 = vmul.f32 0.088388346, %v1805_v51  ;;  %v1807_v19 = vadd.f32 %v1806_v54, %v1577_v7  ;;  %v2225_v22 = vpack.c.bf16 %v2220_v15, %v2219_v14 }
 0x27b   : > { %3893 = vmatpush3.bf16.xpose.msra.mxu1 %v4131_v44  ;;  %v1808_v56 = vpop.f32.mrf.mxu0  ;;  %v3789_v44 = vunpack.c.l.bf16 %v3793_v41  ;;  %v4142_v41 = vld [vmem:[#allocation2 + $0x68] ss:$16 sps:$4 sm:$0xff]  }
 0x27c   : > { %v1809_v58 = vadd.f32 %v1808_v56, %v1573_v23  ;;  %3894 = vmatprep.subr.bf16.mxu1 %v4132_v52  ;;  %v2221_v23 = vmul.f32 0.088388346, %v1807_v19 }
 0x27d   : > { %v1810_v16 = vpop.f32.mrf.mxu0 }
 0x27e   : > { %v1836_v60 = vmul.f32 0.088388346, %v1809_v58  ;;  %v1811_v20 = vadd.f32 %v1810_v16, %v1577_v7 }
 0x280   : > { %v1840_v62 = vpack.c.bf16 %v1836_v60, %v1835_v57  ;;  %v2222_v24 = vmul.f32 0.088388346, %v1811_v20 }
 0x282   : > { %3863 = vmatmul.mubr.bf16.gmra.mxu1 %v1840_v62  ;;  %v2226_v25 = vpack.c.bf16 %v2222_v24, %v2221_v23 }
 0x283   : > { %3895 = vmatpush3.bf16.xpose.msra.mxu1 %v4132_v52  ;;  %3906 = vmatprep.mubr.bf16.mxu1 %v2223_v0 }
 0x284   : > { %3896 = vmatprep.subr.bf16.mxu1 %v4133_v63 }
 0x28b   : > { %3897 = vmatpush3.bf16.xpose.msra.mxu1 %v4133_v63 }
 0x28c   : > { %3898 = vmatprep.subr.bf16.mxu1 %v4134_v1 }
 0x293   : > { %3899 = vmatpush3.bf16.xpose.msra.mxu1 %v4134_v1 }
 0x294   : > { %3900 = vmatprep.subr.bf16.mxu1 %v4135_v2 }
 0x29b   : > { %3901 = vmatpush3.bf16.xpose.msra.mxu1 %v4135_v2 }
 0x29c   : > { %3902 = vmatprep.subr.bf16.mxu1 %v4136_v3 }
 0x2a3   : > { %3903 = vmatpush3.bf16.xpose.msra.mxu1 %v4136_v3  ;;  %v4138_v3 = vld [vmem:[#allocation2 + $0xe8] ss:$16 sps:$4 sm:$0xff]  }
 0x2a4   : > { %3904 = vmatprep.subr.bf16.mxu1 %v4137_v4  ;;  %3866 = vmatprep.subr.bf16.mxu0 %v4138_v3 }
 0x2a5   : > { %3867 = vmatpush3.bf16.msra.mxu0 %v4138_v3 }
 0x2ab   : > { %3905 = vmatpush3.bf16.xpose.msra.mxu1 %v4137_v4  ;;  %v4139_v4 = vld [vmem:[#allocation2 + $0xc8] ss:$16 sps:$4 sm:$0xff]  }
 0x2ac   : > { %3868 = vmatprep.subr.bf16.mxu0 %v4139_v4 }
 0x2ad   : > { %3869 = vmatpush3.bf16.msra.mxu0 %v4139_v4 }
 0x2b2   : > { %3907 = vmatmul.mubr.bf16.vlgmr.msra.gmra.mxu1 %v2224_v18 }
 0x2b3   : > { %3910 = vmatprep.mubr.bf16.mxu1 %v2225_v22 }
 0x2ba   : > { %3911 = vmatmul.mubr.bf16.gmra.mxu1 %v2226_v25 }
 0x332   : > { %v3860_v30 = vpop.f32.mrf.mxu1 }
 0x333   : > { %v4981_v31 = vadd.f32 %v3860_v30, %v3781_v28 }
 0x334   : > { %v1955_v33 = vpop.f32.mrf.mxu1 }
 0x335   : > { %v4983_v34 = vadd.f32 %v3777_v29, %v1955_v33  ;;  %1990 = vmax.xlane.f32.xlu1 %v4981_v31 }
 0x336   : > { %v3861_v36 = vpop.f32.mrf.mxu1 }
 0x337   : > { %v4986_v37 = vadd.f32 %v3861_v36, %v3782_v32  ;;  %1986 = vmax.xlane.f32.xlu0 %v4983_v34 }
 0x338   : > { %v1958_v38 = vpop.f32.mrf.mxu1 }
 0x339   : > { %v1959_v39 = vadd.f32 %v3778_v35, %v1958_v38  ;;  %1992 = vmax.xlane.f32.xlu1 %v4986_v37  ;;  %v4140_v38 = vld [vmem:[#allocation2 + $0xa8] ss:$16 sps:$4 sm:$0xff]  }
 0x33a   : > { %3870 = vmatprep.subr.bf16.mxu0 %v4140_v38 }
 0x33b   : > { %1988 = vmax.xlane.f32.xlu0 %v1959_v39  ;;  %3871 = vmatpush3.bf16.msra.mxu0 %v4140_v38 }
 0x33c   : > { %3872 = vmatprep.subr.bf16.mxu0 %v4141_v40 }
 0x33f   : > { %3873 = vmatpush3.bf16.msra.mxu0 %v4141_v40 }
 0x340   : > { %3874 = vmatprep.subr.bf16.mxu0 %v4142_v41 }
 0x342   : > { %v3864_v43 = vpop.f32.mrf.mxu1 }
 0x343   : > { %v4992_v50 = vadd.f32 %v3864_v43, %v3789_v44  ;;  %v4143_v43 = vld [vmem:[#allocation2 + $0x48] ss:$16 sps:$4 sm:$0xff]   ;;  %3875 = vmatpush3.bf16.msra.mxu0 %v4142_v41 }
 0x344   : > { %v1971_v45 = vpop.f32.mrf.mxu1  ;;  %3876 = vmatprep.subr.bf16.mxu0 %v4143_v43 }
 0x345   : > { %v1972_v47 = vadd.f32 %v3785_v42, %v1971_v45 }
 0x346   : > { %v3865_v49 = vpop.f32.mrf.mxu1 }
 0x347   : > { %1994 = vmax.xlane.f32.xlu0 %v1972_v47  ;;  %v4996_v9 = vadd.f32 %v3865_v49, %v3790_v6  ;;  %3877 = vmatpush3.bf16.msra.mxu0 %v4143_v43  ;;  %v4147_v43 = vld [vmem:[#allocation2 + $0xcc] ss:$16 sps:$4 sm:$0xff]  }
 0x348   : > { %v1974_v7 = vpop.f32.mrf.mxu1 }
 0x349   : > { %v4994_v8 = vadd.f32 %v3786_v48, %v1974_v7 }
 0x34b   : > { %1996 = vmax.xlane.f32.xlu1 %v4994_v8  ;;  %1998 = vmax.xlane.f32.xlu0 %v4992_v50 }
 0x34f   : > { %2000 = vmax.xlane.f32.xlu1 %v4996_v9 }
 0x372   : > { %v3908_v51 = vpop.f32.mrf.mxu1 }
 0x373   : > { %v5004_v56 = vadd.f32 %v3908_v51, %v3781_v28 }
 0x374   : > { %v2341_v52 = vpop.f32.mrf.mxu1 }
 0x375   : > { %v5001_v53 = vadd.f32 %v3777_v29, %v2341_v52 }
 0x376   : > { %v3909_v54 = vpop.f32.mrf.mxu1 }
 0x377   : > { %2372 = vmax.xlane.f32.xlu0 %v5001_v53  ;;  %v5010_v60 = vadd.f32 %v3909_v54, %v3782_v32 }
 0x378   : > { %v2344_v55 = vpop.f32.mrf.mxu1 }
 0x379   : > { %v5006_v57 = vadd.f32 %v3778_v35, %v2344_v55  ;;  %v5058_v55 = vld [vmem:[#allocation2 + $0xec] ss:$16 sps:$4 sm:$0xff]  }
 0x37a   : > { %v3912_v58 = vpop.f32.mrf.mxu1 }
 0x37b   : > { %2374 = vmax.xlane.f32.xlu1 %v5006_v57  ;;  %2376 = vmax.xlane.f32.xlu0 %v5004_v56  ;;  %v5016_v0 = vadd.f32 %v3912_v58, %v3789_v44 }
 0x37c   : > { %v2357_v59 = vpop.f32.mrf.mxu1 }
 0x37d   : > { %v5012_v61 = vadd.f32 %v3785_v42, %v2357_v59 }
 0x37e   : > { %v3913_v62 = vpop.f32.mrf.mxu1 }
 0x37f   : > { %2378 = vmax.xlane.f32.xlu1 %v5010_v60  ;;  %2380 = vmax.xlane.f32.xlu0 %v5012_v61  ;;  %v5022_v2 = vadd.f32 %v3913_v62, %v3790_v6 }
 0x380   : > { %v2360_v63 = vpop.f32.mrf.mxu1 }
 0x381   : > { %v5018_v1 = vadd.f32 %v3786_v48, %v2360_v63  ;;  %v4145_v48 = vld [vmem:[#allocation2 + $0x8] ss:$16 sps:$4 sm:$0xff]  }
 0x383   : > { %2382 = vmax.xlane.f32.xlu1 %v5018_v1  ;;  %2384 = vmax.xlane.f32.xlu0 %v5016_v0 }
 0x387   : > { %2386 = vmax.xlane.f32.xlu1 %v5022_v2 }
 0x3be   : > { %v1991_v5 = vpop.xlane.xlu1 %1990 }
 0x3bf   : > { %v2004_v10 = vsub.f32 %v4981_v31, %v1991_v5 }
 0x3c0   : > { %v1987_v11 = vpop.xlane.xlu0 %1986 }
 0x3c1   : > { %v2002_v12 = vsub.f32 %v4983_v34, %v1987_v11  ;;  %v2014_v15 = vmul.f32 1.442695, %v2004_v10 }
 0x3c2   : > { %v1993_v13 = vpop.xlane.xlu1 %1992 }
 0x3c3   : > { %v2010_v14 = vmul.f32 1.442695, %v2002_v12  ;;  %v2005_v17 = vsub.f32 %v4986_v37, %v1993_v13 }
 0x3c4   : > { %v1989_v16 = vpop.xlane.xlu0 %1988 }
 0x3c5   : > { %4262 = vpow2.f32 %v2010_v14  ;;  %v2003_v18 = vsub.f32 %v1959_v39, %v1989_v16  ;;  %v2016_v20 = vmul.f32 1.442695, %v2005_v17 }
 0x3c6   : > { %4264 = vpow2.f32 %v2014_v15 }
 0x3c7   : > { %v2012_v19 = vmul.f32 1.442695, %v2003_v18 }
 0x3c9   : > { %4266 = vpow2.f32 %v2012_v19 }
 0x3ca   : > { %4268 = vpow2.f32 %v2016_v20 }
 0x3d0   : > { %v1995_v22 = vpop.xlane.xlu0 %1994 }
 0x3d1   : > { %v2006_v23 = vsub.f32 %v1972_v47, %v1995_v22  ;;  %v4144_v47 = vld [vmem:[#allocation2 + $0x28] ss:$16 sps:$4 sm:$0xff]  }
 0x3d2   : > { %v5028_v24 = vpop.eup %4262  ;;  %3878 = vmatprep.subr.bf16.mxu0 %v4144_v47 }
 0x3d3   : > { %v2018_v25 = vmul.f32 1.442695, %v2006_v23  ;;  %2026 = vadd.xlane.f32.xlu0 %v5028_v24  ;;  %v5031_v28 = vpop.eup %4264  ;;  %3879 = vmatpush3.bf16.msra.mxu0 %v4144_v47  ;;  %v4149_v47 = vld [vmem:[#allocation2 + $0x8c] ss:$16 sps:$4 sm:$0xff]  }
 0x3d4   : > { %v1997_v26 = vpop.xlane.xlu1 %1996  ;;  %v1999_v27 = vpop.xlane.xlu0 %1998  ;;  %3880 = vmatprep.subr.bf16.mxu0 %v4145_v48 }
 0x3d5   : > { %4270 = vpow2.f32 %v2018_v25  ;;  %v2007_v29 = vsub.f32 %v4994_v8, %v1997_v26  ;;  %v2008_v30 = vsub.f32 %v4992_v50, %v1999_v27 }
 0x3d6   : > { %v5035_v31 = vpop.eup %4266 }
 0x3d7   : > { %v2020_v32 = vmul.f32 1.442695, %v2007_v29  ;;  %v2022_v33 = vmul.f32 1.442695, %v2008_v30  ;;  %2030 = vadd.xlane.f32.xlu0 %v5031_v28  ;;  %2028 = vadd.xlane.f32.xlu1 %v5035_v31  ;;  %v5040_v36 = vpop.eup %4268 }
 0x3d8   : > { %v2001_v34 = vpop.xlane.xlu1 %2000  ;;  %3881 = vmatpush3.bf16.msra.mxu0 %v4145_v48 }
 0x3d9   : > { %4272 = vpow2.f32 %v2020_v32  ;;  %v2009_v35 = vsub.f32 %v4996_v9, %v2001_v34  ;;  %3914 = vmatprep.subr.bf16.mxu0 %v5058_v55 }
 0x3da   : > { %4274 = vpow2.f32 %v2022_v33 }
 0x3db   : > { %v2024_v37 = vmul.f32 1.442695, %v2009_v35  ;;  %2032 = vadd.xlane.f32.xlu1 %v5040_v36 }
 0x3dd   : > { %4276 = vpow2.f32 %v2024_v37 }
 0x3e2   : > { %v5043_v39 = vpop.eup %4270 }
 0x3e3   : > { %2034 = vadd.xlane.f32.xlu0 %v5043_v39 }
 0x3e6   : > { %v5046_v42 = vpop.eup %4272 }
 0x3e7   : > { %v5048_v44 = vpop.eup %4274  ;;  %2036 = vadd.xlane.f32.xlu1 %v5046_v42 }
 0x3e8   : > { %2038 = vadd.xlane.f32.xlu0 %v5048_v44 }
 0x3ea   : > { %v5052_v45 = vpop.eup %4276 }
 0x3eb   : > { %2040 = vadd.xlane.f32.xlu1 %v5052_v45 }
 0x400   : > { %v2373_v49 = vpop.xlane.xlu0 %2372 }
 0x401   : > { %v2388_v50 = vsub.f32 %v5001_v53, %v2373_v49 }
 0x403   : > { %v2396_v6 = vmul.f32 1.442695, %v2388_v50 }
 0x404   : > { %v2375_v7 = vpop.xlane.xlu1 %2374  ;;  %v2377_v8 = vpop.xlane.xlu0 %2376 }
 0x405   : > { %4278 = vpow2.f32 %v2396_v6  ;;  %v2389_v9 = vsub.f32 %v5006_v57, %v2375_v7  ;;  %v2390_v51 = vsub.f32 %v5004_v56, %v2377_v8  ;;  %v4150_v6 = vld [vmem:[#allocation2 + $0x6c] ss:$16 sps:$4 sm:$0xff]  }
 0x407   : > { %v2398_v52 = vmul.f32 1.442695, %v2389_v9  ;;  %v2400_v54 = vmul.f32 1.442695, %v2390_v51 }
 0x408   : > { %v2379_v58 = vpop.xlane.xlu1 %2378  ;;  %v2381_v59 = vpop.xlane.xlu0 %2380 }
 0x409   : > { %4280 = vpow2.f32 %v2398_v52  ;;  %v2391_v62 = vsub.f32 %v5010_v60, %v2379_v58  ;;  %v2392_v63 = vsub.f32 %v5012_v61, %v2381_v59  ;;  %v4151_v52 = vld [vmem:[#allocation2 + $0x4c] ss:$16 sps:$4 sm:$0xff]  }
 0x40a   : > { %4282 = vpow2.f32 %v2400_v54 }
 0x40b   : > { %v2402_v53 = vmul.f32 1.442695, %v2391_v62  ;;  %v2404_v3 = vmul.f32 1.442695, %v2392_v63 }
 0x40c   : > { %v2383_v4 = vpop.xlane.xlu1 %2382  ;;  %v2385_v57 = vpop.xlane.xlu0 %2384 }
 0x40d   : > { %4284 = vpow2.f32 %v2402_v53  ;;  %v2393_v56 = vsub.f32 %v5018_v1, %v2383_v4  ;;  %v2394_v5 = vsub.f32 %v5016_v0, %v2385_v57 }
 0x40e   : > { %4286 = vpow2.f32 %v2404_v3 }
 0x40f   : > { %v2406_v10 = vmul.f32 1.442695, %v2393_v56  ;;  %v2408_v11 = vmul.f32 1.442695, %v2394_v5 }
 0x410   : > { %v2387_v12 = vpop.xlane.xlu1 %2386 }
 0x411   : > { %4288 = vpow2.f32 %v2406_v10  ;;  %v2395_v60 = vsub.f32 %v5022_v2, %v2387_v12 }
 0x412   : > { %v5066_v61 = vpop.eup %4278  ;;  %4290 = vpow2.f32 %v2408_v11 }
 0x413   : > { %v2410_v13 = vmul.f32 1.442695, %v2395_v60  ;;  %2412 = vadd.xlane.f32.xlu0 %v5066_v61 }
 0x415   : > { %4292 = vpow2.f32 %v2410_v13 }
 0x416   : > { %v5069_v14 = vpop.eup %4280 }
 0x417   : > { %v5071_v15 = vpop.eup %4282  ;;  %2414 = vadd.xlane.f32.xlu1 %v5069_v14 }
 0x418   : > { %2416 = vadd.xlane.f32.xlu0 %v5071_v15 }
 0x41a   : > { %v5075_v0 = vpop.eup %4284 }
 0x41b   : > { %v5077_v1 = vpop.eup %4286  ;;  %2418 = vadd.xlane.f32.xlu1 %v5075_v0 }
 0x41c   : > { %2420 = vadd.xlane.f32.xlu0 %v5077_v1 }
 0x41e   : > { %v5081_v2 = vpop.eup %4288 }
 0x41f   : > { %v5083_v16 = vpop.eup %4290  ;;  %2422 = vadd.xlane.f32.xlu1 %v5081_v2 }
 0x420   : > { %2424 = vadd.xlane.f32.xlu0 %v5083_v16 }
 0x422   : > { %v5087_v17 = vpop.eup %4292 }
 0x423   : > { %2426 = vadd.xlane.f32.xlu1 %v5087_v17 }
 0x45c   : > { %v2027_v18 = vpop.xlane.xlu0 %2026 }
 0x45d   : > { %4294 = vrcp.f32 %v2027_v18 }
 0x460   : > { %v2029_v19 = vpop.xlane.xlu1 %2028  ;;  %v2031_v20 = vpop.xlane.xlu0 %2030 }
 0x461   : > { %4296 = vrcp.f32 %v2029_v19 }
 0x462   : > { %4298 = vrcp.f32 %v2031_v20 }
 0x464   : > { %v2033_v22 = vpop.xlane.xlu1 %2032 }
 0x465   : > { %4300 = vrcp.f32 %v2033_v22 }
 0x46a   : > { %v4295_v23 = vpop.eup %4294 }
 0x46b   : > { %v2050_v27 = vmul.f32 %v4295_v23, %v5028_v24  ;;  %v4148_v24 = vld [vmem:[#allocation2 + $0xac] ss:$16 sps:$4 sm:$0xff]  }
 0x46c   : > { %v2035_v25 = vpop.xlane.xlu0 %2034 }
 0x46d   : > { %4302 = vrcp.f32 %v2035_v25 }
 0x46e   : > { %v4297_v26 = vpop.eup %4296 }
 0x46f   : > { %v2051_v29 = vmul.f32 %v4297_v26, %v5035_v31  ;;  %v4299_v30 = vpop.eup %4298 }
 0x470   : > { %v2037_v32 = vpop.xlane.xlu1 %2036  ;;  %v2052_v37 = vmul.f32 %v4299_v30, %v5031_v28  ;;  %v4168_v30 = vld [vmem:[%s5428_s7 + $0x34] ss:$8 sps:$4 sm:$0xff]  }
 0x471   : > { %4304 = vrcp.f32 %v2037_v32  ;;  %v2039_v33 = vpop.xlane.xlu0 %2038  ;;  %v2058_v34 = vpack.c.bf16 %v2051_v29, %v2050_v27  ;;  %v4165_v27 = vld [vmem:[%s5428_s7 + $0x44] ss:$8 sps:$4 sm:$0xff]   ;;  %v4163_v29 = vld [vmem:[%s5428_s7 + $0x40] ss:$8 sps:$4 sm:$0xff]   ;;  %v4166_v32 = vld [vmem:[%s5428_s7 + $0x30] ss:$8 sps:$4 sm:$0xff]  }
 0x472   : > { %v4301_v35 = vpop.eup %4300  ;;  %4306 = vrcp.f32 %v2039_v33  ;;  %v4171_v33 = vld [vmem:[%s5428_s7 + $0x24] ss:$8 sps:$4 sm:$0xff]  }
 0x473   : > { %3882 = vmatprep.mubr.bf16.mxu0 %v2058_v34  ;;  %v2053_v38 = vmul.f32 %v4301_v35, %v5040_v36  ;;  %v4169_v34 = vld [vmem:[%s5428_s7 + $0x20] ss:$8 sps:$4 sm:$0xff]   ;;  %v4174_v35 = vld [vmem:[%s5428_s7 + $0x14] ss:$8 sps:$4 sm:$0xff]  }
 0x474   : > { %v2041_v40 = vpop.xlane.xlu1 %2040 }
 0x475   : > { %4308 = vrcp.f32 %v2041_v40  ;;  %v2059_v41 = vpack.c.bf16 %v2053_v38, %v2052_v37  ;;  %v4172_v37 = vld [vmem:[%s5428_s7 + $0x10] ss:$8 sps:$4 sm:$0xff]   ;;  %v4177_v38 = vld [vmem:[%s5428_s7 + $0x4] ss:$8 sps:$4 sm:$0xff]   ;;  %v4175_v40 = vld [vmem:[%s5428_s7] ss:$8 sps:$4 sm:$0xff]  }
 0x477   : > { %3883 = vmatmul.mubr.bf16.vlgmr.msra.gmra.mxu0 %v2059_v41  ;;  %v4180_v41 = vld [vmem:[%s5428_s7 + $0xf4] ss:$8 sps:$4 sm:$0xff]  }
 0x478   : > { %3915 = vmatpush3.bf16.msra.mxu0 %v5058_v55 }
 0x479   : > { %3916 = vmatprep.subr.bf16.mxu0 %v4147_v43 }
 0x47a   : > { %v4303_v31 = vpop.eup %4302 }
 0x47b   : > { %v2054_v49 = vmul.f32 %v4303_v31, %v5043_v39  ;;  %v4152_v39 = vld [vmem:[#allocation2 + $0x2c] ss:$16 sps:$4 sm:$0xff]   ;;  %v4181_v31 = vld [vmem:[%s5428_s7 + $0xe0] ss:$8 sps:$4 sm:$0xff]  }
 0x47c   : > { %3917 = vmatpush3.bf16.msra.mxu0 %v4147_v43  ;;  %v4178_v43 = vld [vmem:[%s5428_s7 + $0xf0] ss:$8 sps:$4 sm:$0xff]  }
 0x47d   : > { %3918 = vmatprep.subr.bf16.mxu0 %v4148_v24 }
 0x47e   : > { %v4305_v48 = vpop.eup %4304 }
 0x47f   : > { %v2055_v28 = vmul.f32 %v4305_v48, %v5046_v42  ;;  %v4307_v50 = vpop.eup %4306  ;;  %v4153_v42 = vld [vmem:[#allocation2 + $0xc] ss:$16 sps:$4 sm:$0xff]   ;;  %v4184_v48 = vld [vmem:[%s5428_s7 + $0xd0] ss:$8 sps:$4 sm:$0xff]  }
 0x480   : > { %3919 = vmatpush3.bf16.msra.mxu0 %v4148_v24  ;;  %v2056_v8 = vmul.f32 %v4307_v50, %v5048_v44  ;;  %v4183_v24 = vld [vmem:[%s5428_s7 + $0xe4] ss:$8 sps:$4 sm:$0xff]   ;;  %v4192_v50 = vld [vmem:[%s5428_s7 + $0xb4] ss:$8 sps:$4 sm:$0xff]  }
 0x481   : > { %v2060_v36 = vpack.c.bf16 %v2055_v28, %v2054_v49  ;;  %3920 = vmatprep.subr.bf16.mxu0 %v4149_v47  ;;  %v4189_v49 = vld [vmem:[%s5428_s7 + $0xc4] ss:$8 sps:$4 sm:$0xff]   ;;  %v4187_v28 = vld [vmem:[%s5428_s7 + $0xc0] ss:$8 sps:$4 sm:$0xff]  }
 0x482   : > { %v4309_v7 = vpop.eup %4308 }
 0x483   : > { %3886 = vmatprep.mubr.bf16.mxu0 %v2060_v36  ;;  %v2057_v9 = vmul.f32 %v4309_v7, %v5052_v45  ;;  %v4190_v36 = vld [vmem:[%s5428_s7 + $0xb0] ss:$8 sps:$4 sm:$0xff]   ;;  %v4193_v7 = vld [vmem:[%s5428_s7 + $0xa0] ss:$8 sps:$4 sm:$0xff]  }
 0x484   : > { %3921 = vmatpush3.bf16.msra.mxu0 %v4149_v47  ;;  %v4186_v47 = vld [vmem:[%s5428_s7 + $0xd4] ss:$8 sps:$4 sm:$0xff]  }
 0x485   : > { %v2061_v51 = vpack.c.bf16 %v2057_v9, %v2056_v8  ;;  %3922 = vmatprep.subr.bf16.mxu0 %v4150_v6  ;;  %v4198_v8 = vld [vmem:[%s5428_s7 + $0x94] ss:$8 sps:$4 sm:$0xff]   ;;  %v4196_v9 = vld [vmem:[%s5428_s7 + $0x90] ss:$8 sps:$4 sm:$0xff]  }
 0x487   : > { %3887 = vmatmul.mubr.bf16.gmra.mxu0 %v2061_v51  ;;  %v4201_v51 = vld [vmem:[%s5428_s7 + $0x84] ss:$8 sps:$4 sm:$0xff]  }
 0x488   : > { %3923 = vmatpush3.bf16.msra.mxu0 %v4150_v6  ;;  %v4195_v6 = vld [vmem:[%s5428_s7 + $0xa4] ss:$8 sps:$4 sm:$0xff]  }
 0x489   : > { %3924 = vmatprep.subr.bf16.mxu0 %v4151_v52 }
 0x48c   : > { %3925 = vmatpush3.bf16.msra.mxu0 %v4151_v52  ;;  %v4199_v52 = vld [vmem:[%s5428_s7 + $0x80] ss:$8 sps:$4 sm:$0xff]  }
 0x48d   : > { %3926 = vmatprep.subr.bf16.mxu0 %v4152_v39 }
 0x490   : > { %3927 = vmatpush3.bf16.msra.mxu0 %v4152_v39  ;;  %v4214_v39 = vld [vmem:[%s5430_s9 + $0x70] ss:$8 sps:$4 sm:$0xff]  }
 0x491   : > { %3928 = vmatprep.subr.bf16.mxu0 %v4153_v42 }
 0x494   : > { %3929 = vmatpush3.bf16.msra.mxu0 %v4153_v42  ;;  %v4216_v42 = vld [vmem:[%s5430_s9 + $0x74] ss:$8 sps:$4 sm:$0xff]  }
 0x495   : > { %3142 = vmatprep.subr.bf16.mxu1 %v4216_v42 }
 0x496   : > { %3143 = vmatpush1.bf16.msra.mxu1 %v4214_v39 }
 0x49c   : > { %v2413_v54 = vpop.xlane.xlu0 %2412 }
 0x49d   : > { %4310 = vrcp.f32 %v2413_v54  ;;  %v4219_v54 = vld [vmem:[%s5430_s9 + $0x64] ss:$8 sps:$4 sm:$0xff]  }
 0x49e   : > { %3144 = vmatprep.subr.bf16.mxu1 %v4219_v54 }
 0x4a0   : > { %v2415_v55 = vpop.xlane.xlu1 %2414 }
 0x4a1   : > { %4312 = vrcp.f32 %v2415_v55  ;;  %v2417_v44 = vpop.xlane.xlu0 %2416  ;;  %v4217_v55 = vld [vmem:[%s5430_s9 + $0x60] ss:$8 sps:$4 sm:$0xff]  }
 0x4a2   : > { %4314 = vrcp.f32 %v2417_v44  ;;  %v4222_v44 = vld [vmem:[%s5430_s9 + $0x54] ss:$8 sps:$4 sm:$0xff]   ;;  %3145 = vmatpush1.bf16.msra.mxu1 %v4217_v55 }
 0x4a3   : > { %3146 = vmatprep.subr.bf16.mxu1 %v4222_v44  ;;  %v4255_v44 = vld [vmem:[%s5430_s9 + $0xa4] ss:$8 sps:$4 sm:$0xff]  }
 0x4a4   : > { %v2419_v45 = vpop.xlane.xlu1 %2418 }
 0x4a5   : > { %4316 = vrcp.f32 %v2419_v45  ;;  %v2421_v58 = vpop.xlane.xlu0 %2420  ;;  %v4220_v45 = vld [vmem:[%s5430_s9 + $0x50] ss:$8 sps:$4 sm:$0xff]  }
 0x4a6   : > { %4318 = vrcp.f32 %v2421_v58  ;;  %v4225_v58 = vld [vmem:[%s5430_s9 + $0x44] ss:$8 sps:$4 sm:$0xff]   ;;  %3147 = vmatpush1.bf16.msra.mxu1 %v4220_v45  ;;  %v4253_v45 = vld [vmem:[%s5430_s9 + $0xa0] ss:$8 sps:$4 sm:$0xff]  }
 0x4a7   : > { %3148 = vmatprep.subr.bf16.mxu1 %v4225_v58  ;;  %v4258_v58 = vld [vmem:[%s5430_s9 + $0x94] ss:$8 sps:$4 sm:$0xff]  }
 0x4a8   : > { %v2423_v59 = vpop.xlane.xlu1 %2422 }
 0x4a9   : > { %4320 = vrcp.f32 %v2423_v59  ;;  %v2425_v62 = vpop.xlane.xlu0 %2424  ;;  %v4223_v59 = vld [vmem:[%s5430_s9 + $0x40] ss:$8 sps:$4 sm:$0xff]  }
 0x4aa   : > { %4322 = vrcp.f32 %v2425_v62  ;;  %v4311_v63 = vpop.eup %4310  ;;  %v4228_v62 = vld [vmem:[%s5430_s9 + $0x34] ss:$8 sps:$4 sm:$0xff]   ;;  %3149 = vmatpush1.bf16.msra.mxu1 %v4223_v59  ;;  %v4256_v59 = vld [vmem:[%s5430_s9 + $0x90] ss:$8 sps:$4 sm:$0xff]  }
 0x4ab   : > { %v2436_v4 = vmul.f32 %v4311_v63, %v5066_v61  ;;  %v4226_v63 = vld [vmem:[%s5430_s9 + $0x30] ss:$8 sps:$4 sm:$0xff]   ;;  %3150 = vmatprep.subr.bf16.mxu1 %v4228_v62  ;;  %v4261_v62 = vld [vmem:[%s5430_s9 + $0x84] ss:$8 sps:$4 sm:$0xff]  }
 0x4ac   : > { %v2427_v53 = vpop.xlane.xlu1 %2426 }
 0x4ad   : > { %4324 = vrcp.f32 %v2427_v53  ;;  %v4231_v53 = vld [vmem:[%s5430_s9 + $0x24] ss:$8 sps:$4 sm:$0xff]  }
 0x4ae   : > { %v4313_v3 = vpop.eup %4312  ;;  %3151 = vmatpush1.bf16.msra.mxu1 %v4226_v63  ;;  %v4259_v63 = vld [vmem:[%s5430_s9 + $0x80] ss:$8 sps:$4 sm:$0xff]  }
 0x4af   : > { %v2437_v57 = vmul.f32 %v4313_v3, %v5069_v14  ;;  %v4315_v56 = vpop.eup %4314  ;;  %v4229_v3 = vld [vmem:[%s5430_s9 + $0x20] ss:$8 sps:$4 sm:$0xff]   ;;  %3152 = vmatprep.subr.bf16.mxu1 %v4231_v53 }
 0x4b0   : > { %v2438_v11 = vmul.f32 %v4315_v56, %v5071_v15  ;;  %v4156_v15 = vld [vmem:[%s5428_s7 + $0x74] ss:$8 sps:$4 sm:$0xff]   ;;  %v2641_v53 = vld [vmem:[%s5429_s8] sm:$0x3] }
 0x4b1   : > { %v2444_v5 = vpack.c.bf16 %v2437_v57, %v2436_v4  ;;  %2853 = vmatprep.subr.bf16.mxu0 %v4156_v15  ;;  %v4234_v4 = vld [vmem:[%s5430_s9 + $0x14] ss:$8 sps:$4 sm:$0xff]  }
 0x4b2   : > { %v4317_v10 = vpop.eup %4316  ;;  %3153 = vmatpush1.bf16.msra.mxu1 %v4229_v3 }
 0x4b3   : > { %3930 = vmatprep.mubr.bf16.mxu0 %v2444_v5  ;;  %v2439_v12 = vmul.f32 %v4317_v10, %v5075_v0  ;;  %v4319_v60 = vpop.eup %4318  ;;  %v4154_v0 = vld [vmem:[%s5428_s7 + $0x70] ss:$8 sps:$4 sm:$0xff]   ;;  %3154 = vmatprep.subr.bf16.mxu1 %v4234_v4  ;;  %v5303_v4 = vrot.slane %v2641_v53, %v4976_v46 }
 0x4b4   : > { %v2440_v19 = vmul.f32 %v4319_v60, %v5077_v1  ;;  %v4159_v1 = vld [vmem:[%s5428_s7 + $0x64] ss:$8 sps:$4 sm:$0xff]   ;;  %v4232_v10 = vld [vmem:[%s5430_s9 + $0x10] ss:$8 sps:$4 sm:$0xff]  }
 0x4b5   : > { %v2445_v13 = vpack.c.bf16 %v2439_v12, %v2438_v11  ;;  %v4237_v12 = vld [vmem:[%s5430_s9 + $0x4] ss:$8 sps:$4 sm:$0xff]  }
 0x4b6   : > { %v4321_v18 = vpop.eup %4320  ;;  %3155 = vmatpush1.bf16.msra.mxu1 %v4232_v10 }
 0x4b7   : > { %3931 = vmatmul.mubr.bf16.vlgmr.msra.gmra.mxu0 %v2445_v13  ;;  %v2441_v20 = vmul.f32 %v4321_v18, %v5081_v2  ;;  %v4323_v22 = vpop.eup %4322  ;;  %v4157_v2 = vld [vmem:[%s5428_s7 + $0x60] ss:$8 sps:$4 sm:$0xff]   ;;  %3156 = vmatprep.subr.bf16.mxu1 %v4237_v12 }
 0x4b8   : > { %v2442_v14 = vmul.f32 %v4323_v22, %v5083_v16  ;;  %2854 = vmatpush1.bf16.msra.mxu0 %v4154_v0  ;;  %v4160_v16 = vld [vmem:[%s5428_s7 + $0x50] ss:$8 sps:$4 sm:$0xff]   ;;  %v4240_v22 = vld [vmem:[%s5430_s9 + $0xf4] ss:$8 sps:$4 sm:$0xff]  }
 0x4b9   : > { %v2446_v61 = vpack.c.bf16 %v2441_v20, %v2440_v19  ;;  %2855 = vmatprep.subr.bf16.mxu0 %v4159_v1  ;;  %v4235_v19 = vld [vmem:[%s5430_s9] ss:$8 sps:$4 sm:$0xff]   ;;  %v4244_v1 = vld [vmem:[%s5430_s9 + $0xd0] ss:$8 sps:$4 sm:$0xff]  }
 0x4ba   : > { %v4325_v23 = vpop.eup %4324  ;;  %3157 = vmatpush1.bf16.msra.mxu1 %v4235_v19 }
 0x4bb   : > { %3934 = vmatprep.mubr.bf16.mxu0 %v2446_v61  ;;  %v2443_v25 = vmul.f32 %v4325_v23, %v5087_v17  ;;  %v4162_v17 = vld [vmem:[%s5428_s7 + $0x54] ss:$8 sps:$4 sm:$0xff]   ;;  %v4238_v61 = vld [vmem:[%s5430_s9 + $0xf0] ss:$8 sps:$4 sm:$0xff]   ;;  %3158 = vmatprep.subr.bf16.mxu1 %v4240_v22  ;;  %v4243_v23 = vld [vmem:[%s5430_s9 + $0xe4] ss:$8 sps:$4 sm:$0xff]  }
 0x4bc   : > { %2856 = vmatpush1.bf16.msra.mxu0 %v4157_v2  ;;  %v4327_v22 = vld [vmem:[%s4870_s28 + $0x8] sm:$0xff] }
 0x4bd   : > { %v2447_v26 = vpack.c.bf16 %v2443_v25, %v2442_v14  ;;  %2857 = vmatprep.subr.bf16.mxu0 %v4162_v17  ;;  %v4241_v14 = vld [vmem:[%s5430_s9 + $0xe0] ss:$8 sps:$4 sm:$0xff]   ;;  %v4246_v25 = vld [vmem:[%s5430_s9 + $0xd4] ss:$8 sps:$4 sm:$0xff]  }
 0x4be   : > { %3159 = vmatpush2.bf16.msra.mxu1 %v4238_v61 }
 0x4bf   : > { %3935 = vmatmul.mubr.bf16.gmra.mxu0 %v2447_v26  ;;  %3160 = vmatprep.subr.bf16.mxu1 %v4243_v23  ;;  %v4328_v23 = vld [vmem:[%s4870_s28 + $0x18] sm:$0xff] }
 0x4c0   : > { %2858 = vmatpush1.bf16.msra.mxu0 %v4160_v16  ;;  %v4249_v16 = vld [vmem:[%s5430_s9 + $0xc4] ss:$8 sps:$4 sm:$0xff]  }
 0x4c1   : > { %2859 = vmatprep.subr.bf16.mxu0 %v4165_v27 }
 0x4c2   : > { %3161 = vmatpush2.bf16.msra.mxu1 %v4241_v14 }
 0x4c3   : > { %3162 = vmatprep.subr.bf16.mxu1 %v4246_v25  ;;  %v4329_v25 = vld [vmem:[%s4870_s28] sm:$0xff] }
 0x4c4   : > { %2860 = vmatpush1.bf16.msra.mxu0 %v4163_v29 }
 0x4c5   : > { %2861 = vmatprep.subr.bf16.mxu0 %v4168_v30  ;;  %v4247_v30 = vld [vmem:[%s5430_s9 + $0xc0] ss:$8 sps:$4 sm:$0xff]  }
 0x4c6   : > { %3163 = vmatpush2.bf16.msra.mxu1 %v4244_v1 }
 0x4c7   : > { %3164 = vmatprep.subr.bf16.mxu1 %v4249_v16 }
 0x4c8   : > { %2862 = vmatpush1.bf16.msra.mxu0 %v4166_v32 }
 0x4c9   : > { %2863 = vmatprep.subr.bf16.mxu0 %v4171_v33  ;;  %v4252_v33 = vld [vmem:[%s5430_s9 + $0xb4] ss:$8 sps:$4 sm:$0xff]  }
 0x4ca   : > { %3165 = vmatpush2.bf16.msra.mxu1 %v4247_v30 }
 0x4cb   : > { %3166 = vmatprep.subr.bf16.mxu1 %v4252_v33 }
 0x4cc   : > { %2864 = vmatpush1.bf16.msra.mxu0 %v4169_v34  ;;  %v4250_v34 = vld [vmem:[%s5430_s9 + $0xb0] ss:$8 sps:$4 sm:$0xff]  }
 0x4cd   : > { %2865 = vmatprep.subr.bf16.mxu0 %v4174_v35 }
 0x4ce   : > { %3167 = vmatpush2.bf16.msra.mxu1 %v4250_v34 }
 0x4cf   : > { %3168 = vmatprep.subr.bf16.mxu1 %v4255_v44 }
 0x4d0   : > { %2866 = vmatpush1.bf16.msra.mxu0 %v4172_v37 }
 0x4d1   : > { %2867 = vmatprep.subr.bf16.mxu0 %v4177_v38 }
 0x4d2   : > { %3169 = vmatpush2.bf16.msra.mxu1 %v4253_v45 }
 0x4d3   : > { %3170 = vmatprep.subr.bf16.mxu1 %v4258_v58 }
 0x4d4   : > { %2868 = vmatpush1.bf16.msra.mxu0 %v4175_v40 }
 0x4d5   : > { %2869 = vmatprep.subr.bf16.mxu0 %v4180_v41 }
 0x4d6   : > { %3171 = vmatpush2.bf16.msra.mxu1 %v4256_v59 }
 0x4d7   : > { %3172 = vmatprep.subr.bf16.mxu1 %v4261_v62 }
 0x4d8   : > { %2870 = vmatpush2.bf16.msra.mxu0 %v4178_v43 }
 0x4d9   : > { %2871 = vmatprep.subr.bf16.mxu0 %v4183_v24 }
 0x4da   : > { %3173 = vmatpush2.bf16.msra.mxu1 %v4259_v63 }
 0x4dc   : > { %2872 = vmatpush2.bf16.msra.mxu0 %v4181_v31 }
 0x4dd   : > { %2873 = vmatprep.subr.bf16.mxu0 %v4186_v47 }
 0x4e0   : > { %2874 = vmatpush2.bf16.msra.mxu0 %v4184_v48 }
 0x4e1   : > { %2875 = vmatprep.subr.bf16.mxu0 %v4189_v49 }
 0x4e4   : > { %2876 = vmatpush2.bf16.msra.mxu0 %v4187_v28 }
 0x4e5   : > { %2877 = vmatprep.subr.bf16.mxu0 %v4192_v50 }
 0x4e8   : > { %2878 = vmatpush2.bf16.msra.mxu0 %v4190_v36 }
 0x4e9   : > { %2879 = vmatprep.subr.bf16.mxu0 %v4195_v6 }
 0x4ec   : > { %2880 = vmatpush2.bf16.msra.mxu0 %v4193_v7 }
 0x4ed   : > { %2881 = vmatprep.subr.bf16.mxu0 %v4198_v8 }
 0x4f0   : > { %2882 = vmatpush2.bf16.msra.mxu0 %v4196_v9 }
 0x4f1   : > { %2883 = vmatprep.subr.bf16.mxu0 %v4201_v51 }
 0x4f4   : > { %2884 = vmatpush2.bf16.msra.mxu0 %v4199_v52 }
 0x537   : > { %v3884_v57 = vpop.f32.mrf.mxu0 }
 0x538   : > { %v3761_v56 = vpack.c.bf16 %v3884_v57, %v3884_v57  ;;  %v5306_v57 = vrot.slane %v2641_v53, %v4970_v21 }
 0x539   : > { %v2144_v5 = vpop.f32.mrf.mxu0 }
 0x53a   : > { %2209 = vst [vmem:[#allocation3 + $0x10] sm:$0xf] %v3761_v56  ;;  %v3759_v11 = vpack.c.bf16 %v2144_v5, %v2144_v5 }
 0x53b   : > { %v3885_v60 = vpop.f32.mrf.mxu0 }
 0x53c   : > { %2207 = vst [vmem:[#allocation3] sm:$0xf] %v3759_v11  ;;  %v3762_v13 = vpack.c.bf16 %v3885_v60, %v3885_v60 }
 0x53d   : > { %v2147_v18 = vpop.f32.mrf.mxu0 }
 0x53e   : > { %2210 = vst [vmem:[#allocation3 + $0x18] sm:$0xf] %v3762_v13  ;;  %v3760_v20 = vpack.c.bf16 %v2147_v18, %v2147_v18  ;;  %v4326_v18 = vld [vmem:[%s4870_s28 + $0x10] sm:$0xff] }
 0x540   : > { %2208 = vst [vmem:[#allocation3 + $0x8] sm:$0xf] %v3760_v20 }
 0x545   : > { %v4207_v52 = vld [vmem:[#allocation3 + $0x10] ss:$8 sps:$4 sm:$0xff]  }
 0x547   : > { %v3888_v26 = vpop.f32.mrf.mxu0  ;;  %v4202_v8 = vld [vmem:[#allocation3] ss:$8 sps:$4 sm:$0xff]  }
 0x548   : > { %v3765_v15 = vpack.c.bf16 %v3888_v26, %v3888_v26 }
 0x549   : > { %v2160_v0 = vpop.f32.mrf.mxu0 }
 0x54a   : > { %2213 = vst [vmem:[#allocation3 + $0x30] sm:$0xf] %v3765_v15  ;;  %v3763_v2 = vpack.c.bf16 %v2160_v0, %v2160_v0 }
 0x54b   : > { %v3889_v17 = vpop.f32.mrf.mxu0 }
 0x54c   : > { %2211 = vst [vmem:[#allocation3 + $0x20] sm:$0xf] %v3763_v2  ;;  %v3766_v27 = vpack.c.bf16 %v3889_v17, %v3889_v17 }
 0x54d   : > { %v2163_v29 = vpop.f32.mrf.mxu0 }
 0x54e   : > { %2214 = vst [vmem:[#allocation3 + $0x38] sm:$0xf] %v3766_v27  ;;  %v3764_v32 = vpack.c.bf16 %v2163_v29, %v2163_v29 }
 0x550   : > { %2212 = vst [vmem:[#allocation3 + $0x28] sm:$0xf] %v3764_v32  ;;  %v4330_v32 = vld [vmem:[%s4870_s28 + $0x30] sm:$0xff] }
 0x555   : > { %v4213_v55 = vld [vmem:[#allocation3 + $0x30] ss:$8 sps:$4 sm:$0xff]  }
 0x557   : > { %v4210_v42 = vld [vmem:[#allocation3 + $0x20] ss:$8 sps:$4 sm:$0xff]  }
 0x577   : > { %v3932_v35 = vpop.f32.mrf.mxu0 }
 0x578   : > { %v3769_v37 = vpack.c.bf16 %v3932_v35, %v3932_v35  ;;  %v4331_v35 = vld [vmem:[%s4870_s28 + $0x28] sm:$0xff] }
 0x579   : > { %v2530_v38 = vpop.f32.mrf.mxu0 }
 0x57a   : > { %2595 = vst [vmem:[#allocation3 + $0x14] sm:$0xf] %v3769_v37  ;;  %v3767_v40 = vpack.c.bf16 %v2530_v38, %v2530_v38  ;;  %v4332_v38 = vld [vmem:[%s4870_s28 + $0x38] sm:$0xff] }
 0x57b   : > { %v3933_v41 = vpop.f32.mrf.mxu0 }
 0x57c   : > { %2593 = vst [vmem:[#allocation3 + $0x4] sm:$0xf] %v3767_v40  ;;  %v3770_v43 = vpack.c.bf16 %v3933_v41, %v3933_v41  ;;  %v4333_v41 = vld [vmem:[%s4870_s28 + $0x20] sm:$0xff] }
 0x57d   : > { %v2533_v24 = vpop.f32.mrf.mxu0 }
 0x57e   : > { %2596 = vst [vmem:[#allocation3 + $0x1c] sm:$0xf] %v3770_v43  ;;  %v3768_v31 = vpack.c.bf16 %v2533_v24, %v2533_v24 }
 0x57f   : > { %v3936_v47 = vpop.f32.mrf.mxu0 }
 0x580   : > { %2594 = vst [vmem:[#allocation3 + $0xc] sm:$0xf] %v3768_v31  ;;  %v3773_v48 = vpack.c.bf16 %v3936_v47, %v3936_v47 }
 0x581   : > { %v2546_v49 = vpop.f32.mrf.mxu0 }
 0x582   : > { %2599 = vst [vmem:[#allocation3 + $0x34] sm:$0xf] %v3773_v48  ;;  %v3771_v28 = vpack.c.bf16 %v2546_v49, %v2546_v49 }
 0x583   : > { %v3937_v50 = vpop.f32.mrf.mxu0 }
 0x584   : > { %2597 = vst [vmem:[#allocation3 + $0x24] sm:$0xf] %v3771_v28  ;;  %v3774_v36 = vpack.c.bf16 %v3937_v50, %v3937_v50 }
 0x585   : > { %v2549_v6 = vpop.f32.mrf.mxu0  ;;  %v4205_v51 = vld [vmem:[#allocation3 + $0x14] ss:$8 sps:$4 sm:$0xff]  }
 0x586   : > { %2600 = vst [vmem:[#allocation3 + $0x3c] sm:$0xf] %v3774_v36  ;;  %v3772_v7 = vpack.c.bf16 %v2549_v6, %v2549_v6 }
 0x587   : > { %v4204_v9 = vld [vmem:[#allocation3 + $0x4] ss:$8 sps:$4 sm:$0xff]  }
 0x588   : > { %2598 = vst [vmem:[#allocation3 + $0x2c] sm:$0xf] %v3772_v7  ;;  %2885 = vmatprep.mubr.bf16.mxu0 %v4204_v9  ;;  %v4334_v7 = vld [vmem:[%s4870_s28 + $0x50] sm:$0xff] }
 0x589   : > { %2886 = vmatmul.mubr.bf16.vlgmr.msra.gmra.mxu0 %v4202_v8 }
 0x58a   : > { %2895 = vmatprep.mubr.bf16.mxu0 %v4205_v51  ;;  %v4335_v51 = vld [vmem:[%s4870_s28 + $0x48] sm:$0xff] }
 0x58d   : > { %v4211_v54 = vld [vmem:[#allocation3 + $0x34] ss:$8 sps:$4 sm:$0xff]  }
 0x58f   : > { %v4208_v39 = vld [vmem:[#allocation3 + $0x24] ss:$8 sps:$4 sm:$0xff]  }
 0x591   : > { %2896 = vmatmul.mubr.bf16.gmra.mxu0 %v4207_v52 }
 0x592   : > { %2905 = vmatprep.mubr.bf16.mxu0 %v4208_v39  ;;  %v4336_v39 = vld [vmem:[%s4870_s28 + $0x58] sm:$0xff] }
 0x599   : > { %2906 = vmatmul.mubr.bf16.gmra.mxu0 %v4210_v42 }
 0x59a   : > { %2915 = vmatprep.mubr.bf16.mxu0 %v4211_v54  ;;  %v4337_v54 = vld [vmem:[%s4870_s28 + $0x40] sm:$0xff] }
 0x5a1   : > { %2916 = vmatmul.mubr.bf16.gmra.mxu0 %v4213_v55 }
 0x649   : > { %v2887_v3 = vpop.f32.mrf.mxu0 }
 0x64a   : > { %v2888_v12 = vadd.f32 %v2887_v3, %v5306_v57 }
 0x64b   : > { %v2889_v56 = vpop.f32.mrf.mxu0 }
 0x64c   : > { %v2890_v10 = vadd.f32 %v2889_v56, %v5303_v4  ;;  %v2926_v26 = vsub.f32 %v4329_v25, %v2888_v12 }
 0x64d   : > { %v2891_v5 = vpop.f32.mrf.mxu0 }
 0x64e   : > { %v2892_v11 = vadd.f32 %v2891_v5, %v5306_v57  ;;  %v2927_v61 = vsub.f32 %v4327_v22, %v2890_v10  ;;  %v4338_v5 = vld [vmem:[%s4870_s28 + $0x70] sm:$0xff] }
 0x64f   : > { %v2893_v60 = vpop.f32.mrf.mxu0 }
 0x650   : > { %v2894_v13 = vadd.f32 %v2893_v60, %v5303_v4  ;;  %v2928_v19 = vsub.f32 %v4326_v18, %v2892_v11  ;;  %v4339_v11 = vld [vmem:[%s4870_s28 + $0x68] sm:$0xff]  ;;  %v4340_v60 = vld [vmem:[%s4870_s28 + $0x78] sm:$0xff]  ;;  %v4341_v18 = vld [vmem:[%s4870_s28 + $0x60] sm:$0xff] }
 0x651   : > { %v2897_v20 = vpop.f32.mrf.mxu0 }
 0x652   : > { %v2929_v14 = vsub.f32 %v4328_v23, %v2894_v13  ;;  %v2942_v1 = vpack.c.bf16 %v2928_v19, %v2926_v26  ;;  %v2898_v27 = vadd.f32 %v2897_v20, %v5306_v57 }
 0x653   : > { %v2899_v15 = vpop.f32.mrf.mxu0 }
 0x654   : > { %v2943_v0 = vpack.c.bf16 %v2929_v14, %v2927_v61  ;;  %v2900_v16 = vadd.f32 %v2899_v15, %v5303_v4  ;;  %v2930_v43 = vsub.f32 %v4333_v41, %v2898_v27 }
 0x655   : > { %v2901_v2 = vpop.f32.mrf.mxu0 }
 0x656   : > { %v2902_v17 = vadd.f32 %v2901_v2, %v5306_v57  ;;  %3174 = vmatprep.mubr.bf16.mxu1 %v2943_v0  ;;  %v2931_v37 = vsub.f32 %v4331_v35, %v2900_v16 }
 0x657   : > { %v2903_v29 = vpop.f32.mrf.mxu0  ;;  %3175 = vmatmul.mubr.bf16.vlgmr.msra.gmra.mxu1 %v2942_v1 }
 0x658   : > { %v2904_v30 = vadd.f32 %v2903_v29, %v5303_v4  ;;  %v2932_v33 = vsub.f32 %v4330_v32, %v2902_v17 }
 0x659   : > { %v2907_v34 = vpop.f32.mrf.mxu0 }
 0x65a   : > { %v2933_v40 = vsub.f32 %v4332_v38, %v2904_v30  ;;  %v2944_v48 = vpack.c.bf16 %v2932_v33, %v2930_v43  ;;  %v2908_v50 = vadd.f32 %v2907_v34, %v5306_v57 }
 0x65b   : > { %v2909_v24 = vpop.f32.mrf.mxu0 }
 0x65c   : > { %v2945_v31 = vpack.c.bf16 %v2933_v40, %v2931_v37  ;;  %v2910_v49 = vadd.f32 %v2909_v24, %v5303_v4  ;;  %v2934_v55 = vsub.f32 %v4337_v54, %v2908_v50 }
 0x65d   : > { %v2911_v47 = vpop.f32.mrf.mxu0 }
 0x65e   : > { %v2912_v28 = vadd.f32 %v2911_v47, %v5306_v57  ;;  %3184 = vmatprep.mubr.bf16.mxu1 %v2945_v31  ;;  %v2935_v52 = vsub.f32 %v4335_v51, %v2910_v49 }
 0x65f   : > { %v2913_v36 = vpop.f32.mrf.mxu0  ;;  %3185 = vmatmul.mubr.bf16.gmra.mxu1 %v2944_v48 }
 0x660   : > { %v2914_v6 = vadd.f32 %v2913_v36, %v5303_v4  ;;  %v2936_v8 = vsub.f32 %v4334_v7, %v2912_v28 }
 0x661   : > { %v2917_v9 = vpop.f32.mrf.mxu0 }
 0x662   : > { %v2937_v42 = vsub.f32 %v4336_v39, %v2914_v6  ;;  %v2946_v59 = vpack.c.bf16 %v2936_v8, %v2934_v55  ;;  %v2918_v53 = vadd.f32 %v2917_v9, %v5306_v57 }
 0x663   : > { %v2919_v44 = vpop.f32.mrf.mxu0 }
 0x664   : > { %v2947_v45 = vpack.c.bf16 %v2937_v42, %v2935_v52  ;;  %v2920_v62 = vadd.f32 %v2919_v44, %v5303_v4  ;;  %v2938_v19 = vsub.f32 %v4341_v18, %v2918_v53 }
 0x665   : > { %v2921_v58 = vpop.f32.mrf.mxu0 }
 0x666   : > { %v2922_v63 = vadd.f32 %v2921_v58, %v5306_v57  ;;  %3194 = vmatprep.mubr.bf16.mxu1 %v2947_v45  ;;  %v2939_v12 = vsub.f32 %v4339_v11, %v2920_v62  ;;  %v3215_v57 = vld [vmem:[%s5431_s10] sm:$0x3] }
 0x667   : > { %v2923_v3 = vpop.f32.mrf.mxu0  ;;  %3195 = vmatmul.mubr.bf16.gmra.mxu1 %v2946_v59  ;;  %v5347_v61 = vrot.slane %v3215_v57, %v4970_v21  ;;  %v5353_v14 = vrot.slane %v3215_v57, %v4976_v46 }
 0x668   : > { %v2924_v56 = vadd.f32 %v2923_v3, %v5303_v4  ;;  %v2940_v10 = vsub.f32 %v4338_v5, %v2922_v63  ;;  %v3243_v4 = vld [vmem:[%s5443_s14] sm:$0x3] }
 0x669   : > { %v5350_v23 = vrot.slane %v3243_v4, %v4970_v21  ;;  %v5357_v15 = vrot.slane %v3243_v4, %v4976_v46 }
 0x66a   : > { %v2941_v13 = vsub.f32 %v4340_v60, %v2924_v56  ;;  %v2948_v22 = vpack.c.bf16 %v2940_v10, %v2938_v19 }
 0x66c   : > { %v2949_v20 = vpack.c.bf16 %v2941_v13, %v2939_v12 }
 0x66e   : > { %3204 = vmatprep.mubr.bf16.mxu1 %v2949_v20 }
 0x66f   : > { %3205 = vmatmul.mubr.bf16.gmra.mxu1 %v2948_v22 }
 0x717   : > { %v3176_v25 = vpop.f32.mrf.mxu1 }
 0x718   : > { %v3227_v26 = vmul.f32 %v5347_v61, %v3176_v25 }
 0x719   : > { %v3178_v0 = vpop.f32.mrf.mxu1 }
 0x71a   : > { %v3255_v1 = vadd.f32 %v5350_v23, %v3227_v26  ;;  %v3228_v2 = vmul.f32 %v5353_v14, %v3178_v0 }
 0x71b   : > { %v3180_v16 = vpop.f32.mrf.mxu1 }
 0x71c   : > { %vm3271_vm0 = vcmp.ge.f32.partialorder %v3255_v1, 0.0  ;;  %v3287_v21 = vmul.f32 0.2, %v3255_v1  ;;  %v3256_v17 = vadd.f32 %v5357_v15, %v3228_v2  ;;  %v3229_v27 = vmul.f32 %v5347_v61, %v3180_v16 }
 0x71d   : > { %v3182_v29 = vpop.f32.mrf.mxu1 }
 0x71e   : > { %v3303_v30 = vsel %vm3271_vm0, %v3255_v1, %v3287_v21  ;;  %vm3272_vm1 = vcmp.ge.f32.partialorder %v3256_v17, 0.0  ;;  %v3288_v32 = vmul.f32 0.2, %v3256_v17  ;;  %v3257_v46 = vadd.f32 %v5350_v23, %v3229_v27 }
 0x71f   : > { %3319 = vst [vmem:[%s4498_s13] sm:$0xff] %v3303_v30  ;;  %v3230_v33 = vmul.f32 %v5353_v14, %v3182_v29  ;;  %v3186_v34 = vpop.f32.mrf.mxu1 }
 0x720   : > { %v3304_v35 = vsel %vm3272_vm1, %v3256_v17, %v3288_v32  ;;  %vm3273_vm2 = vcmp.ge.f32.partialorder %v3257_v46, 0.0  ;;  %v3289_v37 = vmul.f32 0.2, %v3257_v46  ;;  %v3231_v38 = vmul.f32 %v5347_v61, %v3186_v34 }
 0x721   : > { %3320 = vst [vmem:[%s4498_s13 + $0x8] sm:$0xff] %v3304_v35  ;;  %v3258_v40 = vadd.f32 %v5357_v15, %v3230_v33  ;;  %v3188_v41 = vpop.f32.mrf.mxu1 }
 0x722   : > { %v3305_v43 = vsel %vm3273_vm2, %v3257_v46, %v3289_v37  ;;  %v3259_v24 = vadd.f32 %v5350_v23, %v3231_v38  ;;  %v3232_v31 = vmul.f32 %v5353_v14, %v3188_v41 }
 0x723   : > { %3321 = vst [vmem:[%s4498_s13 + $0x10] sm:$0xff] %v3305_v43  ;;  %vm3274_vm3 = vcmp.ge.f32.partialorder %v3258_v40, 0.0  ;;  %v3290_v47 = vmul.f32 0.2, %v3258_v40  ;;  %v3190_v48 = vpop.f32.mrf.mxu1 }
 0x724   : > { %vm3275_vm4 = vcmp.ge.f32.partialorder %v3259_v24, 0.0  ;;  %v3291_v49 = vmul.f32 0.2, %v3259_v24  ;;  %v3260_v28 = vadd.f32 %v5357_v15, %v3232_v31  ;;  %v3233_v50 = vmul.f32 %v5347_v61, %v3190_v48 }
 0x725   : > { %v3306_v36 = vsel %vm3274_vm3, %v3258_v40, %v3290_v47  ;;  %v3192_v6 = vpop.f32.mrf.mxu1 }
 0x726   : > { %3322 = vst [vmem:[%s4498_s13 + $0x18] sm:$0xff] %v3306_v36  ;;  %v3307_v7 = vsel %vm3275_vm4, %v3259_v24, %v3291_v49  ;;  %vm3276_vm5 = vcmp.ge.f32.partialorder %v3260_v28, 0.0  ;;  %v3292_v8 = vmul.f32 0.2, %v3260_v28  ;;  %v3261_v9 = vadd.f32 %v5350_v23, %v3233_v50 }
 0x727   : > { %3323 = vst [vmem:[%s4498_s13 + $0x20] sm:$0xff] %v3307_v7  ;;  %v3234_v51 = vmul.f32 %v5353_v14, %v3192_v6  ;;  %v3196_v52 = vpop.f32.mrf.mxu1 }
 0x728   : > { %v3308_v39 = vsel %vm3276_vm5, %v3260_v28, %v3292_v8  ;;  %vm3277_vm6 = vcmp.ge.f32.partialorder %v3261_v9, 0.0  ;;  %v3293_v42 = vmul.f32 0.2, %v3261_v9  ;;  %v3235_v54 = vmul.f32 %v5347_v61, %v3196_v52 }
 0x729   : > { %3324 = vst [vmem:[%s4498_s13 + $0x28] sm:$0xff] %v3308_v39  ;;  %v3262_v55 = vadd.f32 %v5357_v15, %v3234_v51  ;;  %v3198_v44 = vpop.f32.mrf.mxu1 }
 0x72a   : > { %v3309_v45 = vsel %vm3277_vm6, %v3261_v9, %v3293_v42  ;;  %v3263_v58 = vadd.f32 %v5350_v23, %v3235_v54  ;;  %v3236_v59 = vmul.f32 %v5353_v14, %v3198_v44 }
 0x72b   : > { %3325 = vst [vmem:[%s4498_s13 + $0x30] sm:$0xff] %v3309_v45  ;;  %vm3278_vm7 = vcmp.ge.f32.partialorder %v3262_v55, 0.0  ;;  %v3294_v62 = vmul.f32 0.2, %v3262_v55  ;;  %v3200_v63 = vpop.f32.mrf.mxu1 }
 0x72c   : > { %vm3279_vm8 = vcmp.ge.f32.partialorder %v3263_v58, 0.0  ;;  %v3295_v53 = vmul.f32 0.2, %v3263_v58  ;;  %v3264_v3 = vadd.f32 %v5357_v15, %v3236_v59  ;;  %v3237_v56 = vmul.f32 %v5347_v61, %v3200_v63 }
 0x72d   : > { %v3310_v5 = vsel %vm3278_vm7, %v3262_v55, %v3294_v62  ;;  %v3202_v10 = vpop.f32.mrf.mxu1 }
 0x72e   : > { %3326 = vst [vmem:[%s4498_s13 + $0x38] sm:$0xff] %v3310_v5  ;;  %v3311_v11 = vsel %vm3279_vm8, %v3263_v58, %v3295_v53  ;;  %vm3280_vm9 = vcmp.ge.f32.partialorder %v3264_v3, 0.0  ;;  %v3296_v12 = vmul.f32 0.2, %v3264_v3  ;;  %v3265_v60 = vadd.f32 %v5350_v23, %v3237_v56 }
 0x72f   : > { %3327 = vst [vmem:[%s4498_s13 + $0x40] sm:$0xff] %v3311_v11  ;;  %v3238_v13 = vmul.f32 %v5353_v14, %v3202_v10  ;;  %v3206_v18 = vpop.f32.mrf.mxu1 }
 0x730   : > { %v3312_v19 = vsel %vm3280_vm9, %v3264_v3, %v3296_v12  ;;  %vm3281_vm10 = vcmp.ge.f32.partialorder %v3265_v60, 0.0  ;;  %v3297_v20 = vmul.f32 0.2, %v3265_v60  ;;  %v3239_v22 = vmul.f32 %v5347_v61, %v3206_v18 }
 0x731   : > { %3328 = vst [vmem:[%s4498_s13 + $0x48] sm:$0xff] %v3312_v19  ;;  %v3266_v57 = vadd.f32 %v5357_v15, %v3238_v13  ;;  %v3208_v4 = vpop.f32.mrf.mxu1 }
 0x732   : > { %v3313_v25 = vsel %vm3281_vm10, %v3265_v60, %v3297_v20  ;;  %v3267_v26 = vadd.f32 %v5350_v23, %v3239_v22  ;;  %v3240_v0 = vmul.f32 %v5353_v14, %v3208_v4 }
 0x733   : > { %3329 = vst [vmem:[%s4498_s13 + $0x50] sm:$0xff] %v3313_v25  ;;  %vm3282_vm11 = vcmp.ge.f32.partialorder %v3266_v57, 0.0  ;;  %v3298_v1 = vmul.f32 0.2, %v3266_v57  ;;  %v3210_v2 = vpop.f32.mrf.mxu1 }
 0x734   : > { %vm3283_vm12 = vcmp.ge.f32.partialorder %v3267_v26, 0.0  ;;  %v3299_v16 = vmul.f32 0.2, %v3267_v26  ;;  %v3268_v21 = vadd.f32 %v5357_v15, %v3240_v0  ;;  %v3241_v17 = vmul.f32 %v5347_v61, %v3210_v2 }
 0x735   : > { %v3314_v27 = vsel %vm3282_vm11, %v3266_v57, %v3298_v1  ;;  %v3212_v29 = vpop.f32.mrf.mxu1 }
 0x736   : > { %3330 = vst [vmem:[%s4498_s13 + $0x58] sm:$0xff] %v3314_v27  ;;  %v3315_v30 = vsel %vm3283_vm12, %v3267_v26, %v3299_v16  ;;  %vm3284_vm13 = vcmp.ge.f32.partialorder %v3268_v21, 0.0  ;;  %v3300_v32 = vmul.f32 0.2, %v3268_v21  ;;  %v3269_v46 = vadd.f32 %v5350_v23, %v3241_v17 }
 0x737   : > { %3331 = vst [vmem:[%s4498_s13 + $0x60] sm:$0xff] %v3315_v30  ;;  %v3242_v33 = vmul.f32 %v5353_v14, %v3212_v29 }
 0x738   : > { %v3316_v34 = vsel %vm3284_vm13, %v3268_v21, %v3300_v32  ;;  %vm3285_vm14 = vcmp.ge.f32.partialorder %v3269_v46, 0.0  ;;  %v3301_v35 = vmul.f32 0.2, %v3269_v46 }
 0x739   : > { %3332 = vst [vmem:[%s4498_s13 + $0x68] sm:$0xff] %v3316_v34  ;;  %v3270_v37 = vadd.f32 %v5357_v15, %v3242_v33 }
 0x73a   : > { %v3317_v61 = vsel %vm3285_vm14, %v3269_v46, %v3301_v35 }
 0x73b   : > { %3333 = vst [vmem:[%s4498_s13 + $0x70] sm:$0xff] %v3317_v61  ;;  %vm3286_vm15 = vcmp.ge.f32.partialorder %v3270_v37, 0.0  ;;  %v3302_v38 = vmul.f32 0.2, %v3270_v37 }
 0x73d   : > { %v3318_v40 = vsel %vm3286_vm15, %v3270_v37, %v3302_v38 }
 0x73e   : > { %3334 = vst [vmem:[%s4498_s13 + $0x78] sm:$0xff] %v3318_v40 }
 0x73f PF: > { %s5444_s28 = sld [smem:[#allocation6_spill]] }
 0x740   : > { %s5445_s21 = sld [smem:[#allocation4_spill]] }
 0x741   : > { %s5446_s22 = sld [smem:[#allocation5_spill]] }
 0x742   : > { %s5447_s23 = sld [smem:[#allocation7_spill]] }
 0x743   : > { %s5448_s24 = sld [smem:[#allocation8_spill]] }
 0x745   : > { %s22_s25 = sadd.s32 1, %s5444_s28  }
 0x746   : > { %p19_p8 = scmp.ge.s32.totalorder %s22_s25, 6  }
 0x748   :  { %21 = sbr.rel (!%p19_p8) target bundleno = 3 (0x3), region = 110 }

// kernel: template_self_layer_forward.1
= control target key start
LH: loop header
LB: loop body
LE: loop exit
PB: predicated region body
PF: predicated region fallthrough
CT: control target
= control target key end

     0   :  { %s4447_s21 = smov 0   ;;  %s4449_s22 = smov 0   ;;  %s5421_s0 = inlined_call_operand.vmem [shape: f32[2,128,256], index: 0, kind: input, shape index: {}]   ;;  %s5422_s1 = inlined_call_operand.vmem [shape: f32[2,128,256], index: 1, kind: input, shape index: {}]   ;;  %s5423_s2 = inlined_call_operand.vmem [shape: bf16[1,128,128], index: 2, kind: input, shape index: {}]   ;;  %s5424_s3 = inlined_call_operand.vmem [shape: bf16[256,256], index: 3, kind: input, shape index: {}]   ;;  %s5425_s4 = inlined_call_operand.vmem [shape: f32[1,256], index: 4, kind: input, shape index: {}]   ;;  %s5426_s5 = inlined_call_operand.vmem [shape: bf16[256,512], index: 5, kind: input, shape index: {}]   ;;  %s5427_s6 = inlined_call_operand.vmem [shape: f32[1,512], index: 6, kind: input, shape index: {}]   ;;  %s5428_s7 = inlined_call_operand.vmem [shape: bf16[256,256], index: 7, kind: input, shape index: {}]   ;;  %s5429_s8 = inlined_call_operand.vmem [shape: f32[1,256], index: 8, kind: input, shape index: {}]   ;;  %s5430_s9 = inlined_call_operand.vmem [shape: bf16[256,256], index: 9, kind: input, shape index: {}]   ;;  %s5431_s10 = inlined_call_operand.vmem [shape: f32[1,256], index: 10, kind: input, shape index: {}]   ;;  %s5432_s11 = inlined_call_operand.vmem [shape: f32[1,256], index: 11, kind: input, shape index: {}]   ;;  %s5433_s12 = inlined_call_operand.vmem [shape: f32[2,128,256], index: 12, kind: output, shape index: {}]  }
   0x1   :  { %5437 = sst [smem:[#allocation9_spill]] %s5432_s11  ;;  %s4451_s23 = smov 0  }
   0x2   :  { %s4453_s24 = smov 0   ;;  %s4455_s25 = smov 0  }
   0x3 LB: > { %5438 = sst [smem:[#allocation4_spill]] %s4372_s23  ;;  %s31_s26 = sadd.s32 1, %s4372_s23  ;;  %s4380_s25 = sphi %s4455_s25, %s22_s25   ;;  %s4376_s24 = sphi %s4453_s24, %s5448_s24   ;;  %s4372_s23 = sphi %s4451_s23, %s5447_s23   ;;  %s4368_s22 = sphi %s4449_s22, %s5446_s22   ;;  %s4364_s21 = sphi %s4447_s21, %s5445_s21  }
   0x4   : > { %5439 = sst [smem:[#allocation5_spill]] %s4376_s24  ;;  %s34_s27 = sadd.s32 1, %s4376_s24 }
   0x5   : > { %5440 = sst [smem:[#allocation6_spill]] %s4380_s25  ;;  %p32_p0 = scmp.ge.s32.totalorder %s31_s26, 2 }
   0x6   : > { %p3457_p1 = scmp.ge.s32.totalorder %s4380_s25, 1  ;;  %p397_p2 = scmp.lt.s32.totalorder %s4380_s25, 5 }
   0x7   : > { %s5450_s26 = smov (%p32_p0, %s31_s26), 0  ;;  %s5452_s27 = smov (!%p32_p0, %s34_s27), %s4376_s24 }
   0x8   : > { %5441 = sst [smem:[#allocation7_spill]] %s5450_s26  ;;  %p398_p3 = pnand %p3457_p1, %p397_p2 }
   0x9   : > { %p36_p4 = scmp.ge.s32.totalorder %s5452_s27, 2  ;;  %p454_p5 = scmp.lt.s32.totalorder (!%p398_p3), %s4368_s22, 1 }
   0xa   : > { %401 = sbr.rel (%p398_p3) target bundleno = 1855 (0x73f), region = 68  ;;  %s3462_s28 = sshll.u32 (!%p398_p3), %s4364_s21, 3 }
   0xb   : > { %s5454_s27 = smov (%p36_p4, %s5452_s27), 0  ;;  %p465_p6 = scmp.lt.s32.totalorder (!%p398_p3), %s3462_s28, 15 }
   0xc   : > { %5442 = sst [smem:[#allocation8_spill]] %s5454_s27  ;;  %p3468_p7 = scmp.ne.s32.totalorder (!%p398_p3), %s4364_s21, 0 }
   0xf   : > { %s5456_s22 = smov (!%p454_p5, %s4368_s22), 1  ;;  %s5458_s28 = smov (!%p465_p6, %s3462_s28), 15 }
  0x10   : > { %s3723_s29 = sshll.u32 %s5456_s22, 8  ;;  %s3466_s30 = sshll.u32 %s5456_s22, 5 }
  0x11   : > { %s4483_s15 = scalar_lea.vmem %s5421_s0, %s3723_s29  ;;  %s4488_s18 = scalar_lea.vmem %s5422_s1, %s3723_s29 }
  0x12   : > { %s3463_s19 = sshll.u32 %s5458_s28, 2  ;;  %s3465_s20 = sshll.u32 %s5458_s28, 1 }
  0x13   : > { %s4493_s24 = scalar_lea.vmem %s5423_s2, %s3463_s19  ;;  %s477_s23 = sadd.s32 %s3466_s30, %s3465_s20 }
  0x14   : > { %s3467_s25 = sshll.u32 %s477_s23, 3  ;;  %485 = sbr.rel (%p3468_p7) target bundleno = 350 (0x15e), region = 72 }
  0x15   : > { %s4498_s13 = scalar_lea.vmem %s5433_s12, %s3467_s25 }
  0x19   : > { %v3978_v0 = vld [vmem:[%s5426_s5 + $0xe4] ss:$16 sps:$4 sm:$0xff]   ;;  %v3980_v1 = vld [vmem:[%s5426_s5 + $0xec] ss:$16 sps:$4 sm:$0xff]   ;;  %v3982_v2 = vld [vmem:[%s5426_s5 + $0xe0] ss:$16 sps:$4 sm:$0xff]  }
  0x1a   : > { %802 = vmatprep.subr.bf16.mxu0 %v3978_v0  ;;  %v3983_v3 = vld [vmem:[%s5426_s5 + $0xe8] ss:$16 sps:$4 sm:$0xff]   ;;  %1135 = vmatprep.subr.bf16.mxu1 %v3980_v1  ;;  %v3984_v4 = vld [vmem:[%s5426_s5 + $0xc4] ss:$16 sps:$4 sm:$0xff]   ;;  %v3986_v5 = vld [vmem:[%s5426_s5 + $0xcc] ss:$16 sps:$4 sm:$0xff]  }
  0x1b   : > { %803 = vmatpush1.bf16.msra.mxu0 %v3982_v2  ;;  %1136 = vmatpush1.bf16.msra.mxu1 %v3983_v3  ;;  %v3988_v6 = vld [vmem:[%s5426_s5 + $0xc0] ss:$16 sps:$4 sm:$0xff]   ;;  %v3989_v7 = vld [vmem:[%s5426_s5 + $0xc8] ss:$16 sps:$4 sm:$0xff]   ;;  %v3990_v8 = vld [vmem:[%s5426_s5 + $0xa4] ss:$16 sps:$4 sm:$0xff]  }
  0x1c   : > { %804 = vmatprep.subr.bf16.mxu0 %v3984_v4  ;;  %1137 = vmatprep.subr.bf16.mxu1 %v3986_v5  ;;  %v3992_v9 = vld [vmem:[%s5426_s5 + $0xac] ss:$16 sps:$4 sm:$0xff]   ;;  %v3994_v10 = vld [vmem:[%s5426_s5 + $0xa0] ss:$16 sps:$4 sm:$0xff]   ;;  %v3995_v11 = vld [vmem:[%s5426_s5 + $0xa8] ss:$16 sps:$4 sm:$0xff]  }
  0x1d   : > { %v3996_v12 = vld [vmem:[%s5426_s5 + $0x84] ss:$16 sps:$4 sm:$0xff]   ;;  %v3998_v13 = vld [vmem:[%s5426_s5 + $0x8c] ss:$16 sps:$4 sm:$0xff]   ;;  %v4000_v14 = vld [vmem:[%s5426_s5 + $0x80] ss:$16 sps:$4 sm:$0xff]  }
  0x1e   : > { %v4001_v15 = vld [vmem:[%s5426_s5 + $0x88] ss:$16 sps:$4 sm:$0xff]   ;;  %v4002_v16 = vld [vmem:[%s5426_s5 + $0x64] ss:$16 sps:$4 sm:$0xff]   ;;  %v4004_v17 = vld [vmem:[%s5426_s5 + $0x6c] ss:$16 sps:$4 sm:$0xff]  }
  0x1f   : > { %805 = vmatpush1.bf16.msra.mxu0 %v3988_v6  ;;  %1138 = vmatpush1.bf16.msra.mxu1 %v3989_v7  ;;  %v4006_v18 = vld [vmem:[%s5426_s5 + $0x60] ss:$16 sps:$4 sm:$0xff]   ;;  %v4007_v19 = vld [vmem:[%s5426_s5 + $0x68] ss:$16 sps:$4 sm:$0xff]   ;;  %v4008_v20 = vld [vmem:[%s5426_s5 + $0x44] ss:$16 sps:$4 sm:$0xff]  }
  0x20   : > { %806 = vmatprep.subr.bf16.mxu0 %v3990_v8  ;;  %1139 = vmatprep.subr.bf16.mxu1 %v3992_v9  ;;  %v4010_v21 = vld [vmem:[%s5426_s5 + $0x4c] ss:$16 sps:$4 sm:$0xff]   ;;  %v4012_v22 = vld [vmem:[%s5426_s5 + $0x40] ss:$16 sps:$4 sm:$0xff]   ;;  %v4013_v23 = vld [vmem:[%s5426_s5 + $0x48] ss:$16 sps:$4 sm:$0xff]  }
  0x21   : > { %v4014_v24 = vld [vmem:[%s5426_s5 + $0x24] ss:$16 sps:$4 sm:$0xff]   ;;  %v4016_v25 = vld [vmem:[%s5426_s5 + $0x2c] ss:$16 sps:$4 sm:$0xff]   ;;  %v4018_v26 = vld [vmem:[%s5426_s5 + $0x20] ss:$16 sps:$4 sm:$0xff]  }
  0x22   : > { %v4019_v27 = vld [vmem:[%s5426_s5 + $0x28] ss:$16 sps:$4 sm:$0xff]   ;;  %v4020_v28 = vld [vmem:[%s5426_s5 + $0x4] ss:$16 sps:$4 sm:$0xff]   ;;  %v4022_v29 = vld [vmem:[%s5426_s5 + $0xc] ss:$16 sps:$4 sm:$0xff]  }
  0x23   : > { %807 = vmatpush1.bf16.msra.mxu0 %v3994_v10  ;;  %1140 = vmatpush1.bf16.msra.mxu1 %v3995_v11  ;;  %v4024_v30 = vld [vmem:[%s5426_s5] ss:$16 sps:$4 sm:$0xff]   ;;  %v4025_v31 = vld [vmem:[%s5426_s5 + $0x8] ss:$16 sps:$4 sm:$0xff]   ;;  %v4026_v32 = vld [vmem:[%s5426_s5 + $0x1e4] ss:$16 sps:$4 sm:$0xff]  }
  0x24   : > { %808 = vmatprep.subr.bf16.mxu0 %v3996_v12  ;;  %1141 = vmatprep.subr.bf16.mxu1 %v3998_v13  ;;  %v4028_v33 = vld [vmem:[%s5426_s5 + $0x1ec] ss:$16 sps:$4 sm:$0xff]   ;;  %v4030_v34 = vld [vmem:[%s5426_s5 + $0x1e0] ss:$16 sps:$4 sm:$0xff]   ;;  %v4031_v35 = vld [vmem:[%s5426_s5 + $0x1e8] ss:$16 sps:$4 sm:$0xff]  }
  0x25   : > { %v4032_v36 = vld [vmem:[%s5426_s5 + $0x1c4] ss:$16 sps:$4 sm:$0xff]   ;;  %v4034_v37 = vld [vmem:[%s5426_s5 + $0x1cc] ss:$16 sps:$4 sm:$0xff]   ;;  %v4036_v38 = vld [vmem:[%s5426_s5 + $0x1c0] ss:$16 sps:$4 sm:$0xff]  }
  0x26   : > { %v4037_v39 = vld [vmem:[%s5426_s5 + $0x1c8] ss:$16 sps:$4 sm:$0xff]   ;;  %v4038_v40 = vld [vmem:[%s5426_s5 + $0x1a4] ss:$16 sps:$4 sm:$0xff]   ;;  %v4040_v41 = vld [vmem:[%s5426_s5 + $0x1ac] ss:$16 sps:$4 sm:$0xff]  }
  0x27   : > { %809 = vmatpush1.bf16.msra.mxu0 %v4000_v14  ;;  %1142 = vmatpush1.bf16.msra.mxu1 %v4001_v15  ;;  %v4042_v42 = vld [vmem:[%s5426_s5 + $0x1a0] ss:$16 sps:$4 sm:$0xff]   ;;  %v4043_v43 = vld [vmem:[%s5426_s5 + $0x1a8] ss:$16 sps:$4 sm:$0xff]   ;;  %v4044_v44 = vld [vmem:[%s5426_s5 + $0x184] ss:$16 sps:$4 sm:$0xff]  }
  0x28   : > { %810 = vmatprep.subr.bf16.mxu0 %v4002_v16  ;;  %1143 = vmatprep.subr.bf16.mxu1 %v4004_v17  ;;  %v4046_v45 = vld [vmem:[%s5426_s5 + $0x18c] ss:$16 sps:$4 sm:$0xff]   ;;  %v4048_v50 = vld [vmem:[%s5426_s5 + $0x180] ss:$16 sps:$4 sm:$0xff]   ;;  %v4049_v51 = vld [vmem:[%s5426_s5 + $0x188] ss:$16 sps:$4 sm:$0xff]  }
  0x29   : > { %v487_v46 = vld [vmem:[%s4483_s15 + $0x8] sm:$0xff]  ;;  %v489_v47 = vld [vmem:[%s4483_s15 + $0x18] sm:$0xff]  ;;  %v4050_v55 = vld [vmem:[%s5426_s5 + $0x164] ss:$16 sps:$4 sm:$0xff]  }
  0x2a   : > { %v519_v48 = vld [vmem:[%s4488_s18 + $0x8] sm:$0xff]  ;;  %v521_v49 = vld [vmem:[%s4488_s18 + $0x18] sm:$0xff]  ;;  %v916_v54 = vpack.c.bf16 %v489_v47, %v487_v46  ;;  %v4054_v58 = vld [vmem:[%s5426_s5 + $0x160] ss:$16 sps:$4 sm:$0xff]  }
  0x2b   : > { %811 = vmatpush1.bf16.msra.mxu0 %v4006_v18  ;;  %1144 = vmatpush1.bf16.msra.mxu1 %v4007_v19  ;;  %v551_v52 = vadd.f32 %v519_v48, %v487_v46  ;;  %v553_v53 = vadd.f32 %v521_v49, %v489_v47  ;;  %v4052_v56 = vld [vmem:[%s5426_s5 + $0x16c] ss:$16 sps:$4 sm:$0xff]   ;;  %v4055_v59 = vld [vmem:[%s5426_s5 + $0x168] ss:$16 sps:$4 sm:$0xff]   ;;  %v4056_v60 = vld [vmem:[%s5426_s5 + $0x144] ss:$16 sps:$4 sm:$0xff]  }
  0x2c   : > { %812 = vmatprep.subr.bf16.mxu0 %v4008_v20  ;;  %1145 = vmatprep.subr.bf16.mxu1 %v4010_v21  ;;  %v4058_v61 = vld [vmem:[%s5426_s5 + $0x14c] ss:$16 sps:$4 sm:$0xff]   ;;  %v4060_v62 = vld [vmem:[%s5426_s5 + $0x140] ss:$16 sps:$4 sm:$0xff]   ;;  %v4061_v63 = vld [vmem:[%s5426_s5 + $0x148] ss:$16 sps:$4 sm:$0xff]  }
  0x2d   : > { %v583_v57 = vpack.c.bf16 %v553_v53, %v551_v52  ;;  %1167 = vmatprep.mubr.bf16.mxu1 %v916_v54  ;;  %v4062_v0 = vld [vmem:[%s5426_s5 + $0x124] ss:$16 sps:$4 sm:$0xff]   ;;  %v4064_v1 = vld [vmem:[%s5426_s5 + $0x12c] ss:$16 sps:$4 sm:$0xff]   ;;  %v4066_v2 = vld [vmem:[%s5426_s5 + $0x120] ss:$16 sps:$4 sm:$0xff]  }
  0x2e   : > { %v4067_v3 = vld [vmem:[%s5426_s5 + $0x128] ss:$16 sps:$4 sm:$0xff]   ;;  %v4068_v4 = vld [vmem:[%s5426_s5 + $0x104] ss:$16 sps:$4 sm:$0xff]   ;;  %v4070_v5 = vld [vmem:[%s5426_s5 + $0x10c] ss:$16 sps:$4 sm:$0xff]  }
  0x2f   : > { %813 = vmatpush1.bf16.msra.mxu0 %v4012_v22  ;;  %1146 = vmatpush1.bf16.msra.mxu1 %v4013_v23  ;;  %v486_v6 = vld [vmem:[%s4483_s15] sm:$0xff]  ;;  %v488_v7 = vld [vmem:[%s4483_s15 + $0x10] sm:$0xff]  ;;  %v491_v10 = vld [vmem:[%s4483_s15 + $0x28] sm:$0xff] }
  0x30   : > { %814 = vmatprep.subr.bf16.mxu0 %v4014_v24  ;;  %1147 = vmatprep.subr.bf16.mxu1 %v4016_v25  ;;  %v518_v8 = vld [vmem:[%s4488_s18] sm:$0xff]  ;;  %v520_v9 = vld [vmem:[%s4488_s18 + $0x10] sm:$0xff]  ;;  %v493_v11 = vld [vmem:[%s4483_s15 + $0x38] sm:$0xff]  ;;  %v915_v21 = vpack.c.bf16 %v488_v7, %v486_v6 }
  0x31   : > { %834 = vmatprep.mubr.bf16.mxu0 %v583_v57  ;;  %v523_v12 = vld [vmem:[%s4488_s18 + $0x28] sm:$0xff]  ;;  %v525_v13 = vld [vmem:[%s4488_s18 + $0x38] sm:$0xff]  ;;  %v550_v14 = vadd.f32 %v518_v8, %v486_v6  ;;  %v552_v15 = vadd.f32 %v520_v9, %v488_v7  ;;  %v4072_v16 = vld [vmem:[%s5426_s5 + $0x100] ss:$16 sps:$4 sm:$0xff]   ;;  %v918_v25 = vpack.c.bf16 %v493_v11, %v491_v10 }
  0x32   : > { %v4073_v17 = vld [vmem:[%s5426_s5 + $0x108] ss:$16 sps:$4 sm:$0xff]   ;;  %v555_v18 = vadd.f32 %v523_v12, %v491_v10  ;;  %v557_v19 = vadd.f32 %v525_v13, %v493_v11  ;;  %v490_v22 = vld [vmem:[%s4483_s15 + $0x20] sm:$0xff]  ;;  %v492_v23 = vld [vmem:[%s4483_s15 + $0x30] sm:$0xff] }
  0x33   : > { %815 = vmatpush1.bf16.msra.mxu0 %v4018_v26  ;;  %1148 = vmatpush1.bf16.msra.mxu1 %v4019_v27  ;;  %v582_v20 = vpack.c.bf16 %v552_v15, %v550_v14  ;;  %v522_v26 = vld [vmem:[%s4488_s18 + $0x20] sm:$0xff]  ;;  %v524_v27 = vld [vmem:[%s4488_s18 + $0x30] sm:$0xff]  ;;  %v531_v46 = vld [vmem:[%s4488_s18 + $0x68] sm:$0xff] }
  0x34   : > { %816 = vmatprep.subr.bf16.mxu0 %v4020_v28  ;;  %1149 = vmatprep.subr.bf16.mxu1 %v4022_v29  ;;  %v585_v24 = vpack.c.bf16 %v557_v19, %v555_v18  ;;  %v495_v28 = vld [vmem:[%s4483_s15 + $0x48] sm:$0xff]  ;;  %v497_v29 = vld [vmem:[%s4483_s15 + $0x58] sm:$0xff]  ;;  %v498_v54 = vld [vmem:[%s4483_s15 + $0x60] sm:$0xff] }
  0x35   : > { %v533_v47 = vld [vmem:[%s4488_s18 + $0x78] sm:$0xff]  ;;  %v502_v6 = vld [vmem:[%s4483_s15 + $0x80] sm:$0xff]  ;;  %v504_v7 = vld [vmem:[%s4483_s15 + $0x90] sm:$0xff] }
  0x36   : > { %v534_v10 = vld [vmem:[%s4488_s18 + $0x80] sm:$0xff]  ;;  %v536_v11 = vld [vmem:[%s4488_s18 + $0x90] sm:$0xff]  ;;  %v507_v12 = vld [vmem:[%s4483_s15 + $0xa8] sm:$0xff] }
  0x37   : > { %817 = vmatpush1.bf16.msra.mxu0 %v4024_v30  ;;  %1150 = vmatpush1.bf16.msra.mxu1 %v4025_v31  ;;  %v527_v30 = vld [vmem:[%s4488_s18 + $0x48] sm:$0xff]  ;;  %v529_v31 = vld [vmem:[%s4488_s18 + $0x58] sm:$0xff] }
  0x38   : > { %818 = vmatprep.subr.bf16.mxu0 %v4026_v32  ;;  %1151 = vmatprep.subr.bf16.mxu1 %v4028_v33  ;;  %v554_v32 = vadd.f32 %v522_v26, %v490_v22  ;;  %v556_v33 = vadd.f32 %v524_v27, %v492_v23  ;;  %v509_v13 = vld [vmem:[%s4483_s15 + $0xb8] sm:$0xff]  ;;  %v539_v14 = vld [vmem:[%s4488_s18 + $0xa8] sm:$0xff]  ;;  %v538_v26 = vld [vmem:[%s4488_s18 + $0xa0] sm:$0xff] }
  0x39   : > { %v541_v15 = vld [vmem:[%s4488_s18 + $0xb8] sm:$0xff]  ;;  %v571_v18 = vadd.f32 %v539_v14, %v507_v12  ;;  %v540_v27 = vld [vmem:[%s4488_s18 + $0xb0] sm:$0xff] }
  0x3a   : > { %v573_v19 = vadd.f32 %v541_v15, %v509_v13 }
  0x3b   : > { %819 = vmatpush2.bf16.msra.mxu0 %v4030_v34  ;;  %1152 = vmatpush2.bf16.msra.mxu1 %v4031_v35  ;;  %v559_v34 = vadd.f32 %v527_v30, %v495_v28  ;;  %v561_v35 = vadd.f32 %v529_v31, %v497_v29  ;;  %v543_v30 = vld [vmem:[%s4488_s18 + $0xc8] sm:$0xff]  ;;  %v545_v31 = vld [vmem:[%s4488_s18 + $0xd8] sm:$0xff] }
  0x3c   : > { %820 = vmatprep.subr.bf16.mxu0 %v4032_v36  ;;  %1153 = vmatprep.subr.bf16.mxu1 %v4034_v37  ;;  %v584_v36 = vpack.c.bf16 %v556_v33, %v554_v32  ;;  %v917_v37 = vpack.c.bf16 %v492_v23, %v490_v22  ;;  %v506_v22 = vld [vmem:[%s4483_s15 + $0xa0] sm:$0xff]  ;;  %v508_v23 = vld [vmem:[%s4483_s15 + $0xb0] sm:$0xff] }
  0x3d   : > { %v570_v32 = vadd.f32 %v538_v26, %v506_v22  ;;  %v572_v33 = vadd.f32 %v540_v27, %v508_v23 }
  0x3f   : > { %821 = vmatpush2.bf16.msra.mxu0 %v4036_v38  ;;  %1154 = vmatpush2.bf16.msra.mxu1 %v4037_v39  ;;  %v494_v38 = vld [vmem:[%s4483_s15 + $0x40] sm:$0xff]  ;;  %v496_v39 = vld [vmem:[%s4483_s15 + $0x50] sm:$0xff] }
  0x40   : > { %822 = vmatprep.subr.bf16.mxu0 %v4038_v40  ;;  %1155 = vmatprep.subr.bf16.mxu1 %v4040_v41  ;;  %v587_v40 = vpack.c.bf16 %v561_v35, %v559_v34  ;;  %v920_v41 = vpack.c.bf16 %v497_v29, %v495_v28  ;;  %v919_v53 = vpack.c.bf16 %v496_v39, %v494_v38  ;;  %v511_v28 = vld [vmem:[%s4483_s15 + $0xc8] sm:$0xff]  ;;  %v513_v29 = vld [vmem:[%s4483_s15 + $0xd8] sm:$0xff] }
  0x41   : > { %v575_v34 = vadd.f32 %v543_v30, %v511_v28  ;;  %v577_v35 = vadd.f32 %v545_v31, %v513_v29 }
  0x43   : > { %823 = vmatpush2.bf16.msra.mxu0 %v4042_v42  ;;  %1156 = vmatpush2.bf16.msra.mxu1 %v4043_v43  ;;  %v526_v42 = vld [vmem:[%s4488_s18 + $0x40] sm:$0xff]  ;;  %v528_v43 = vld [vmem:[%s4488_s18 + $0x50] sm:$0xff] }
  0x44   : > { %824 = vmatprep.subr.bf16.mxu0 %v4044_v44  ;;  %1157 = vmatprep.subr.bf16.mxu1 %v4046_v45  ;;  %v499_v44 = vld [vmem:[%s4483_s15 + $0x68] sm:$0xff]  ;;  %v501_v45 = vld [vmem:[%s4483_s15 + $0x78] sm:$0xff]  ;;  %v558_v48 = vadd.f32 %v526_v42, %v494_v38  ;;  %v560_v49 = vadd.f32 %v528_v43, %v496_v39  ;;  %v510_v38 = vld [vmem:[%s4483_s15 + $0xc0] sm:$0xff] }
  0x45   : > { %v922_v57 = vpack.c.bf16 %v501_v45, %v499_v44  ;;  %v512_v39 = vld [vmem:[%s4483_s15 + $0xd0] sm:$0xff]  ;;  %v542_v42 = vld [vmem:[%s4488_s18 + $0xc0] sm:$0xff] }
  0x46   : > { %v586_v52 = vpack.c.bf16 %v560_v49, %v558_v48  ;;  %v544_v43 = vld [vmem:[%s4488_s18 + $0xd0] sm:$0xff]  ;;  %v574_v48 = vadd.f32 %v542_v42, %v510_v38 }
  0x47   : > { %825 = vmatpush2.bf16.msra.mxu0 %v4048_v50  ;;  %1158 = vmatpush2.bf16.msra.mxu1 %v4049_v51  ;;  %v563_v50 = vadd.f32 %v531_v46, %v499_v44  ;;  %v565_v51 = vadd.f32 %v533_v47, %v501_v45  ;;  %v515_v44 = vld [vmem:[%s4483_s15 + $0xe8] sm:$0xff]  ;;  %v517_v45 = vld [vmem:[%s4483_s15 + $0xf8] sm:$0xff]  ;;  %v576_v49 = vadd.f32 %v544_v43, %v512_v39 }
  0x48   : > { %826 = vmatprep.subr.bf16.mxu0 %v4050_v55  ;;  %1159 = vmatprep.subr.bf16.mxu1 %v4052_v56  ;;  %v500_v55 = vld [vmem:[%s4483_s15 + $0x70] sm:$0xff]  ;;  %v547_v46 = vld [vmem:[%s4488_s18 + $0xe8] sm:$0xff]  ;;  %v549_v47 = vld [vmem:[%s4488_s18 + $0xf8] sm:$0xff] }
  0x49   : > { %v589_v56 = vpack.c.bf16 %v565_v51, %v563_v50  ;;  %v579_v50 = vadd.f32 %v547_v46, %v515_v44  ;;  %v581_v51 = vadd.f32 %v549_v47, %v517_v45 }
  0x4b   : > { %827 = vmatpush2.bf16.msra.mxu0 %v4054_v58  ;;  %1160 = vmatpush2.bf16.msra.mxu1 %v4055_v59  ;;  %v530_v58 = vld [vmem:[%s4488_s18 + $0x60] sm:$0xff]  ;;  %v532_v59 = vld [vmem:[%s4488_s18 + $0x70] sm:$0xff] }
  0x4c   : > { %828 = vmatprep.subr.bf16.mxu0 %v4056_v60  ;;  %1161 = vmatprep.subr.bf16.mxu1 %v4058_v61  ;;  %v503_v60 = vld [vmem:[%s4483_s15 + $0x88] sm:$0xff]  ;;  %v505_v61 = vld [vmem:[%s4483_s15 + $0x98] sm:$0xff] }
  0x4d   : > { %v924_v9 = vpack.c.bf16 %v505_v61, %v503_v60 }
  0x4f   : > { %829 = vmatpush2.bf16.msra.mxu0 %v4060_v62  ;;  %1162 = vmatpush2.bf16.msra.mxu1 %v4061_v63  ;;  %v535_v62 = vld [vmem:[%s4488_s18 + $0x88] sm:$0xff]  ;;  %v537_v63 = vld [vmem:[%s4488_s18 + $0x98] sm:$0xff] }
  0x50   : > { %830 = vmatprep.subr.bf16.mxu0 %v4062_v0  ;;  %1163 = vmatprep.subr.bf16.mxu1 %v4064_v1  ;;  %v562_v0 = vadd.f32 %v530_v58, %v498_v54  ;;  %v564_v1 = vadd.f32 %v532_v59, %v500_v55  ;;  %v546_v58 = vld [vmem:[%s4488_s18 + $0xe0] sm:$0xff]  ;;  %v548_v59 = vld [vmem:[%s4488_s18 + $0xf0] sm:$0xff] }
  0x53   : > { %831 = vmatpush2.bf16.msra.mxu0 %v4066_v2  ;;  %1164 = vmatpush2.bf16.msra.mxu1 %v4067_v3  ;;  %v567_v2 = vadd.f32 %v535_v62, %v503_v60  ;;  %v569_v3 = vadd.f32 %v537_v63, %v505_v61 }
  0x54   : > { %832 = vmatprep.subr.bf16.mxu0 %v4068_v4  ;;  %1165 = vmatprep.subr.bf16.mxu1 %v4070_v5  ;;  %v588_v4 = vpack.c.bf16 %v564_v1, %v562_v0  ;;  %v921_v5 = vpack.c.bf16 %v500_v55, %v498_v54  ;;  %v514_v54 = vld [vmem:[%s4483_s15 + $0xe0] sm:$0xff]  ;;  %v597_v55 = vpack.c.bf16 %v581_v51, %v579_v50  ;;  %v632_v0 = vlaneseq }
  0x55   : > { %v591_v8 = vpack.c.bf16 %v569_v3, %v567_v2  ;;  %v578_v60 = vadd.f32 %v546_v58, %v514_v54 }
  0x56   : > { %v633_v1 = vshrl.u32 %v632_v0, 7 }
  0x57   : > { %833 = vmatpush2.bf16.msra.mxu0 %v4072_v16  ;;  %1166 = vmatpush2.bf16.msra.mxu1 %v4073_v17  ;;  %v566_v16 = vadd.f32 %v534_v10, %v502_v6  ;;  %v568_v17 = vadd.f32 %v536_v11, %v504_v7 }
  0x58   : > { %v634_v2 = vsub.s32 0, %v633_v1  ;;  %v638_v3 = vsub.s32 1, %v633_v1 }
  0x5a   : > { %835 = vmatmul.mubr.bf16.vlgmr.msra.gmra.mxu0 %v582_v20  ;;  %1168 = vmatmul.mubr.bf16.vlgmr.msra.gmra.mxu1 %v915_v21  ;;  %v590_v20 = vpack.c.bf16 %v568_v17, %v566_v16  ;;  %v923_v21 = vpack.c.bf16 %v504_v7, %v502_v6 }
  0x5b   : > { %844 = vmatprep.mubr.bf16.mxu0 %v585_v24  ;;  %1177 = vmatprep.mubr.bf16.mxu1 %v918_v25  ;;  %v593_v24 = vpack.c.bf16 %v573_v19, %v571_v18  ;;  %v926_v25 = vpack.c.bf16 %v509_v13, %v507_v12 }
  0x62   : > { %845 = vmatmul.mubr.bf16.gmra.mxu0 %v584_v36  ;;  %1178 = vmatmul.mubr.bf16.gmra.mxu1 %v917_v37  ;;  %v592_v36 = vpack.c.bf16 %v572_v33, %v570_v32  ;;  %v925_v37 = vpack.c.bf16 %v508_v23, %v506_v22 }
  0x63   : > { %854 = vmatprep.mubr.bf16.mxu0 %v587_v40  ;;  %1187 = vmatprep.mubr.bf16.mxu1 %v920_v41  ;;  %v595_v40 = vpack.c.bf16 %v577_v35, %v575_v34  ;;  %v928_v41 = vpack.c.bf16 %v513_v29, %v511_v28 }
  0x6a   : > { %855 = vmatmul.mubr.bf16.gmra.mxu0 %v586_v52  ;;  %1188 = vmatmul.mubr.bf16.gmra.mxu1 %v919_v53  ;;  %v594_v52 = vpack.c.bf16 %v576_v49, %v574_v48  ;;  %v927_v53 = vpack.c.bf16 %v512_v39, %v510_v38 }
  0x6b   : > { %864 = vmatprep.mubr.bf16.mxu0 %v589_v56  ;;  %1197 = vmatprep.mubr.bf16.mxu1 %v922_v57  ;;  %v930_v56 = vpack.c.bf16 %v517_v45, %v515_v44  ;;  %v516_v57 = vld [vmem:[%s4483_s15 + $0xf0] sm:$0xff] }
  0x6c   : > { %v580_v61 = vadd.f32 %v548_v59, %v516_v57  ;;  %v929_v63 = vpack.c.bf16 %v516_v57, %v514_v54 }
  0x6e   : > { %v596_v62 = vpack.c.bf16 %v580_v61, %v578_v60 }
  0x72   : > { %865 = vmatmul.mubr.bf16.gmra.mxu0 %v588_v4  ;;  %1198 = vmatmul.mubr.bf16.gmra.mxu1 %v921_v5  ;;  %v630_v4 = vld [vmem:[%s5427_s6] sm:$0x3]  ;;  %v963_v5 = vld [vmem:[%s5427_s6 + $0x2] sm:$0x3] }
  0x73   : > { %874 = vmatprep.mubr.bf16.mxu0 %v591_v8  ;;  %1207 = vmatprep.mubr.bf16.mxu1 %v924_v9  ;;  %v4763_v6 = vrot.slane %v630_v4, %v634_v2  ;;  %v4765_v7 = vrot.slane %v963_v5, %v634_v2  ;;  %v4767_v8 = vrot.slane %v630_v4, %v638_v3 }
  0x74   : > { %v4769_v9 = vrot.slane %v963_v5, %v638_v3 }
  0x7a   : > { %875 = vmatmul.mubr.bf16.gmra.mxu0 %v590_v20  ;;  %1208 = vmatmul.mubr.bf16.gmra.mxu1 %v923_v21 }
  0x7b   : > { %884 = vmatprep.mubr.bf16.mxu0 %v593_v24  ;;  %1217 = vmatprep.mubr.bf16.mxu1 %v926_v25 }
  0x82   : > { %885 = vmatmul.mubr.bf16.gmra.mxu0 %v592_v36  ;;  %1218 = vmatmul.mubr.bf16.gmra.mxu1 %v925_v37 }
  0x83   : > { %894 = vmatprep.mubr.bf16.mxu0 %v595_v40  ;;  %1227 = vmatprep.mubr.bf16.mxu1 %v928_v41 }
  0x8a   : > { %895 = vmatmul.mubr.bf16.gmra.mxu0 %v594_v52  ;;  %1228 = vmatmul.mubr.bf16.gmra.mxu1 %v927_v53 }
  0x8b   : > { %904 = vmatprep.mubr.bf16.mxu0 %v597_v55  ;;  %1237 = vmatprep.mubr.bf16.mxu1 %v930_v56 }
  0x92   : > { %905 = vmatmul.mubr.bf16.gmra.mxu0 %v596_v62  ;;  %1238 = vmatmul.mubr.bf16.gmra.mxu1 %v929_v63 }
 0x11a   : > { %v836_v10 = vpop.f32.mrf.mxu0  ;;  %v1169_v11 = vpop.f32.mrf.mxu1 }
 0x11b   : > { %v837_v14 = vadd.f32 %v836_v10, %v4763_v6  ;;  %v1170_v15 = vadd.f32 %v1169_v11, %v4765_v7 }
 0x11c   : > { %v838_v12 = vpop.f32.mrf.mxu0  ;;  %v1171_v13 = vpop.f32.mrf.mxu1 }
 0x11d   : > { %v839_v16 = vadd.f32 %v838_v12, %v4767_v8  ;;  %v1172_v17 = vadd.f32 %v1171_v13, %v4769_v9 }
 0x11e   : > { %v840_v18 = vpop.f32.mrf.mxu0  ;;  %v1173_v19 = vpop.f32.mrf.mxu1 }
 0x11f   : > { %v3725_v20 = vpack.c.bf16 %v839_v16, %v837_v14  ;;  %v3741_v21 = vpack.c.bf16 %v1172_v17, %v1170_v15  ;;  %v841_v24 = vadd.f32 %v840_v18, %v4763_v6  ;;  %v1174_v25 = vadd.f32 %v1173_v19, %v4765_v7 }
 0x120   : > { %v842_v22 = vpop.f32.mrf.mxu0  ;;  %v1175_v23 = vpop.f32.mrf.mxu1 }
 0x121   : > { %1344 = vst [vmem:[#allocation2] sm:$0xff] %v3725_v20  ;;  %1456 = vst [vmem:[#allocation2 + $0x8] sm:$0xff] %v3741_v21  ;;  %v843_v26 = vadd.f32 %v842_v22, %v4767_v8  ;;  %v1176_v27 = vadd.f32 %v1175_v23, %v4769_v9 }
 0x122   : > { %v846_v28 = vpop.f32.mrf.mxu0  ;;  %v1179_v29 = vpop.f32.mrf.mxu1 }
 0x123   : > { %v3726_v30 = vpack.c.bf16 %v843_v26, %v841_v24  ;;  %v3742_v31 = vpack.c.bf16 %v1176_v27, %v1174_v25  ;;  %v847_v34 = vadd.f32 %v846_v28, %v4763_v6  ;;  %v1180_v35 = vadd.f32 %v1179_v29, %v4765_v7 }
 0x124   : > { %v848_v32 = vpop.f32.mrf.mxu0  ;;  %v1181_v33 = vpop.f32.mrf.mxu1 }
 0x125   : > { %1345 = vst [vmem:[#allocation2 + $0x10] sm:$0xff] %v3726_v30  ;;  %1457 = vst [vmem:[#allocation2 + $0x18] sm:$0xff] %v3742_v31  ;;  %v849_v36 = vadd.f32 %v848_v32, %v4767_v8  ;;  %v1182_v37 = vadd.f32 %v1181_v33, %v4769_v9 }
 0x126   : > { %v850_v38 = vpop.f32.mrf.mxu0  ;;  %v1183_v39 = vpop.f32.mrf.mxu1 }
 0x127   : > { %v3727_v40 = vpack.c.bf16 %v849_v36, %v847_v34  ;;  %v3743_v41 = vpack.c.bf16 %v1182_v37, %v1180_v35  ;;  %v851_v44 = vadd.f32 %v850_v38, %v4763_v6  ;;  %v1184_v45 = vadd.f32 %v1183_v39, %v4765_v7 }
 0x128   : > { %v852_v42 = vpop.f32.mrf.mxu0  ;;  %v1185_v43 = vpop.f32.mrf.mxu1 }
 0x129   : > { %1346 = vst [vmem:[#allocation2 + $0x20] sm:$0xff] %v3727_v40  ;;  %1458 = vst [vmem:[#allocation2 + $0x28] sm:$0xff] %v3743_v41  ;;  %v853_v46 = vadd.f32 %v852_v42, %v4767_v8  ;;  %v1186_v47 = vadd.f32 %v1185_v43, %v4769_v9 }
 0x12a   : > { %v856_v48 = vpop.f32.mrf.mxu0  ;;  %v1189_v49 = vpop.f32.mrf.mxu1 }
 0x12b   : > { %v3728_v50 = vpack.c.bf16 %v853_v46, %v851_v44  ;;  %v3744_v51 = vpack.c.bf16 %v1186_v47, %v1184_v45  ;;  %v857_v54 = vadd.f32 %v856_v48, %v4763_v6  ;;  %v1190_v55 = vadd.f32 %v1189_v49, %v4765_v7 }
 0x12c   : > { %v858_v52 = vpop.f32.mrf.mxu0  ;;  %v1191_v53 = vpop.f32.mrf.mxu1 }
 0x12d   : > { %1347 = vst [vmem:[#allocation2 + $0x30] sm:$0xff] %v3728_v50  ;;  %1459 = vst [vmem:[#allocation2 + $0x38] sm:$0xff] %v3744_v51  ;;  %v859_v56 = vadd.f32 %v858_v52, %v4767_v8  ;;  %v1192_v57 = vadd.f32 %v1191_v53, %v4769_v9 }
 0x12e   : > { %v860_v58 = vpop.f32.mrf.mxu0  ;;  %v1193_v59 = vpop.f32.mrf.mxu1 }
 0x12f   : > { %v3729_v60 = vpack.c.bf16 %v859_v56, %v857_v54  ;;  %v3745_v61 = vpack.c.bf16 %v1192_v57, %v1190_v55  ;;  %v861_v0 = vadd.f32 %v860_v58, %v4763_v6  ;;  %v1194_v1 = vadd.f32 %v1193_v59, %v4765_v7 }
 0x130   : > { %v862_v62 = vpop.f32.mrf.mxu0  ;;  %v1195_v63 = vpop.f32.mrf.mxu1 }
 0x131   : > { %1348 = vst [vmem:[#allocation2 + $0x40] sm:$0xff] %v3729_v60  ;;  %1460 = vst [vmem:[#allocation2 + $0x48] sm:$0xff] %v3745_v61  ;;  %v863_v2 = vadd.f32 %v862_v62, %v4767_v8  ;;  %v1196_v3 = vadd.f32 %v1195_v63, %v4769_v9 }
 0x132   : > { %v866_v4 = vpop.f32.mrf.mxu0  ;;  %v1199_v5 = vpop.f32.mrf.mxu1 }
 0x133   : > { %v3730_v10 = vpack.c.bf16 %v863_v2, %v861_v0  ;;  %v3746_v11 = vpack.c.bf16 %v1196_v3, %v1194_v1  ;;  %v867_v14 = vadd.f32 %v866_v4, %v4763_v6  ;;  %v1200_v15 = vadd.f32 %v1199_v5, %v4765_v7 }
 0x134   : > { %v868_v12 = vpop.f32.mrf.mxu0  ;;  %v1201_v13 = vpop.f32.mrf.mxu1 }
 0x135   : > { %1349 = vst [vmem:[#allocation2 + $0x50] sm:$0xff] %v3730_v10  ;;  %1461 = vst [vmem:[#allocation2 + $0x58] sm:$0xff] %v3746_v11  ;;  %v869_v16 = vadd.f32 %v868_v12, %v4767_v8  ;;  %v1202_v17 = vadd.f32 %v1201_v13, %v4769_v9 }
 0x136   : > { %v870_v18 = vpop.f32.mrf.mxu0  ;;  %v1203_v19 = vpop.f32.mrf.mxu1 }
 0x137   : > { %v3731_v20 = vpack.c.bf16 %v869_v16, %v867_v14  ;;  %v3747_v21 = vpack.c.bf16 %v1202_v17, %v1200_v15  ;;  %v871_v24 = vadd.f32 %v870_v18, %v4763_v6  ;;  %v1204_v25 = vadd.f32 %v1203_v19, %v4765_v7 }
 0x138   : > { %v872_v22 = vpop.f32.mrf.mxu0  ;;  %v1205_v23 = vpop.f32.mrf.mxu1 }
 0x139   : > { %1350 = vst [vmem:[#allocation2 + $0x60] sm:$0xff] %v3731_v20  ;;  %1462 = vst [vmem:[#allocation2 + $0x68] sm:$0xff] %v3747_v21  ;;  %v873_v26 = vadd.f32 %v872_v22, %v4767_v8  ;;  %v1206_v27 = vadd.f32 %v1205_v23, %v4769_v9 }
 0x13a   : > { %v876_v28 = vpop.f32.mrf.mxu0  ;;  %v1209_v29 = vpop.f32.mrf.mxu1 }
 0x13b   : > { %v3732_v30 = vpack.c.bf16 %v873_v26, %v871_v24  ;;  %v3748_v31 = vpack.c.bf16 %v1206_v27, %v1204_v25  ;;  %v877_v34 = vadd.f32 %v876_v28, %v4763_v6  ;;  %v1210_v35 = vadd.f32 %v1209_v29, %v4765_v7 }
 0x13c   : > { %v878_v32 = vpop.f32.mrf.mxu0  ;;  %v1211_v33 = vpop.f32.mrf.mxu1 }
 0x13d   : > { %1351 = vst [vmem:[#allocation2 + $0x70] sm:$0xff] %v3732_v30  ;;  %1463 = vst [vmem:[#allocation2 + $0x78] sm:$0xff] %v3748_v31  ;;  %v879_v36 = vadd.f32 %v878_v32, %v4767_v8  ;;  %v1212_v37 = vadd.f32 %v1211_v33, %v4769_v9 }
 0x13e   : > { %v880_v38 = vpop.f32.mrf.mxu0  ;;  %v1213_v39 = vpop.f32.mrf.mxu1 }
 0x13f   : > { %v3733_v40 = vpack.c.bf16 %v879_v36, %v877_v34  ;;  %v3749_v41 = vpack.c.bf16 %v1212_v37, %v1210_v35  ;;  %v881_v44 = vadd.f32 %v880_v38, %v4763_v6  ;;  %v1214_v45 = vadd.f32 %v1213_v39, %v4765_v7 }
 0x140   : > { %v882_v42 = vpop.f32.mrf.mxu0  ;;  %v1215_v43 = vpop.f32.mrf.mxu1 }
 0x141   : > { %1352 = vst [vmem:[#allocation2 + $0x80] sm:$0xff] %v3733_v40  ;;  %1464 = vst [vmem:[#allocation2 + $0x88] sm:$0xff] %v3749_v41  ;;  %v883_v46 = vadd.f32 %v882_v42, %v4767_v8  ;;  %v1216_v47 = vadd.f32 %v1215_v43, %v4769_v9 }
 0x142   : > { %v886_v48 = vpop.f32.mrf.mxu0  ;;  %v1219_v49 = vpop.f32.mrf.mxu1 }
 0x143   : > { %v3734_v50 = vpack.c.bf16 %v883_v46, %v881_v44  ;;  %v3750_v51 = vpack.c.bf16 %v1216_v47, %v1214_v45  ;;  %v887_v54 = vadd.f32 %v886_v48, %v4763_v6  ;;  %v1220_v55 = vadd.f32 %v1219_v49, %v4765_v7 }
 0x144   : > { %v888_v52 = vpop.f32.mrf.mxu0  ;;  %v1221_v53 = vpop.f32.mrf.mxu1 }
 0x145   : > { %1353 = vst [vmem:[#allocation2 + $0x90] sm:$0xff] %v3734_v50  ;;  %1465 = vst [vmem:[#allocation2 + $0x98] sm:$0xff] %v3750_v51  ;;  %v889_v56 = vadd.f32 %v888_v52, %v4767_v8  ;;  %v1222_v57 = vadd.f32 %v1221_v53, %v4769_v9 }
 0x146   : > { %v890_v58 = vpop.f32.mrf.mxu0  ;;  %v1223_v59 = vpop.f32.mrf.mxu1 }
 0x147   : > { %v3735_v60 = vpack.c.bf16 %v889_v56, %v887_v54  ;;  %v3751_v61 = vpack.c.bf16 %v1222_v57, %v1220_v55  ;;  %v891_v0 = vadd.f32 %v890_v58, %v4763_v6  ;;  %v1224_v1 = vadd.f32 %v1223_v59, %v4765_v7 }
 0x148   : > { %v892_v62 = vpop.f32.mrf.mxu0  ;;  %v1225_v63 = vpop.f32.mrf.mxu1 }
 0x149   : > { %1354 = vst [vmem:[#allocation2 + $0xa0] sm:$0xff] %v3735_v60  ;;  %1466 = vst [vmem:[#allocation2 + $0xa8] sm:$0xff] %v3751_v61  ;;  %v893_v2 = vadd.f32 %v892_v62, %v4767_v8  ;;  %v1226_v3 = vadd.f32 %v1225_v63, %v4769_v9 }
 0x14a   : > { %v896_v4 = vpop.f32.mrf.mxu0  ;;  %v1229_v5 = vpop.f32.mrf.mxu1 }
 0x14b   : > { %v3736_v10 = vpack.c.bf16 %v893_v2, %v891_v0  ;;  %v3752_v11 = vpack.c.bf16 %v1226_v3, %v1224_v1  ;;  %v897_v14 = vadd.f32 %v896_v4, %v4763_v6  ;;  %v1230_v15 = vadd.f32 %v1229_v5, %v4765_v7 }
 0x14c   : > { %v898_v12 = vpop.f32.mrf.mxu0  ;;  %v1231_v13 = vpop.f32.mrf.mxu1 }
 0x14d   : > { %1355 = vst [vmem:[#allocation2 + $0xb0] sm:$0xff] %v3736_v10  ;;  %1467 = vst [vmem:[#allocation2 + $0xb8] sm:$0xff] %v3752_v11  ;;  %v899_v16 = vadd.f32 %v898_v12, %v4767_v8  ;;  %v1232_v17 = vadd.f32 %v1231_v13, %v4769_v9 }
 0x14e   : > { %v900_v18 = vpop.f32.mrf.mxu0  ;;  %v1233_v19 = vpop.f32.mrf.mxu1 }
 0x14f   : > { %v3737_v20 = vpack.c.bf16 %v899_v16, %v897_v14  ;;  %v3753_v21 = vpack.c.bf16 %v1232_v17, %v1230_v15  ;;  %v901_v24 = vadd.f32 %v900_v18, %v4763_v6  ;;  %v1234_v25 = vadd.f32 %v1233_v19, %v4765_v7 }
 0x150   : > { %v902_v22 = vpop.f32.mrf.mxu0  ;;  %v1235_v23 = vpop.f32.mrf.mxu1 }
 0x151   : > { %1356 = vst [vmem:[#allocation2 + $0xc0] sm:$0xff] %v3737_v20  ;;  %1468 = vst [vmem:[#allocation2 + $0xc8] sm:$0xff] %v3753_v21  ;;  %v903_v26 = vadd.f32 %v902_v22, %v4767_v8  ;;  %v1236_v27 = vadd.f32 %v1235_v23, %v4769_v9 }
 0x152   : > { %v906_v28 = vpop.f32.mrf.mxu0  ;;  %v1239_v29 = vpop.f32.mrf.mxu1 }
 0x153   : > { %v3738_v30 = vpack.c.bf16 %v903_v26, %v901_v24  ;;  %v3754_v31 = vpack.c.bf16 %v1236_v27, %v1234_v25  ;;  %v907_v34 = vadd.f32 %v906_v28, %v4763_v6  ;;  %v1240_v35 = vadd.f32 %v1239_v29, %v4765_v7 }
 0x154   : > { %v908_v32 = vpop.f32.mrf.mxu0  ;;  %v1241_v33 = vpop.f32.mrf.mxu1 }
 0x155   : > { %1357 = vst [vmem:[#allocation2 + $0xd0] sm:$0xff] %v3738_v30  ;;  %1469 = vst [vmem:[#allocation2 + $0xd8] sm:$0xff] %v3754_v31  ;;  %v909_v36 = vadd.f32 %v908_v32, %v4767_v8  ;;  %v1242_v37 = vadd.f32 %v1241_v33, %v4769_v9 }
 0x156   : > { %v910_v38 = vpop.f32.mrf.mxu0  ;;  %v1243_v39 = vpop.f32.mrf.mxu1 }
 0x157   : > { %v3739_v40 = vpack.c.bf16 %v909_v36, %v907_v34  ;;  %v3755_v41 = vpack.c.bf16 %v1242_v37, %v1240_v35  ;;  %v911_v44 = vadd.f32 %v910_v38, %v4763_v6  ;;  %v1244_v45 = vadd.f32 %v1243_v39, %v4765_v7 }
 0x158   : > { %v912_v42 = vpop.f32.mrf.mxu0  ;;  %v1245_v43 = vpop.f32.mrf.mxu1 }
 0x159   : > { %1358 = vst [vmem:[#allocation2 + $0xe0] sm:$0xff] %v3739_v40  ;;  %1470 = vst [vmem:[#allocation2 + $0xe8] sm:$0xff] %v3755_v41  ;;  %v913_v46 = vadd.f32 %v912_v42, %v4767_v8  ;;  %v1246_v47 = vadd.f32 %v1245_v43, %v4769_v9 }
 0x15b   : > { %v3740_v48 = vpack.c.bf16 %v913_v46, %v911_v44  ;;  %v3756_v49 = vpack.c.bf16 %v1246_v47, %v1244_v45 }
 0x15d   : > { %1359 = vst [vmem:[#allocation2 + $0xf0] sm:$0xff] %v3740_v48  ;;  %1471 = vst [vmem:[#allocation2 + $0xf8] sm:$0xff] %v3756_v49 }
 0x15e PF: > { %v4074_v50 = vld [vmem:[%s5424_s3 + $0x74] ss:$8 sps:$4 sm:$0xff]   ;;  %v4076_v6 = vld [vmem:[%s5424_s3 + $0x70] ss:$8 sps:$4 sm:$0xff]   ;;  %v4077_v7 = vld [vmem:[%s5424_s3 + $0x64] ss:$8 sps:$4 sm:$0xff]  }
 0x15f   : > { %1740 = vmatprep.subr.bf16.mxu0 %v4074_v50  ;;  %v4079_v8 = vld [vmem:[%s5424_s3 + $0x60] ss:$8 sps:$4 sm:$0xff]   ;;  %v4080_v9 = vld [vmem:[%s5424_s3 + $0x54] ss:$8 sps:$4 sm:$0xff]   ;;  %v4082_v51 = vld [vmem:[%s5424_s3 + $0x50] ss:$8 sps:$4 sm:$0xff]  }
 0x160   : > { %1741 = vmatpush1.bf16.msra.mxu0 %v4076_v6  ;;  %v4083_v52 = vld [vmem:[%s5424_s3 + $0x44] ss:$8 sps:$4 sm:$0xff]   ;;  %s3565_s23 = sshll.u32 %s4364_s21, 6  ;;  %v4085_v53 = vld [vmem:[%s5424_s3 + $0x40] ss:$8 sps:$4 sm:$0xff]  }
 0x161   : > { %1742 = vmatprep.subr.bf16.mxu0 %v4077_v7  ;;  %v4086_v54 = vld [vmem:[%s5424_s3 + $0x34] ss:$8 sps:$4 sm:$0xff]   ;;  %s1473_s19 = sshra.s32 %s3565_s23, 3  ;;  %v4088_v55 = vld [vmem:[%s5424_s3 + $0x30] ss:$8 sps:$4 sm:$0xff]  }
 0x162   : > { %s3757_s14 = sshll.u32 %s1473_s19, 4  ;;  %v4089_v56 = vld [vmem:[%s5424_s3 + $0x24] ss:$8 sps:$4 sm:$0xff]   ;;  %v4091_v57 = vld [vmem:[%s5424_s3 + $0x20] ss:$8 sps:$4 sm:$0xff]  }
 0x163   : > { %s4870_s28 = scalar_lea.vmem %s4483_s15, %s3757_s14  ;;  %s4876_s27 = scalar_lea.vmem %s4488_s18, %s3757_s14  ;;  %v4092_v58 = vld [vmem:[%s5424_s3 + $0x14] ss:$8 sps:$4 sm:$0xff]   ;;  %v4094_v63 = vld [vmem:[%s5424_s3 + $0x10] ss:$8 sps:$4 sm:$0xff]   ;;  %v4095_v2 = vld [vmem:[%s5424_s3 + $0x4] ss:$8 sps:$4 sm:$0xff]  }
 0x164   : > { %1743 = vmatpush1.bf16.msra.mxu0 %v4079_v8  ;;  %v1479_v59 = vld [vmem:[%s4870_s28 + $0x8] sm:$0xff]  ;;  %v1481_v60 = vld [vmem:[%s4870_s28 + $0x18] sm:$0xff]  ;;  %v4122_v12 = vld [vmem:[#allocation2 + $0xe0] ss:$16 sps:$4 sm:$0xff]   ;;  %s5443_s14 = sld [smem:[#allocation9_spill]] }
 0x165   : > { %1744 = vmatprep.subr.bf16.mxu0 %v4080_v9  ;;  %v1497_v61 = vld [vmem:[%s4876_s27 + $0x8] sm:$0xff]  ;;  %v1499_v62 = vld [vmem:[%s4876_s27 + $0x18] sm:$0xff]  ;;  %v4123_v13 = vld [vmem:[#allocation2 + $0xc0] ss:$16 sps:$4 sm:$0xff]   ;;  %3842 = vmatprep.subr.bf16.mxu1 %v4122_v12 }
 0x166   : > { %v1513_v0 = vadd.f32 %v1497_v61, %v1479_v59  ;;  %v1515_v1 = vadd.f32 %v1499_v62, %v1481_v60  ;;  %v4097_v4 = vld [vmem:[%s5424_s3] ss:$8 sps:$4 sm:$0xff]   ;;  %v4098_v5 = vld [vmem:[%s5424_s3 + $0xf4] ss:$8 sps:$4 sm:$0xff]   ;;  %v4100_v10 = vld [vmem:[%s5424_s3 + $0xf0] ss:$8 sps:$4 sm:$0xff]   ;;  %3843 = vmatpush3.bf16.xpose.msra.mxu1 %v4122_v12 }
 0x167   : > { %v4101_v11 = vld [vmem:[%s5424_s3 + $0xe4] ss:$8 sps:$4 sm:$0xff]   ;;  %v4103_v14 = vld [vmem:[%s5424_s3 + $0xe0] ss:$8 sps:$4 sm:$0xff]   ;;  %v4104_v15 = vld [vmem:[%s5424_s3 + $0xd4] ss:$8 sps:$4 sm:$0xff]   ;;  %3844 = vmatprep.subr.bf16.mxu1 %v4123_v13 }
 0x168   : > { %1745 = vmatpush1.bf16.msra.mxu0 %v4082_v51  ;;  %v1529_v3 = vpack.c.bf16 %v1515_v1, %v1513_v0  ;;  %v4106_v16 = vld [vmem:[%s5424_s3 + $0xd0] ss:$8 sps:$4 sm:$0xff]   ;;  %v4107_v17 = vld [vmem:[%s5424_s3 + $0xc4] ss:$8 sps:$4 sm:$0xff]   ;;  %v4109_v19 = vld [vmem:[%s5424_s3 + $0xc0] ss:$8 sps:$4 sm:$0xff]  }
 0x169   : > { %1746 = vmatprep.subr.bf16.mxu0 %v4083_v52  ;;  %v4124_v18 = vld [vmem:[#allocation2 + $0xa0] ss:$16 sps:$4 sm:$0xff]   ;;  %v4110_v20 = vld [vmem:[%s5424_s3 + $0xb4] ss:$8 sps:$4 sm:$0xff]   ;;  %v4113_v22 = vld [vmem:[%s5424_s3 + $0xa4] ss:$8 sps:$4 sm:$0xff]  }
 0x16a   : > { %1772 = vmatprep.mubr.bf16.mxu0 %v1529_v3  ;;  %v4112_v21 = vld [vmem:[%s5424_s3 + $0xb0] ss:$8 sps:$4 sm:$0xff]   ;;  %v4115_v24 = vld [vmem:[%s5424_s3 + $0xa0] ss:$8 sps:$4 sm:$0xff]   ;;  %v4116_v25 = vld [vmem:[%s5424_s3 + $0x94] ss:$8 sps:$4 sm:$0xff]  }
 0x16b   : > { %v4125_v23 = vld [vmem:[#allocation2 + $0x80] ss:$16 sps:$4 sm:$0xff]   ;;  %v4119_v31 = vld [vmem:[%s5424_s3 + $0x84] ss:$8 sps:$4 sm:$0xff]   ;;  %v1485_v33 = vld [vmem:[%s4870_s28 + $0x38] sm:$0xff] }
 0x16c   : > { %1747 = vmatpush1.bf16.msra.mxu0 %v4085_v53  ;;  %v4118_v26 = vld [vmem:[%s5424_s3 + $0x90] ss:$8 sps:$4 sm:$0xff]   ;;  %v1478_v27 = vld [vmem:[%s4870_s28] sm:$0xff]  ;;  %v1483_v32 = vld [vmem:[%s4870_s28 + $0x28] sm:$0xff] }
 0x16d   : > { %1748 = vmatprep.subr.bf16.mxu0 %v4086_v54  ;;  %v1480_v28 = vld [vmem:[%s4870_s28 + $0x10] sm:$0xff]  ;;  %v1496_v29 = vld [vmem:[%s4876_s27] sm:$0xff]  ;;  %v1501_v34 = vld [vmem:[%s4876_s27 + $0x28] sm:$0xff] }
 0x16e   : > { %3845 = vmatpush3.bf16.xpose.msra.mxu1 %v4123_v13  ;;  %v1498_v30 = vld [vmem:[%s4876_s27 + $0x10] sm:$0xff]  ;;  %v1503_v35 = vld [vmem:[%s4876_s27 + $0x38] sm:$0xff]  ;;  %v4121_v37 = vld [vmem:[%s5424_s3 + $0x80] ss:$8 sps:$4 sm:$0xff]   ;;  %v1512_v38 = vadd.f32 %v1496_v29, %v1478_v27  ;;  %v1517_v40 = vadd.f32 %v1501_v34, %v1483_v32 }
 0x16f   : > { %3846 = vmatprep.subr.bf16.mxu1 %v4124_v18  ;;  %v4126_v36 = vld [vmem:[#allocation2 + $0x60] ss:$16 sps:$4 sm:$0xff]   ;;  %v1514_v39 = vadd.f32 %v1498_v30, %v1480_v28  ;;  %v1519_v41 = vadd.f32 %v1503_v35, %v1485_v33  ;;  %v1487_v47 = vld [vmem:[%s4870_s28 + $0x48] sm:$0xff]  ;;  %v1489_v48 = vld [vmem:[%s4870_s28 + $0x58] sm:$0xff] }
 0x170   : > { %1749 = vmatpush1.bf16.msra.mxu0 %v4088_v55  ;;  %v1482_v42 = vld [vmem:[%s4870_s28 + $0x20] sm:$0xff]  ;;  %v1484_v43 = vld [vmem:[%s4870_s28 + $0x30] sm:$0xff]  ;;  %v1505_v49 = vld [vmem:[%s4876_s27 + $0x48] sm:$0xff] }
 0x171   : > { %1750 = vmatprep.subr.bf16.mxu0 %v4089_v56  ;;  %v1500_v44 = vld [vmem:[%s4876_s27 + $0x20] sm:$0xff]  ;;  %v1502_v45 = vld [vmem:[%s4876_s27 + $0x30] sm:$0xff]  ;;  %v1528_v46 = vpack.c.bf16 %v1514_v39, %v1512_v38  ;;  %v1507_v50 = vld [vmem:[%s4876_s27 + $0x58] sm:$0xff]  ;;  %v1531_v7 = vpack.c.bf16 %v1519_v41, %v1517_v40  ;;  %v1521_v51 = vadd.f32 %v1505_v49, %v1487_v47 }
 0x172   : > { %v4127_v6 = vld [vmem:[#allocation2 + $0x40] ss:$16 sps:$4 sm:$0xff]   ;;  %v1516_v8 = vadd.f32 %v1500_v44, %v1482_v42  ;;  %v1518_v9 = vadd.f32 %v1502_v45, %v1484_v43  ;;  %v1523_v52 = vadd.f32 %v1507_v50, %v1489_v48  ;;  %v1493_v59 = vld [vmem:[%s4870_s28 + $0x78] sm:$0xff]  ;;  %v1509_v60 = vld [vmem:[%s4876_s27 + $0x68] sm:$0xff] }
 0x173   : > { %v1486_v53 = vld [vmem:[%s4870_s28 + $0x40] sm:$0xff]  ;;  %v1488_v54 = vld [vmem:[%s4870_s28 + $0x50] sm:$0xff]  ;;  %v1511_v61 = vld [vmem:[%s4876_s27 + $0x78] sm:$0xff] }
 0x174   : > { %1751 = vmatpush1.bf16.msra.mxu0 %v4091_v57  ;;  %v1504_v55 = vld [vmem:[%s4876_s27 + $0x40] sm:$0xff]  ;;  %v1506_v56 = vld [vmem:[%s4876_s27 + $0x50] sm:$0xff]  ;;  %v1530_v57 = vpack.c.bf16 %v1518_v9, %v1516_v8  ;;  %v1533_v62 = vpack.c.bf16 %v1523_v52, %v1521_v51 }
 0x175   : > { %1752 = vmatprep.subr.bf16.mxu0 %v4092_v58  ;;  %v1491_v58 = vld [vmem:[%s4870_s28 + $0x68] sm:$0xff]  ;;  %v1522_v0 = vadd.f32 %v1506_v56, %v1488_v54  ;;  %v1510_v12 = vld [vmem:[%s4876_s27 + $0x70] sm:$0xff] }
 0x176   : > { %3847 = vmatpush3.bf16.xpose.msra.mxu1 %v4124_v18  ;;  %v1525_v1 = vadd.f32 %v1509_v60, %v1491_v58  ;;  %v4130_v18 = vld [vmem:[#allocation2 + $0xe4] ss:$16 sps:$4 sm:$0xff]  }
 0x177   : > { %3848 = vmatprep.subr.bf16.mxu1 %v4125_v23  ;;  %v4131_v44 = vld [vmem:[#allocation2 + $0xc4] ss:$16 sps:$4 sm:$0xff]  }
 0x178   : > { %1753 = vmatpush1.bf16.msra.mxu0 %v4094_v63  ;;  %v1520_v63 = vadd.f32 %v1504_v55, %v1486_v53  ;;  %v4132_v52 = vld [vmem:[#allocation2 + $0xa4] ss:$16 sps:$4 sm:$0xff]  }
 0x179   : > { %1754 = vmatprep.subr.bf16.mxu0 %v4095_v2  ;;  %v1527_v2 = vadd.f32 %v1511_v61, %v1493_v59 }
 0x17a   : > { %v1532_v3 = vpack.c.bf16 %v1522_v0, %v1520_v63  ;;  %v4133_v63 = vld [vmem:[#allocation2 + $0x84] ss:$16 sps:$4 sm:$0xff]  }
 0x17c   : > { %1755 = vmatpush1.bf16.msra.mxu0 %v4097_v4  ;;  %v1490_v4 = vld [vmem:[%s4870_s28 + $0x60] sm:$0xff] }
 0x17d   : > { %1756 = vmatprep.subr.bf16.mxu0 %v4098_v5  ;;  %v1535_v5 = vpack.c.bf16 %v1527_v2, %v1525_v1  ;;  %v4134_v1 = vld [vmem:[#allocation2 + $0x64] ss:$16 sps:$4 sm:$0xff]  }
 0x17e   : > { %3849 = vmatpush3.bf16.xpose.msra.mxu1 %v4125_v23  ;;  %v4135_v2 = vld [vmem:[#allocation2 + $0x44] ss:$16 sps:$4 sm:$0xff]  }
 0x17f   : > { %3850 = vmatprep.subr.bf16.mxu1 %v4126_v36 }
 0x180   : > { %1757 = vmatpush2.bf16.msra.mxu0 %v4100_v10  ;;  %v1492_v10 = vld [vmem:[%s4870_s28 + $0x70] sm:$0xff] }
 0x181   : > { %1758 = vmatprep.subr.bf16.mxu0 %v4101_v11  ;;  %v1508_v11 = vld [vmem:[%s4876_s27 + $0x60] sm:$0xff] }
 0x182   : > { %v1524_v13 = vadd.f32 %v1508_v11, %v1490_v4  ;;  %v4137_v4 = vld [vmem:[#allocation2 + $0x4] ss:$16 sps:$4 sm:$0xff]  }
 0x184   : > { %1759 = vmatpush2.bf16.msra.mxu0 %v4103_v14  ;;  %v1526_v14 = vadd.f32 %v1510_v12, %v1492_v10 }
 0x185   : > { %1760 = vmatprep.subr.bf16.mxu0 %v4104_v15 }
 0x186   : > { %3851 = vmatpush3.bf16.xpose.msra.mxu1 %v4126_v36  ;;  %v1534_v15 = vpack.c.bf16 %v1526_v14, %v1524_v13 }
 0x187   : > { %3852 = vmatprep.subr.bf16.mxu1 %v4127_v6 }
 0x188   : > { %1761 = vmatpush2.bf16.msra.mxu0 %v4106_v16  ;;  %v4128_v16 = vld [vmem:[#allocation2 + $0x20] ss:$16 sps:$4 sm:$0xff]  }
 0x189   : > { %1762 = vmatprep.subr.bf16.mxu0 %v4107_v17  ;;  %v4129_v17 = vld [vmem:[#allocation2] ss:$16 sps:$4 sm:$0xff]  }
 0x18c   : > { %1763 = vmatpush2.bf16.msra.mxu0 %v4109_v19  ;;  %v1570_v19 = vlaneseq }
 0x18d   : > { %1764 = vmatprep.subr.bf16.mxu0 %v4110_v20 }
 0x18e   : > { %3853 = vmatpush3.bf16.xpose.msra.mxu1 %v4127_v6  ;;  %v1571_v20 = vshrl.u32 %v1570_v19, 7 }
 0x18f   : > { %3854 = vmatprep.subr.bf16.mxu1 %v4128_v16 }
 0x190   : > { %1765 = vmatpush2.bf16.msra.mxu0 %v4112_v21  ;;  %v4970_v21 = vsub.s32 0, %v1571_v20 }
 0x191   : > { %1766 = vmatprep.subr.bf16.mxu0 %v4113_v22  ;;  %v1568_v22 = vld [vmem:[%s5425_s4] sm:$0x3] }
 0x192   : > { %v1573_v23 = vrot.slane %v1568_v22, %v4970_v21 }
 0x194   : > { %1767 = vmatpush2.bf16.msra.mxu0 %v4115_v24 }
 0x195   : > { %1768 = vmatprep.subr.bf16.mxu0 %v4116_v25 }
 0x196   : > { %3855 = vmatpush3.bf16.xpose.msra.mxu1 %v4128_v16 }
 0x197   : > { %3856 = vmatprep.subr.bf16.mxu1 %v4129_v17 }
 0x198   : > { %1769 = vmatpush2.bf16.msra.mxu0 %v4118_v26 }
 0x199   : > { %1770 = vmatprep.subr.bf16.mxu0 %v4119_v31 }
 0x19c   : > { %1771 = vmatpush2.bf16.msra.mxu0 %v4121_v37 }
 0x19e   : > { %3857 = vmatpush3.bf16.xpose.msra.mxu1 %v4129_v17 }
 0x19f   : > { %1773 = vmatmul.mubr.bf16.vlgmr.msra.gmra.mxu0 %v1528_v46  ;;  %3890 = vmatprep.subr.bf16.mxu1 %v4130_v18  ;;  %v4976_v46 = vsub.s32 1, %v1571_v20 }
 0x1a0   : > { %1782 = vmatprep.mubr.bf16.mxu0 %v1531_v7 }
 0x1a1   : > { %v1577_v7 = vrot.slane %v1568_v22, %v4976_v46 }
 0x1a7   : > { %1783 = vmatmul.mubr.bf16.gmra.mxu0 %v1530_v57 }
 0x1a8   : > { %1792 = vmatprep.mubr.bf16.mxu0 %v1533_v62 }
 0x1af   : > { %1793 = vmatmul.mubr.bf16.gmra.mxu0 %v1532_v3  ;;  %v4136_v3 = vld [vmem:[#allocation2 + $0x24] ss:$16 sps:$4 sm:$0xff]  }
 0x1b0   : > { %1802 = vmatprep.mubr.bf16.mxu0 %v1535_v5 }
 0x1b7   : > { %1803 = vmatmul.mubr.bf16.gmra.mxu0 %v1534_v15 }
 0x25f   : > { %v1774_v24 = vpop.f32.mrf.mxu0 }
 0x260   : > { %v1775_v26 = vadd.f32 %v1774_v24, %v1573_v23 }
 0x261   : > { %v1776_v25 = vpop.f32.mrf.mxu0 }
 0x262   : > { %v1829_v30 = vmul.f32 0.088388346, %v1775_v26  ;;  %v1777_v55 = vadd.f32 %v1776_v25, %v1577_v7  ;;  %v3791_v26 = vld [vmem:[%s4493_s24 + $0x8] sm:$0xff]  }
 0x263   : > { %v1778_v27 = vpop.f32.mrf.mxu0 }
 0x264   : > { %v1779_v28 = vadd.f32 %v1778_v27, %v1573_v23  ;;  %v2215_v61 = vmul.f32 0.088388346, %v1777_v55  ;;  %v3776_v27 = vld [vmem:[%s4493_s24] sm:$0xff]  }
 0x265   : > { %v1780_v29 = vpop.f32.mrf.mxu0 }
 0x266   : > { %v1830_v31 = vmul.f32 0.088388346, %v1779_v28  ;;  %v1781_v53 = vadd.f32 %v1780_v29, %v1577_v7  ;;  %v3781_v28 = vunpack.c.l.bf16 %v3791_v26  ;;  %v3777_v29 = vunpack.c.l.bf16 %v3776_v27 }
 0x267   : > { %v1784_v32 = vpop.f32.mrf.mxu0 }
 0x268   : > { %v1837_v33 = vpack.c.bf16 %v1830_v31, %v1829_v30  ;;  %v1785_v35 = vadd.f32 %v1784_v32, %v1573_v23  ;;  %v2216_v59 = vmul.f32 0.088388346, %v1781_v53  ;;  %v3782_v32 = vunpack.c.h.bf16 %v3791_v26 }
 0x269   : > { %v1786_v34 = vpop.f32.mrf.mxu0 }
 0x26a   : > { %3858 = vmatprep.mubr.bf16.mxu1 %v1837_v33  ;;  %v1831_v39 = vmul.f32 0.088388346, %v1785_v35  ;;  %v2223_v0 = vpack.c.bf16 %v2216_v59, %v2215_v61  ;;  %v1787_v12 = vadd.f32 %v1786_v34, %v1577_v7  ;;  %v3778_v35 = vunpack.c.h.bf16 %v3776_v27 }
 0x26b   : > { %v1788_v36 = vpop.f32.mrf.mxu0 }
 0x26c   : > { %v1789_v37 = vadd.f32 %v1788_v36, %v1573_v23  ;;  %v2217_v17 = vmul.f32 0.088388346, %v1787_v12 }
 0x26d   : > { %v1790_v38 = vpop.f32.mrf.mxu0 }
 0x26e   : > { %v1832_v40 = vmul.f32 0.088388346, %v1789_v37  ;;  %v1791_v5 = vadd.f32 %v1790_v38, %v1577_v7 }
 0x26f   : > { %v1794_v41 = vpop.f32.mrf.mxu0 }
 0x270   : > { %v1838_v42 = vpack.c.bf16 %v1832_v40, %v1831_v39  ;;  %v1795_v43 = vadd.f32 %v1794_v41, %v1573_v23  ;;  %v2218_v13 = vmul.f32 0.088388346, %v1791_v5  ;;  %v3792_v40 = vld [vmem:[%s4493_s24 + $0x10] sm:$0xff]   ;;  %v3793_v41 = vld [vmem:[%s4493_s24 + $0x18] sm:$0xff]  }
 0x271   : > { %v1796_v45 = vpop.f32.mrf.mxu0 }
 0x272   : > { %3859 = vmatmul.mubr.bf16.vlgmr.msra.gmra.mxu1 %v1838_v42  ;;  %v1833_v48 = vmul.f32 0.088388346, %v1795_v43  ;;  %v1797_v10 = vadd.f32 %v1796_v45, %v1577_v7  ;;  %v3785_v42 = vunpack.c.l.bf16 %v3792_v40 }
 0x273   : > { %3891 = vmatpush3.bf16.xpose.msra.mxu1 %v4130_v18  ;;  %v1798_v47 = vpop.f32.mrf.mxu0  ;;  %v2224_v18 = vpack.c.bf16 %v2218_v13, %v2217_v17 }
 0x274   : > { %v1799_v49 = vadd.f32 %v1798_v47, %v1573_v23  ;;  %3892 = vmatprep.subr.bf16.mxu1 %v4131_v44  ;;  %v2219_v14 = vmul.f32 0.088388346, %v1797_v10 }
 0x275   : > { %v1800_v50 = vpop.f32.mrf.mxu0 }
 0x276   : > { %v1834_v6 = vmul.f32 0.088388346, %v1799_v49  ;;  %v1801_v11 = vadd.f32 %v1800_v50, %v1577_v7 }
 0x277   : > { %v1804_v8 = vpop.f32.mrf.mxu0 }
 0x278   : > { %v1839_v9 = vpack.c.bf16 %v1834_v6, %v1833_v48  ;;  %v1805_v51 = vadd.f32 %v1804_v8, %v1573_v23  ;;  %v2220_v15 = vmul.f32 0.088388346, %v1801_v11  ;;  %v3786_v48 = vunpack.c.h.bf16 %v3792_v40  ;;  %v4141_v40 = vld [vmem:[#allocation2 + $0x88] ss:$16 sps:$4 sm:$0xff]  }
 0x279   : > { %v1806_v54 = vpop.f32.mrf.mxu0  ;;  %v3790_v6 = vunpack.c.h.bf16 %v3793_v41 }
 0x27a   : > { %3862 = vmatprep.mubr.bf16.mxu1 %v1839_v9  ;;  %v1835_v57 = vmul.f32 0.088388346, %v1805_v51  ;;  %v1807_v19 = vadd.f32 %v1806_v54, %v1577_v7  ;;  %v2225_v22 = vpack.c.bf16 %v2220_v15, %v2219_v14 }
 0x27b   : > { %3893 = vmatpush3.bf16.xpose.msra.mxu1 %v4131_v44  ;;  %v1808_v56 = vpop.f32.mrf.mxu0  ;;  %v3789_v44 = vunpack.c.l.bf16 %v3793_v41  ;;  %v4142_v41 = vld [vmem:[#allocation2 + $0x68] ss:$16 sps:$4 sm:$0xff]  }
 0x27c   : > { %v1809_v58 = vadd.f32 %v1808_v56, %v1573_v23  ;;  %3894 = vmatprep.subr.bf16.mxu1 %v4132_v52  ;;  %v2221_v23 = vmul.f32 0.088388346, %v1807_v19 }
 0x27d   : > { %v1810_v16 = vpop.f32.mrf.mxu0 }
 0x27e   : > { %v1836_v60 = vmul.f32 0.088388346, %v1809_v58  ;;  %v1811_v20 = vadd.f32 %v1810_v16, %v1577_v7 }
 0x280   : > { %v1840_v62 = vpack.c.bf16 %v1836_v60, %v1835_v57  ;;  %v2222_v24 = vmul.f32 0.088388346, %v1811_v20 }
 0x282   : > { %3863 = vmatmul.mubr.bf16.gmra.mxu1 %v1840_v62  ;;  %v2226_v25 = vpack.c.bf16 %v2222_v24, %v2221_v23 }
 0x283   : > { %3895 = vmatpush3.bf16.xpose.msra.mxu1 %v4132_v52  ;;  %3906 = vmatprep.mubr.bf16.mxu1 %v2223_v0 }
 0x284   : > { %3896 = vmatprep.subr.bf16.mxu1 %v4133_v63 }
 0x28b   : > { %3897 = vmatpush3.bf16.xpose.msra.mxu1 %v4133_v63 }
 0x28c   : > { %3898 = vmatprep.subr.bf16.mxu1 %v4134_v1 }
 0x293   : > { %3899 = vmatpush3.bf16.xpose.msra.mxu1 %v4134_v1 }
 0x294   : > { %3900 = vmatprep.subr.bf16.mxu1 %v4135_v2 }
 0x29b   : > { %3901 = vmatpush3.bf16.xpose.msra.mxu1 %v4135_v2 }
 0x29c   : > { %3902 = vmatprep.subr.bf16.mxu1 %v4136_v3 }
 0x2a3   : > { %3903 = vmatpush3.bf16.xpose.msra.mxu1 %v4136_v3  ;;  %v4138_v3 = vld [vmem:[#allocation2 + $0xe8] ss:$16 sps:$4 sm:$0xff]  }
 0x2a4   : > { %3904 = vmatprep.subr.bf16.mxu1 %v4137_v4  ;;  %3866 = vmatprep.subr.bf16.mxu0 %v4138_v3 }
 0x2a5   : > { %3867 = vmatpush3.bf16.msra.mxu0 %v4138_v3 }
 0x2ab   : > { %3905 = vmatpush3.bf16.xpose.msra.mxu1 %v4137_v4  ;;  %v4139_v4 = vld [vmem:[#allocation2 + $0xc8] ss:$16 sps:$4 sm:$0xff]  }
 0x2ac   : > { %3868 = vmatprep.subr.bf16.mxu0 %v4139_v4 }
 0x2ad   : > { %3869 = vmatpush3.bf16.msra.mxu0 %v4139_v4 }
 0x2b2   : > { %3907 = vmatmul.mubr.bf16.vlgmr.msra.gmra.mxu1 %v2224_v18 }
 0x2b3   : > { %3910 = vmatprep.mubr.bf16.mxu1 %v2225_v22 }
 0x2ba   : > { %3911 = vmatmul.mubr.bf16.gmra.mxu1 %v2226_v25 }
 0x332   : > { %v3860_v30 = vpop.f32.mrf.mxu1 }
 0x333   : > { %v4981_v31 = vadd.f32 %v3860_v30, %v3781_v28 }
 0x334   : > { %v1955_v33 = vpop.f32.mrf.mxu1 }
 0x335   : > { %v4983_v34 = vadd.f32 %v3777_v29, %v1955_v33  ;;  %1990 = vmax.xlane.f32.xlu1 %v4981_v31 }
 0x336   : > { %v3861_v36 = vpop.f32.mrf.mxu1 }
 0x337   : > { %v4986_v37 = vadd.f32 %v3861_v36, %v3782_v32  ;;  %1986 = vmax.xlane.f32.xlu0 %v4983_v34 }
 0x338   : > { %v1958_v38 = vpop.f32.mrf.mxu1 }
 0x339   : > { %v1959_v39 = vadd.f32 %v3778_v35, %v1958_v38  ;;  %1992 = vmax.xlane.f32.xlu1 %v4986_v37  ;;  %v4140_v38 = vld [vmem:[#allocation2 + $0xa8] ss:$16 sps:$4 sm:$0xff]  }
 0x33a   : > { %3870 = vmatprep.subr.bf16.mxu0 %v4140_v38 }
 0x33b   : > { %1988 = vmax.xlane.f32.xlu0 %v1959_v39  ;;  %3871 = vmatpush3.bf16.msra.mxu0 %v4140_v38 }
 0x33c   : > { %3872 = vmatprep.subr.bf16.mxu0 %v4141_v40 }
 0x33f   : > { %3873 = vmatpush3.bf16.msra.mxu0 %v4141_v40 }
 0x340   : > { %3874 = vmatprep.subr.bf16.mxu0 %v4142_v41 }
 0x342   : > { %v3864_v43 = vpop.f32.mrf.mxu1 }
 0x343   : > { %v4992_v50 = vadd.f32 %v3864_v43, %v3789_v44  ;;  %v4143_v43 = vld [vmem:[#allocation2 + $0x48] ss:$16 sps:$4 sm:$0xff]   ;;  %3875 = vmatpush3.bf16.msra.mxu0 %v4142_v41 }
 0x344   : > { %v1971_v45 = vpop.f32.mrf.mxu1  ;;  %3876 = vmatprep.subr.bf16.mxu0 %v4143_v43 }
 0x345   : > { %v1972_v47 = vadd.f32 %v3785_v42, %v1971_v45 }
 0x346   : > { %v3865_v49 = vpop.f32.mrf.mxu1 }
 0x347   : > { %1994 = vmax.xlane.f32.xlu0 %v1972_v47  ;;  %v4996_v9 = vadd.f32 %v3865_v49, %v3790_v6  ;;  %3877 = vmatpush3.bf16.msra.mxu0 %v4143_v43  ;;  %v4147_v43 = vld [vmem:[#allocation2 + $0xcc] ss:$16 sps:$4 sm:$0xff]  }
 0x348   : > { %v1974_v7 = vpop.f32.mrf.mxu1 }
 0x349   : > { %v4994_v8 = vadd.f32 %v3786_v48, %v1974_v7 }
 0x34b   : > { %1996 = vmax.xlane.f32.xlu1 %v4994_v8  ;;  %1998 = vmax.xlane.f32.xlu0 %v4992_v50 }
 0x34f   : > { %2000 = vmax.xlane.f32.xlu1 %v4996_v9 }
 0x372   : > { %v3908_v51 = vpop.f32.mrf.mxu1 }
 0x373   : > { %v5004_v56 = vadd.f32 %v3908_v51, %v3781_v28 }
 0x374   : > { %v2341_v52 = vpop.f32.mrf.mxu1 }
 0x375   : > { %v5001_v53 = vadd.f32 %v3777_v29, %v2341_v52 }
 0x376   : > { %v3909_v54 = vpop.f32.mrf.mxu1 }
 0x377   : > { %2372 = vmax.xlane.f32.xlu0 %v5001_v53  ;;  %v5010_v60 = vadd.f32 %v3909_v54, %v3782_v32 }
 0x378   : > { %v2344_v55 = vpop.f32.mrf.mxu1 }
 0x379   : > { %v5006_v57 = vadd.f32 %v3778_v35, %v2344_v55  ;;  %v5058_v55 = vld [vmem:[#allocation2 + $0xec] ss:$16 sps:$4 sm:$0xff]  }
 0x37a   : > { %v3912_v58 = vpop.f32.mrf.mxu1 }
 0x37b   : > { %2374 = vmax.xlane.f32.xlu1 %v5006_v57  ;;  %2376 = vmax.xlane.f32.xlu0 %v5004_v56  ;;  %v5016_v0 = vadd.f32 %v3912_v58, %v3789_v44 }
 0x37c   : > { %v2357_v59 = vpop.f32.mrf.mxu1 }
 0x37d   : > { %v5012_v61 = vadd.f32 %v3785_v42, %v2357_v59 }
 0x37e   : > { %v3913_v62 = vpop.f32.mrf.mxu1 }
 0x37f   : > { %2378 = vmax.xlane.f32.xlu1 %v5010_v60  ;;  %2380 = vmax.xlane.f32.xlu0 %v5012_v61  ;;  %v5022_v2 = vadd.f32 %v3913_v62, %v3790_v6 }
 0x380   : > { %v2360_v63 = vpop.f32.mrf.mxu1 }
 0x381   : > { %v5018_v1 = vadd.f32 %v3786_v48, %v2360_v63  ;;  %v4145_v48 = vld [vmem:[#allocation2 + $0x8] ss:$16 sps:$4 sm:$0xff]  }
 0x383   : > { %2382 = vmax.xlane.f32.xlu1 %v5018_v1  ;;  %2384 = vmax.xlane.f32.xlu0 %v5016_v0 }
 0x387   : > { %2386 = vmax.xlane.f32.xlu1 %v5022_v2 }
 0x3be   : > { %v1991_v5 = vpop.xlane.xlu1 %1990 }
 0x3bf   : > { %v2004_v10 = vsub.f32 %v4981_v31, %v1991_v5 }
 0x3c0   : > { %v1987_v11 = vpop.xlane.xlu0 %1986 }
 0x3c1   : > { %v2002_v12 = vsub.f32 %v4983_v34, %v1987_v11  ;;  %v2014_v15 = vmul.f32 1.442695, %v2004_v10 }
 0x3c2   : > { %v1993_v13 = vpop.xlane.xlu1 %1992 }
 0x3c3   : > { %v2010_v14 = vmul.f32 1.442695, %v2002_v12  ;;  %v2005_v17 = vsub.f32 %v4986_v37, %v1993_v13 }
 0x3c4   : > { %v1989_v16 = vpop.xlane.xlu0 %1988 }
 0x3c5   : > { %4262 = vpow2.f32 %v2010_v14  ;;  %v2003_v18 = vsub.f32 %v1959_v39, %v1989_v16  ;;  %v2016_v20 = vmul.f32 1.442695, %v2005_v17 }
 0x3c6   : > { %4264 = vpow2.f32 %v2014_v15 }
 0x3c7   : > { %v2012_v19 = vmul.f32 1.442695, %v2003_v18 }
 0x3c9   : > { %4266 = vpow2.f32 %v2012_v19 }
 0x3ca   : > { %4268 = vpow2.f32 %v2016_v20 }
 0x3d0   : > { %v1995_v22 = vpop.xlane.xlu0 %1994 }
 0x3d1   : > { %v2006_v23 = vsub.f32 %v1972_v47, %v1995_v22  ;;  %v4144_v47 = vld [vmem:[#allocation2 + $0x28] ss:$16 sps:$4 sm:$0xff]  }
 0x3d2   : > { %v5028_v24 = vpop.eup %4262  ;;  %3878 = vmatprep.subr.bf16.mxu0 %v4144_v47 }
 0x3d3   : > { %v2018_v25 = vmul.f32 1.442695, %v2006_v23  ;;  %2026 = vadd.xlane.f32.xlu0 %v5028_v24  ;;  %v5031_v28 = vpop.eup %4264  ;;  %3879 = vmatpush3.bf16.msra.mxu0 %v4144_v47  ;;  %v4149_v47 = vld [vmem:[#allocation2 + $0x8c] ss:$16 sps:$4 sm:$0xff]  }
 0x3d4   : > { %v1997_v26 = vpop.xlane.xlu1 %1996  ;;  %v1999_v27 = vpop.xlane.xlu0 %1998  ;;  %3880 = vmatprep.subr.bf16.mxu0 %v4145_v48 }
 0x3d5   : > { %4270 = vpow2.f32 %v2018_v25  ;;  %v2007_v29 = vsub.f32 %v4994_v8, %v1997_v26  ;;  %v2008_v30 = vsub.f32 %v4992_v50, %v1999_v27 }
 0x3d6   : > { %v5035_v31 = vpop.eup %4266 }
 0x3d7   : > { %v2020_v32 = vmul.f32 1.442695, %v2007_v29  ;;  %v2022_v33 = vmul.f32 1.442695, %v2008_v30  ;;  %2030 = vadd.xlane.f32.xlu0 %v5031_v28  ;;  %2028 = vadd.xlane.f32.xlu1 %v5035_v31  ;;  %v5040_v36 = vpop.eup %4268 }
 0x3d8   : > { %v2001_v34 = vpop.xlane.xlu1 %2000  ;;  %3881 = vmatpush3.bf16.msra.mxu0 %v4145_v48 }
 0x3d9   : > { %4272 = vpow2.f32 %v2020_v32  ;;  %v2009_v35 = vsub.f32 %v4996_v9, %v2001_v34  ;;  %3914 = vmatprep.subr.bf16.mxu0 %v5058_v55 }
 0x3da   : > { %4274 = vpow2.f32 %v2022_v33 }
 0x3db   : > { %v2024_v37 = vmul.f32 1.442695, %v2009_v35  ;;  %2032 = vadd.xlane.f32.xlu1 %v5040_v36 }
 0x3dd   : > { %4276 = vpow2.f32 %v2024_v37 }
 0x3e2   : > { %v5043_v39 = vpop.eup %4270 }
 0x3e3   : > { %2034 = vadd.xlane.f32.xlu0 %v5043_v39 }
 0x3e6   : > { %v5046_v42 = vpop.eup %4272 }
 0x3e7   : > { %v5048_v44 = vpop.eup %4274  ;;  %2036 = vadd.xlane.f32.xlu1 %v5046_v42 }
 0x3e8   : > { %2038 = vadd.xlane.f32.xlu0 %v5048_v44 }
 0x3ea   : > { %v5052_v45 = vpop.eup %4276 }
 0x3eb   : > { %2040 = vadd.xlane.f32.xlu1 %v5052_v45 }
 0x400   : > { %v2373_v49 = vpop.xlane.xlu0 %2372 }
 0x401   : > { %v2388_v50 = vsub.f32 %v5001_v53, %v2373_v49 }
 0x403   : > { %v2396_v6 = vmul.f32 1.442695, %v2388_v50 }
 0x404   : > { %v2375_v7 = vpop.xlane.xlu1 %2374  ;;  %v2377_v8 = vpop.xlane.xlu0 %2376 }
 0x405   : > { %4278 = vpow2.f32 %v2396_v6  ;;  %v2389_v9 = vsub.f32 %v5006_v57, %v2375_v7  ;;  %v2390_v51 = vsub.f32 %v5004_v56, %v2377_v8  ;;  %v4150_v6 = vld [vmem:[#allocation2 + $0x6c] ss:$16 sps:$4 sm:$0xff]  }
 0x407   : > { %v2398_v52 = vmul.f32 1.442695, %v2389_v9  ;;  %v2400_v54 = vmul.f32 1.442695, %v2390_v51 }
 0x408   : > { %v2379_v58 = vpop.xlane.xlu1 %2378  ;;  %v2381_v59 = vpop.xlane.xlu0 %2380 }
 0x409   : > { %4280 = vpow2.f32 %v2398_v52  ;;  %v2391_v62 = vsub.f32 %v5010_v60, %v2379_v58  ;;  %v2392_v63 = vsub.f32 %v5012_v61, %v2381_v59  ;;  %v4151_v52 = vld [vmem:[#allocation2 + $0x4c] ss:$16 sps:$4 sm:$0xff]  }
 0x40a   : > { %4282 = vpow2.f32 %v2400_v54 }
 0x40b   : > { %v2402_v53 = vmul.f32 1.442695, %v2391_v62  ;;  %v2404_v3 = vmul.f32 1.442695, %v2392_v63 }
 0x40c   : > { %v2383_v4 = vpop.xlane.xlu1 %2382  ;;  %v2385_v57 = vpop.xlane.xlu0 %2384 }
 0x40d   : > { %4284 = vpow2.f32 %v2402_v53  ;;  %v2393_v56 = vsub.f32 %v5018_v1, %v2383_v4  ;;  %v2394_v5 = vsub.f32 %v5016_v0, %v2385_v57 }
 0x40e   : > { %4286 = vpow2.f32 %v2404_v3 }
 0x40f   : > { %v2406_v10 = vmul.f32 1.442695, %v2393_v56  ;;  %v2408_v11 = vmul.f32 1.442695, %v2394_v5 }
 0x410   : > { %v2387_v12 = vpop.xlane.xlu1 %2386 }
 0x411   : > { %4288 = vpow2.f32 %v2406_v10  ;;  %v2395_v60 = vsub.f32 %v5022_v2, %v2387_v12 }
 0x412   : > { %v5066_v61 = vpop.eup %4278  ;;  %4290 = vpow2.f32 %v2408_v11 }
 0x413   : > { %v2410_v13 = vmul.f32 1.442695, %v2395_v60  ;;  %2412 = vadd.xlane.f32.xlu0 %v5066_v61 }
 0x415   : > { %4292 = vpow2.f32 %v2410_v13 }
 0x416   : > { %v5069_v14 = vpop.eup %4280 }
 0x417   : > { %v5071_v15 = vpop.eup %4282  ;;  %2414 = vadd.xlane.f32.xlu1 %v5069_v14 }
 0x418   : > { %2416 = vadd.xlane.f32.xlu0 %v5071_v15 }
 0x41a   : > { %v5075_v0 = vpop.eup %4284 }
 0x41b   : > { %v5077_v1 = vpop.eup %4286  ;;  %2418 = vadd.xlane.f32.xlu1 %v5075_v0 }
 0x41c   : > { %2420 = vadd.xlane.f32.xlu0 %v5077_v1 }
 0x41e   : > { %v5081_v2 = vpop.eup %4288 }
 0x41f   : > { %v5083_v16 = vpop.eup %4290  ;;  %2422 = vadd.xlane.f32.xlu1 %v5081_v2 }
 0x420   : > { %2424 = vadd.xlane.f32.xlu0 %v5083_v16 }
 0x422   : > { %v5087_v17 = vpop.eup %4292 }
 0x423   : > { %2426 = vadd.xlane.f32.xlu1 %v5087_v17 }
 0x45c   : > { %v2027_v18 = vpop.xlane.xlu0 %2026 }
 0x45d   : > { %4294 = vrcp.f32 %v2027_v18 }
 0x460   : > { %v2029_v19 = vpop.xlane.xlu1 %2028  ;;  %v2031_v20 = vpop.xlane.xlu0 %2030 }
 0x461   : > { %4296 = vrcp.f32 %v2029_v19 }
 0x462   : > { %4298 = vrcp.f32 %v2031_v20 }
 0x464   : > { %v2033_v22 = vpop.xlane.xlu1 %2032 }
 0x465   : > { %4300 = vrcp.f32 %v2033_v22 }
 0x46a   : > { %v4295_v23 = vpop.eup %4294 }
 0x46b   : > { %v2050_v27 = vmul.f32 %v4295_v23, %v5028_v24  ;;  %v4148_v24 = vld [vmem:[#allocation2 + $0xac] ss:$16 sps:$4 sm:$0xff]  }
 0x46c   : > { %v2035_v25 = vpop.xlane.xlu0 %2034 }
 0x46d   : > { %4302 = vrcp.f32 %v2035_v25 }
 0x46e   : > { %v4297_v26 = vpop.eup %4296 }
 0x46f   : > { %v2051_v29 = vmul.f32 %v4297_v26, %v5035_v31  ;;  %v4299_v30 = vpop.eup %4298 }
 0x470   : > { %v2037_v32 = vpop.xlane.xlu1 %2036  ;;  %v2052_v37 = vmul.f32 %v4299_v30, %v5031_v28  ;;  %v4168_v30 = vld [vmem:[%s5428_s7 + $0x34] ss:$8 sps:$4 sm:$0xff]  }
 0x471   : > { %4304 = vrcp.f32 %v2037_v32  ;;  %v2039_v33 = vpop.xlane.xlu0 %2038  ;;  %v2058_v34 = vpack.c.bf16 %v2051_v29, %v2050_v27  ;;  %v4165_v27 = vld [vmem:[%s5428_s7 + $0x44] ss:$8 sps:$4 sm:$0xff]   ;;  %v4163_v29 = vld [vmem:[%s5428_s7 + $0x40] ss:$8 sps:$4 sm:$0xff]   ;;  %v4166_v32 = vld [vmem:[%s5428_s7 + $0x30] ss:$8 sps:$4 sm:$0xff]  }
 0x472   : > { %v4301_v35 = vpop.eup %4300  ;;  %4306 = vrcp.f32 %v2039_v33  ;;  %v4171_v33 = vld [vmem:[%s5428_s7 + $0x24] ss:$8 sps:$4 sm:$0xff]  }
 0x473   : > { %3882 = vmatprep.mubr.bf16.mxu0 %v2058_v34  ;;  %v2053_v38 = vmul.f32 %v4301_v35, %v5040_v36  ;;  %v4169_v34 = vld [vmem:[%s5428_s7 + $0x20] ss:$8 sps:$4 sm:$0xff]   ;;  %v4174_v35 = vld [vmem:[%s5428_s7 + $0x14] ss:$8 sps:$4 sm:$0xff]  }
 0x474   : > { %v2041_v40 = vpop.xlane.xlu1 %2040 }
 0x475   : > { %4308 = vrcp.f32 %v2041_v40  ;;  %v2059_v41 = vpack.c.bf16 %v2053_v38, %v2052_v37  ;;  %v4172_v37 = vld [vmem:[%s5428_s7 + $0x10] ss:$8 sps:$4 sm:$0xff]   ;;  %v4177_v38 = vld [vmem:[%s5428_s7 + $0x4] ss:$8 sps:$4 sm:$0xff]   ;;  %v4175_v40 = vld [vmem:[%s5428_s7] ss:$8 sps:$4 sm:$0xff]  }
 0x477   : > { %3883 = vmatmul.mubr.bf16.vlgmr.msra.gmra.mxu0 %v2059_v41  ;;  %v4180_v41 = vld [vmem:[%s5428_s7 + $0xf4] ss:$8 sps:$4 sm:$0xff]  }
 0x478   : > { %3915 = vmatpush3.bf16.msra.mxu0 %v5058_v55 }
 0x479   : > { %3916 = vmatprep.subr.bf16.mxu0 %v4147_v43 }
 0x47a   : > { %v4303_v31 = vpop.eup %4302 }
 0x47b   : > { %v2054_v49 = vmul.f32 %v4303_v31, %v5043_v39  ;;  %v4152_v39 = vld [vmem:[#allocation2 + $0x2c] ss:$16 sps:$4 sm:$0xff]   ;;  %v4181_v31 = vld [vmem:[%s5428_s7 + $0xe0] ss:$8 sps:$4 sm:$0xff]  }
 0x47c   : > { %3917 = vmatpush3.bf16.msra.mxu0 %v4147_v43  ;;  %v4178_v43 = vld [vmem:[%s5428_s7 + $0xf0] ss:$8 sps:$4 sm:$0xff]  }
 0x47d   : > { %3918 = vmatprep.subr.bf16.mxu0 %v4148_v24 }
 0x47e   : > { %v4305_v48 = vpop.eup %4304 }
 0x47f   : > { %v2055_v28 = vmul.f32 %v4305_v48, %v5046_v42  ;;  %v4307_v50 = vpop.eup %4306  ;;  %v4153_v42 = vld [vmem:[#allocation2 + $0xc] ss:$16 sps:$4 sm:$0xff]   ;;  %v4184_v48 = vld [vmem:[%s5428_s7 + $0xd0] ss:$8 sps:$4 sm:$0xff]  }
 0x480   : > { %3919 = vmatpush3.bf16.msra.mxu0 %v4148_v24  ;;  %v2056_v8 = vmul.f32 %v4307_v50, %v5048_v44  ;;  %v4183_v24 = vld [vmem:[%s5428_s7 + $0xe4] ss:$8 sps:$4 sm:$0xff]   ;;  %v4192_v50 = vld [vmem:[%s5428_s7 + $0xb4] ss:$8 sps:$4 sm:$0xff]  }
 0x481   : > { %v2060_v36 = vpack.c.bf16 %v2055_v28, %v2054_v49  ;;  %3920 = vmatprep.subr.bf16.mxu0 %v4149_v47  ;;  %v4189_v49 = vld [vmem:[%s5428_s7 + $0xc4] ss:$8 sps:$4 sm:$0xff]   ;;  %v4187_v28 = vld [vmem:[%s5428_s7 + $0xc0] ss:$8 sps:$4 sm:$0xff]  }
 0x482   : > { %v4309_v7 = vpop.eup %4308 }
 0x483   : > { %3886 = vmatprep.mubr.bf16.mxu0 %v2060_v36  ;;  %v2057_v9 = vmul.f32 %v4309_v7, %v5052_v45  ;;  %v4190_v36 = vld [vmem:[%s5428_s7 + $0xb0] ss:$8 sps:$4 sm:$0xff]   ;;  %v4193_v7 = vld [vmem:[%s5428_s7 + $0xa0] ss:$8 sps:$4 sm:$0xff]  }
 0x484   : > { %3921 = vmatpush3.bf16.msra.mxu0 %v4149_v47  ;;  %v4186_v47 = vld [vmem:[%s5428_s7 + $0xd4] ss:$8 sps:$4 sm:$0xff]  }
 0x485   : > { %v2061_v51 = vpack.c.bf16 %v2057_v9, %v2056_v8  ;;  %3922 = vmatprep.subr.bf16.mxu0 %v4150_v6  ;;  %v4198_v8 = vld [vmem:[%s5428_s7 + $0x94] ss:$8 sps:$4 sm:$0xff]   ;;  %v4196_v9 = vld [vmem:[%s5428_s7 + $0x90] ss:$8 sps:$4 sm:$0xff]  }
 0x487   : > { %3887 = vmatmul.mubr.bf16.gmra.mxu0 %v2061_v51  ;;  %v4201_v51 = vld [vmem:[%s5428_s7 + $0x84] ss:$8 sps:$4 sm:$0xff]  }
 0x488   : > { %3923 = vmatpush3.bf16.msra.mxu0 %v4150_v6  ;;  %v4195_v6 = vld [vmem:[%s5428_s7 + $0xa4] ss:$8 sps:$4 sm:$0xff]  }
 0x489   : > { %3924 = vmatprep.subr.bf16.mxu0 %v4151_v52 }
 0x48c   : > { %3925 = vmatpush3.bf16.msra.mxu0 %v4151_v52  ;;  %v4199_v52 = vld [vmem:[%s5428_s7 + $0x80] ss:$8 sps:$4 sm:$0xff]  }
 0x48d   : > { %3926 = vmatprep.subr.bf16.mxu0 %v4152_v39 }
 0x490   : > { %3927 = vmatpush3.bf16.msra.mxu0 %v4152_v39  ;;  %v4214_v39 = vld [vmem:[%s5430_s9 + $0x70] ss:$8 sps:$4 sm:$0xff]  }
 0x491   : > { %3928 = vmatprep.subr.bf16.mxu0 %v4153_v42 }
 0x494   : > { %3929 = vmatpush3.bf16.msra.mxu0 %v4153_v42  ;;  %v4216_v42 = vld [vmem:[%s5430_s9 + $0x74] ss:$8 sps:$4 sm:$0xff]  }
 0x495   : > { %3142 = vmatprep.subr.bf16.mxu1 %v4216_v42 }
 0x496   : > { %3143 = vmatpush1.bf16.msra.mxu1 %v4214_v39 }
 0x49c   : > { %v2413_v54 = vpop.xlane.xlu0 %2412 }
 0x49d   : > { %4310 = vrcp.f32 %v2413_v54  ;;  %v4219_v54 = vld [vmem:[%s5430_s9 + $0x64] ss:$8 sps:$4 sm:$0xff]  }
 0x49e   : > { %3144 = vmatprep.subr.bf16.mxu1 %v4219_v54 }
 0x4a0   : > { %v2415_v55 = vpop.xlane.xlu1 %2414 }
 0x4a1   : > { %4312 = vrcp.f32 %v2415_v55  ;;  %v2417_v44 = vpop.xlane.xlu0 %2416  ;;  %v4217_v55 = vld [vmem:[%s5430_s9 + $0x60] ss:$8 sps:$4 sm:$0xff]  }
 0x4a2   : > { %4314 = vrcp.f32 %v2417_v44  ;;  %v4222_v44 = vld [vmem:[%s5430_s9 + $0x54] ss:$8 sps:$4 sm:$0xff]   ;;  %3145 = vmatpush1.bf16.msra.mxu1 %v4217_v55 }
 0x4a3   : > { %3146 = vmatprep.subr.bf16.mxu1 %v4222_v44  ;;  %v4255_v44 = vld [vmem:[%s5430_s9 + $0xa4] ss:$8 sps:$4 sm:$0xff]  }
 0x4a4   : > { %v2419_v45 = vpop.xlane.xlu1 %2418 }
 0x4a5   : > { %4316 = vrcp.f32 %v2419_v45  ;;  %v2421_v58 = vpop.xlane.xlu0 %2420  ;;  %v4220_v45 = vld [vmem:[%s5430_s9 + $0x50] ss:$8 sps:$4 sm:$0xff]  }
 0x4a6   : > { %4318 = vrcp.f32 %v2421_v58  ;;  %v4225_v58 = vld [vmem:[%s5430_s9 + $0x44] ss:$8 sps:$4 sm:$0xff]   ;;  %3147 = vmatpush1.bf16.msra.mxu1 %v4220_v45  ;;  %v4253_v45 = vld [vmem:[%s5430_s9 + $0xa0] ss:$8 sps:$4 sm:$0xff]  }
 0x4a7   : > { %3148 = vmatprep.subr.bf16.mxu1 %v4225_v58  ;;  %v4258_v58 = vld [vmem:[%s5430_s9 + $0x94] ss:$8 sps:$4 sm:$0xff]  }
 0x4a8   : > { %v2423_v59 = vpop.xlane.xlu1 %2422 }
 0x4a9   : > { %4320 = vrcp.f32 %v2423_v59  ;;  %v2425_v62 = vpop.xlane.xlu0 %2424  ;;  %v4223_v59 = vld [vmem:[%s5430_s9 + $0x40] ss:$8 sps:$4 sm:$0xff]  }
 0x4aa   : > { %4322 = vrcp.f32 %v2425_v62  ;;  %v4311_v63 = vpop.eup %4310  ;;  %v4228_v62 = vld [vmem:[%s5430_s9 + $0x34] ss:$8 sps:$4 sm:$0xff]   ;;  %3149 = vmatpush1.bf16.msra.mxu1 %v4223_v59  ;;  %v4256_v59 = vld [vmem:[%s5430_s9 + $0x90] ss:$8 sps:$4 sm:$0xff]  }
 0x4ab   : > { %v2436_v4 = vmul.f32 %v4311_v63, %v5066_v61  ;;  %v4226_v63 = vld [vmem:[%s5430_s9 + $0x30] ss:$8 sps:$4 sm:$0xff]   ;;  %3150 = vmatprep.subr.bf16.mxu1 %v4228_v62  ;;  %v4261_v62 = vld [vmem:[%s5430_s9 + $0x84] ss:$8 sps:$4 sm:$0xff]  }
 0x4ac   : > { %v2427_v53 = vpop.xlane.xlu1 %2426 }
 0x4ad   : > { %4324 = vrcp.f32 %v2427_v53  ;;  %v4231_v53 = vld [vmem:[%s5430_s9 + $0x24] ss:$8 sps:$4 sm:$0xff]  }
 0x4ae   : > { %v4313_v3 = vpop.eup %4312  ;;  %3151 = vmatpush1.bf16.msra.mxu1 %v4226_v63  ;;  %v4259_v63 = vld [vmem:[%s5430_s9 + $0x80] ss:$8 sps:$4 sm:$0xff]  }
 0x4af   : > { %v2437_v57 = vmul.f32 %v4313_v3, %v5069_v14  ;;  %v4315_v56 = vpop.eup %4314  ;;  %v4229_v3 = vld [vmem:[%s5430_s9 + $0x20] ss:$8 sps:$4 sm:$0xff]   ;;  %3152 = vmatprep.subr.bf16.mxu1 %v4231_v53 }
 0x4b0   : > { %v2438_v11 = vmul.f32 %v4315_v56, %v5071_v15  ;;  %v4156_v15 = vld [vmem:[%s5428_s7 + $0x74] ss:$8 sps:$4 sm:$0xff]   ;;  %v2641_v53 = vld [vmem:[%s5429_s8] sm:$0x3] }
 0x4b1   : > { %v2444_v5 = vpack.c.bf16 %v2437_v57, %v2436_v4  ;;  %2853 = vmatprep.subr.bf16.mxu0 %v4156_v15  ;;  %v4234_v4 = vld [vmem:[%s5430_s9 + $0x14] ss:$8 sps:$4 sm:$0xff]  }
 0x4b2   : > { %v4317_v10 = vpop.eup %4316  ;;  %3153 = vmatpush1.bf16.msra.mxu1 %v4229_v3 }
 0x4b3   : > { %3930 = vmatprep.mubr.bf16.mxu0 %v2444_v5  ;;  %v2439_v12 = vmul.f32 %v4317_v10, %v5075_v0  ;;  %v4319_v60 = vpop.eup %4318  ;;  %v4154_v0 = vld [vmem:[%s5428_s7 + $0x70] ss:$8 sps:$4 sm:$0xff]   ;;  %3154 = vmatprep.subr.bf16.mxu1 %v4234_v4  ;;  %v5303_v4 = vrot.slane %v2641_v53, %v4976_v46 }
 0x4b4   : > { %v2440_v19 = vmul.f32 %v4319_v60, %v5077_v1  ;;  %v4159_v1 = vld [vmem:[%s5428_s7 + $0x64] ss:$8 sps:$4 sm:$0xff]   ;;  %v4232_v10 = vld [vmem:[%s5430_s9 + $0x10] ss:$8 sps:$4 sm:$0xff]  }
 0x4b5   : > { %v2445_v13 = vpack.c.bf16 %v2439_v12, %v2438_v11  ;;  %v4237_v12 = vld [vmem:[%s5430_s9 + $0x4] ss:$8 sps:$4 sm:$0xff]  }
 0x4b6   : > { %v4321_v18 = vpop.eup %4320  ;;  %3155 = vmatpush1.bf16.msra.mxu1 %v4232_v10 }
 0x4b7   : > { %3931 = vmatmul.mubr.bf16.vlgmr.msra.gmra.mxu0 %v2445_v13  ;;  %v2441_v20 = vmul.f32 %v4321_v18, %v5081_v2  ;;  %v4323_v22 = vpop.eup %4322  ;;  %v4157_v2 = vld [vmem:[%s5428_s7 + $0x60] ss:$8 sps:$4 sm:$0xff]   ;;  %3156 = vmatprep.subr.bf16.mxu1 %v4237_v12 }
 0x4b8   : > { %v2442_v14 = vmul.f32 %v4323_v22, %v5083_v16  ;;  %2854 = vmatpush1.bf16.msra.mxu0 %v4154_v0  ;;  %v4160_v16 = vld [vmem:[%s5428_s7 + $0x50] ss:$8 sps:$4 sm:$0xff]   ;;  %v4240_v22 = vld [vmem:[%s5430_s9 + $0xf4] ss:$8 sps:$4 sm:$0xff]  }
 0x4b9   : > { %v2446_v61 = vpack.c.bf16 %v2441_v20, %v2440_v19  ;;  %2855 = vmatprep.subr.bf16.mxu0 %v4159_v1  ;;  %v4235_v19 = vld [vmem:[%s5430_s9] ss:$8 sps:$4 sm:$0xff]   ;;  %v4244_v1 = vld [vmem:[%s5430_s9 + $0xd0] ss:$8 sps:$4 sm:$0xff]  }
 0x4ba   : > { %v4325_v23 = vpop.eup %4324  ;;  %3157 = vmatpush1.bf16.msra.mxu1 %v4235_v19 }
 0x4bb   : > { %3934 = vmatprep.mubr.bf16.mxu0 %v2446_v61  ;;  %v2443_v25 = vmul.f32 %v4325_v23, %v5087_v17  ;;  %v4162_v17 = vld [vmem:[%s5428_s7 + $0x54] ss:$8 sps:$4 sm:$0xff]   ;;  %v4238_v61 = vld [vmem:[%s5430_s9 + $0xf0] ss:$8 sps:$4 sm:$0xff]   ;;  %3158 = vmatprep.subr.bf16.mxu1 %v4240_v22  ;;  %v4243_v23 = vld [vmem:[%s5430_s9 + $0xe4] ss:$8 sps:$4 sm:$0xff]  }
 0x4bc   : > { %2856 = vmatpush1.bf16.msra.mxu0 %v4157_v2  ;;  %v4327_v22 = vld [vmem:[%s4870_s28 + $0x8] sm:$0xff] }
 0x4bd   : > { %v2447_v26 = vpack.c.bf16 %v2443_v25, %v2442_v14  ;;  %2857 = vmatprep.subr.bf16.mxu0 %v4162_v17  ;;  %v4241_v14 = vld [vmem:[%s5430_s9 + $0xe0] ss:$8 sps:$4 sm:$0xff]   ;;  %v4246_v25 = vld [vmem:[%s5430_s9 + $0xd4] ss:$8 sps:$4 sm:$0xff]  }
 0x4be   : > { %3159 = vmatpush2.bf16.msra.mxu1 %v4238_v61 }
 0x4bf   : > { %3935 = vmatmul.mubr.bf16.gmra.mxu0 %v2447_v26  ;;  %3160 = vmatprep.subr.bf16.mxu1 %v4243_v23  ;;  %v4328_v23 = vld [vmem:[%s4870_s28 + $0x18] sm:$0xff] }
 0x4c0   : > { %2858 = vmatpush1.bf16.msra.mxu0 %v4160_v16  ;;  %v4249_v16 = vld [vmem:[%s5430_s9 + $0xc4] ss:$8 sps:$4 sm:$0xff]  }
 0x4c1   : > { %2859 = vmatprep.subr.bf16.mxu0 %v4165_v27 }
 0x4c2   : > { %3161 = vmatpush2.bf16.msra.mxu1 %v4241_v14 }
 0x4c3   : > { %3162 = vmatprep.subr.bf16.mxu1 %v4246_v25  ;;  %v4329_v25 = vld [vmem:[%s4870_s28] sm:$0xff] }
 0x4c4   : > { %2860 = vmatpush1.bf16.msra.mxu0 %v4163_v29 }
 0x4c5   : > { %2861 = vmatprep.subr.bf16.mxu0 %v4168_v30  ;;  %v4247_v30 = vld [vmem:[%s5430_s9 + $0xc0] ss:$8 sps:$4 sm:$0xff]  }
 0x4c6   : > { %3163 = vmatpush2.bf16.msra.mxu1 %v4244_v1 }
 0x4c7   : > { %3164 = vmatprep.subr.bf16.mxu1 %v4249_v16 }
 0x4c8   : > { %2862 = vmatpush1.bf16.msra.mxu0 %v4166_v32 }
 0x4c9   : > { %2863 = vmatprep.subr.bf16.mxu0 %v4171_v33  ;;  %v4252_v33 = vld [vmem:[%s5430_s9 + $0xb4] ss:$8 sps:$4 sm:$0xff]  }
 0x4ca   : > { %3165 = vmatpush2.bf16.msra.mxu1 %v4247_v30 }
 0x4cb   : > { %3166 = vmatprep.subr.bf16.mxu1 %v4252_v33 }
 0x4cc   : > { %2864 = vmatpush1.bf16.msra.mxu0 %v4169_v34  ;;  %v4250_v34 = vld [vmem:[%s5430_s9 + $0xb0] ss:$8 sps:$4 sm:$0xff]  }
 0x4cd   : > { %2865 = vmatprep.subr.bf16.mxu0 %v4174_v35 }
 0x4ce   : > { %3167 = vmatpush2.bf16.msra.mxu1 %v4250_v34 }
 0x4cf   : > { %3168 = vmatprep.subr.bf16.mxu1 %v4255_v44 }
 0x4d0   : > { %2866 = vmatpush1.bf16.msra.mxu0 %v4172_v37 }
 0x4d1   : > { %2867 = vmatprep.subr.bf16.mxu0 %v4177_v38 }
 0x4d2   : > { %3169 = vmatpush2.bf16.msra.mxu1 %v4253_v45 }
 0x4d3   : > { %3170 = vmatprep.subr.bf16.mxu1 %v4258_v58 }
 0x4d4   : > { %2868 = vmatpush1.bf16.msra.mxu0 %v4175_v40 }
 0x4d5   : > { %2869 = vmatprep.subr.bf16.mxu0 %v4180_v41 }
 0x4d6   : > { %3171 = vmatpush2.bf16.msra.mxu1 %v4256_v59 }
 0x4d7   : > { %3172 = vmatprep.subr.bf16.mxu1 %v4261_v62 }
 0x4d8   : > { %2870 = vmatpush2.bf16.msra.mxu0 %v4178_v43 }
 0x4d9   : > { %2871 = vmatprep.subr.bf16.mxu0 %v4183_v24 }
 0x4da   : > { %3173 = vmatpush2.bf16.msra.mxu1 %v4259_v63 }
 0x4dc   : > { %2872 = vmatpush2.bf16.msra.mxu0 %v4181_v31 }
 0x4dd   : > { %2873 = vmatprep.subr.bf16.mxu0 %v4186_v47 }
 0x4e0   : > { %2874 = vmatpush2.bf16.msra.mxu0 %v4184_v48 }
 0x4e1   : > { %2875 = vmatprep.subr.bf16.mxu0 %v4189_v49 }
 0x4e4   : > { %2876 = vmatpush2.bf16.msra.mxu0 %v4187_v28 }
 0x4e5   : > { %2877 = vmatprep.subr.bf16.mxu0 %v4192_v50 }
 0x4e8   : > { %2878 = vmatpush2.bf16.msra.mxu0 %v4190_v36 }
 0x4e9   : > { %2879 = vmatprep.subr.bf16.mxu0 %v4195_v6 }
 0x4ec   : > { %2880 = vmatpush2.bf16.msra.mxu0 %v4193_v7 }
 0x4ed   : > { %2881 = vmatprep.subr.bf16.mxu0 %v4198_v8 }
 0x4f0   : > { %2882 = vmatpush2.bf16.msra.mxu0 %v4196_v9 }
 0x4f1   : > { %2883 = vmatprep.subr.bf16.mxu0 %v4201_v51 }
 0x4f4   : > { %2884 = vmatpush2.bf16.msra.mxu0 %v4199_v52 }
 0x537   : > { %v3884_v57 = vpop.f32.mrf.mxu0 }
 0x538   : > { %v3761_v56 = vpack.c.bf16 %v3884_v57, %v3884_v57  ;;  %v5306_v57 = vrot.slane %v2641_v53, %v4970_v21 }
 0x539   : > { %v2144_v5 = vpop.f32.mrf.mxu0 }
 0x53a   : > { %2209 = vst [vmem:[#allocation3 + $0x10] sm:$0xf] %v3761_v56  ;;  %v3759_v11 = vpack.c.bf16 %v2144_v5, %v2144_v5 }
 0x53b   : > { %v3885_v60 = vpop.f32.mrf.mxu0 }
 0x53c   : > { %2207 = vst [vmem:[#allocation3] sm:$0xf] %v3759_v11  ;;  %v3762_v13 = vpack.c.bf16 %v3885_v60, %v3885_v60 }
 0x53d   : > { %v2147_v18 = vpop.f32.mrf.mxu0 }
 0x53e   : > { %2210 = vst [vmem:[#allocation3 + $0x18] sm:$0xf] %v3762_v13  ;;  %v3760_v20 = vpack.c.bf16 %v2147_v18, %v2147_v18  ;;  %v4326_v18 = vld [vmem:[%s4870_s28 + $0x10] sm:$0xff] }
 0x540   : > { %2208 = vst [vmem:[#allocation3 + $0x8] sm:$0xf] %v3760_v20 }
 0x545   : > { %v4207_v52 = vld [vmem:[#allocation3 + $0x10] ss:$8 sps:$4 sm:$0xff]  }
 0x547   : > { %v3888_v26 = vpop.f32.mrf.mxu0  ;;  %v4202_v8 = vld [vmem:[#allocation3] ss:$8 sps:$4 sm:$0xff]  }
 0x548   : > { %v3765_v15 = vpack.c.bf16 %v3888_v26, %v3888_v26 }
 0x549   : > { %v2160_v0 = vpop.f32.mrf.mxu0 }
 0x54a   : > { %2213 = vst [vmem:[#allocation3 + $0x30] sm:$0xf] %v3765_v15  ;;  %v3763_v2 = vpack.c.bf16 %v2160_v0, %v2160_v0 }
 0x54b   : > { %v3889_v17 = vpop.f32.mrf.mxu0 }
 0x54c   : > { %2211 = vst [vmem:[#allocation3 + $0x20] sm:$0xf] %v3763_v2  ;;  %v3766_v27 = vpack.c.bf16 %v3889_v17, %v3889_v17 }
 0x54d   : > { %v2163_v29 = vpop.f32.mrf.mxu0 }
 0x54e   : > { %2214 = vst [vmem:[#allocation3 + $0x38] sm:$0xf] %v3766_v27  ;;  %v3764_v32 = vpack.c.bf16 %v2163_v29, %v2163_v29 }
 0x550   : > { %2212 = vst [vmem:[#allocation3 + $0x28] sm:$0xf] %v3764_v32  ;;  %v4330_v32 = vld [vmem:[%s4870_s28 + $0x30] sm:$0xff] }
 0x555   : > { %v4213_v55 = vld [vmem:[#allocation3 + $0x30] ss:$8 sps:$4 sm:$0xff]  }
 0x557   : > { %v4210_v42 = vld [vmem:[#allocation3 + $0x20] ss:$8 sps:$4 sm:$0xff]  }
 0x577   : > { %v3932_v35 = vpop.f32.mrf.mxu0 }
 0x578   : > { %v3769_v37 = vpack.c.bf16 %v3932_v35, %v3932_v35  ;;  %v4331_v35 = vld [vmem:[%s4870_s28 + $0x28] sm:$0xff] }
 0x579   : > { %v2530_v38 = vpop.f32.mrf.mxu0 }
 0x57a   : > { %2595 = vst [vmem:[#allocation3 + $0x14] sm:$0xf] %v3769_v37  ;;  %v3767_v40 = vpack.c.bf16 %v2530_v38, %v2530_v38  ;;  %v4332_v38 = vld [vmem:[%s4870_s28 + $0x38] sm:$0xff] }
 0x57b   : > { %v3933_v41 = vpop.f32.mrf.mxu0 }
 0x57c   : > { %2593 = vst [vmem:[#allocation3 + $0x4] sm:$0xf] %v3767_v40  ;;  %v3770_v43 = vpack.c.bf16 %v3933_v41, %v3933_v41  ;;  %v4333_v41 = vld [vmem:[%s4870_s28 + $0x20] sm:$0xff] }
 0x57d   : > { %v2533_v24 = vpop.f32.mrf.mxu0 }
 0x57e   : > { %2596 = vst [vmem:[#allocation3 + $0x1c] sm:$0xf] %v3770_v43  ;;  %v3768_v31 = vpack.c.bf16 %v2533_v24, %v2533_v24 }
 0x57f   : > { %v3936_v47 = vpop.f32.mrf.mxu0 }
 0x580   : > { %2594 = vst [vmem:[#allocation3 + $0xc] sm:$0xf] %v3768_v31  ;;  %v3773_v48 = vpack.c.bf16 %v3936_v47, %v3936_v47 }
 0x581   : > { %v2546_v49 = vpop.f32.mrf.mxu0 }
 0x582   : > { %2599 = vst [vmem:[#allocation3 + $0x34] sm:$0xf] %v3773_v48  ;;  %v3771_v28 = vpack.c.bf16 %v2546_v49, %v2546_v49 }
 0x583   : > { %v3937_v50 = vpop.f32.mrf.mxu0 }
 0x584   : > { %2597 = vst [vmem:[#allocation3 + $0x24] sm:$0xf] %v3771_v28  ;;  %v3774_v36 = vpack.c.bf16 %v3937_v50, %v3937_v50 }
 0x585   : > { %v2549_v6 = vpop.f32.mrf.mxu0  ;;  %v4205_v51 = vld [vmem:[#allocation3 + $0x14] ss:$8 sps:$4 sm:$0xff]  }
 0x586   : > { %2600 = vst [vmem:[#allocation3 + $0x3c] sm:$0xf] %v3774_v36  ;;  %v3772_v7 = vpack.c.bf16 %v2549_v6, %v2549_v6 }
 0x587   : > { %v4204_v9 = vld [vmem:[#allocation3 + $0x4] ss:$8 sps:$4 sm:$0xff]  }
 0x588   : > { %2598 = vst [vmem:[#allocation3 + $0x2c] sm:$0xf] %v3772_v7  ;;  %2885 = vmatprep.mubr.bf16.mxu0 %v4204_v9  ;;  %v4334_v7 = vld [vmem:[%s4870_s28 + $0x50] sm:$0xff] }
 0x589   : > { %2886 = vmatmul.mubr.bf16.vlgmr.msra.gmra.mxu0 %v4202_v8 }
 0x58a   : > { %2895 = vmatprep.mubr.bf16.mxu0 %v4205_v51  ;;  %v4335_v51 = vld [vmem:[%s4870_s28 + $0x48] sm:$0xff] }
 0x58d   : > { %v4211_v54 = vld [vmem:[#allocation3 + $0x34] ss:$8 sps:$4 sm:$0xff]  }
 0x58f   : > { %v4208_v39 = vld [vmem:[#allocation3 + $0x24] ss:$8 sps:$4 sm:$0xff]  }
 0x591   : > { %2896 = vmatmul.mubr.bf16.gmra.mxu0 %v4207_v52 }
 0x592   : > { %2905 = vmatprep.mubr.bf16.mxu0 %v4208_v39  ;;  %v4336_v39 = vld [vmem:[%s4870_s28 + $0x58] sm:$0xff] }
 0x599   : > { %2906 = vmatmul.mubr.bf16.gmra.mxu0 %v4210_v42 }
 0x59a   : > { %2915 = vmatprep.mubr.bf16.mxu0 %v4211_v54  ;;  %v4337_v54 = vld [vmem:[%s4870_s28 + $0x40] sm:$0xff] }
 0x5a1   : > { %2916 = vmatmul.mubr.bf16.gmra.mxu0 %v4213_v55 }
 0x649   : > { %v2887_v3 = vpop.f32.mrf.mxu0 }
 0x64a   : > { %v2888_v12 = vadd.f32 %v2887_v3, %v5306_v57 }
 0x64b   : > { %v2889_v56 = vpop.f32.mrf.mxu0 }
 0x64c   : > { %v2890_v10 = vadd.f32 %v2889_v56, %v5303_v4  ;;  %v2926_v26 = vsub.f32 %v4329_v25, %v2888_v12 }
 0x64d   : > { %v2891_v5 = vpop.f32.mrf.mxu0 }
 0x64e   : > { %v2892_v11 = vadd.f32 %v2891_v5, %v5306_v57  ;;  %v2927_v61 = vsub.f32 %v4327_v22, %v2890_v10  ;;  %v4338_v5 = vld [vmem:[%s4870_s28 + $0x70] sm:$0xff] }
 0x64f   : > { %v2893_v60 = vpop.f32.mrf.mxu0 }
 0x650   : > { %v2894_v13 = vadd.f32 %v2893_v60, %v5303_v4  ;;  %v2928_v19 = vsub.f32 %v4326_v18, %v2892_v11  ;;  %v4339_v11 = vld [vmem:[%s4870_s28 + $0x68] sm:$0xff]  ;;  %v4340_v60 = vld [vmem:[%s4870_s28 + $0x78] sm:$0xff]  ;;  %v4341_v18 = vld [vmem:[%s4870_s28 + $0x60] sm:$0xff] }
 0x651   : > { %v2897_v20 = vpop.f32.mrf.mxu0 }
 0x652   : > { %v2929_v14 = vsub.f32 %v4328_v23, %v2894_v13  ;;  %v2942_v1 = vpack.c.bf16 %v2928_v19, %v2926_v26  ;;  %v2898_v27 = vadd.f32 %v2897_v20, %v5306_v57 }
 0x653   : > { %v2899_v15 = vpop.f32.mrf.mxu0 }
 0x654   : > { %v2943_v0 = vpack.c.bf16 %v2929_v14, %v2927_v61  ;;  %v2900_v16 = vadd.f32 %v2899_v15, %v5303_v4  ;;  %v2930_v43 = vsub.f32 %v4333_v41, %v2898_v27 }
 0x655   : > { %v2901_v2 = vpop.f32.mrf.mxu0 }
 0x656   : > { %v2902_v17 = vadd.f32 %v2901_v2, %v5306_v57  ;;  %3174 = vmatprep.mubr.bf16.mxu1 %v2943_v0  ;;  %v2931_v37 = vsub.f32 %v4331_v35, %v2900_v16 }
 0x657   : > { %v2903_v29 = vpop.f32.mrf.mxu0  ;;  %3175 = vmatmul.mubr.bf16.vlgmr.msra.gmra.mxu1 %v2942_v1 }
 0x658   : > { %v2904_v30 = vadd.f32 %v2903_v29, %v5303_v4  ;;  %v2932_v33 = vsub.f32 %v4330_v32, %v2902_v17 }
 0x659   : > { %v2907_v34 = vpop.f32.mrf.mxu0 }
 0x65a   : > { %v2933_v40 = vsub.f32 %v4332_v38, %v2904_v30  ;;  %v2944_v48 = vpack.c.bf16 %v2932_v33, %v2930_v43  ;;  %v2908_v50 = vadd.f32 %v2907_v34, %v5306_v57 }
 0x65b   : > { %v2909_v24 = vpop.f32.mrf.mxu0 }
 0x65c   : > { %v2945_v31 = vpack.c.bf16 %v2933_v40, %v2931_v37  ;;  %v2910_v49 = vadd.f32 %v2909_v24, %v5303_v4  ;;  %v2934_v55 = vsub.f32 %v4337_v54, %v2908_v50 }
 0x65d   : > { %v2911_v47 = vpop.f32.mrf.mxu0 }
 0x65e   : > { %v2912_v28 = vadd.f32 %v2911_v47, %v5306_v57  ;;  %3184 = vmatprep.mubr.bf16.mxu1 %v2945_v31  ;;  %v2935_v52 = vsub.f32 %v4335_v51, %v2910_v49 }
 0x65f   : > { %v2913_v36 = vpop.f32.mrf.mxu0  ;;  %3185 = vmatmul.mubr.bf16.gmra.mxu1 %v2944_v48 }
 0x660   : > { %v2914_v6 = vadd.f32 %v2913_v36, %v5303_v4  ;;  %v2936_v8 = vsub.f32 %v4334_v7, %v2912_v28 }
 0x661   : > { %v2917_v9 = vpop.f32.mrf.mxu0 }
 0x662   : > { %v2937_v42 = vsub.f32 %v4336_v39, %v2914_v6  ;;  %v2946_v59 = vpack.c.bf16 %v2936_v8, %v2934_v55  ;;  %v2918_v53 = vadd.f32 %v2917_v9, %v5306_v57 }
 0x663   : > { %v2919_v44 = vpop.f32.mrf.mxu0 }
 0x664   : > { %v2947_v45 = vpack.c.bf16 %v2937_v42, %v2935_v52  ;;  %v2920_v62 = vadd.f32 %v2919_v44, %v5303_v4  ;;  %v2938_v19 = vsub.f32 %v4341_v18, %v2918_v53 }
 0x665   : > { %v2921_v58 = vpop.f32.mrf.mxu0 }
 0x666   : > { %v2922_v63 = vadd.f32 %v2921_v58, %v5306_v57  ;;  %3194 = vmatprep.mubr.bf16.mxu1 %v2947_v45  ;;  %v2939_v12 = vsub.f32 %v4339_v11, %v2920_v62  ;;  %v3215_v57 = vld [vmem:[%s5431_s10] sm:$0x3] }
 0x667   : > { %v2923_v3 = vpop.f32.mrf.mxu0  ;;  %3195 = vmatmul.mubr.bf16.gmra.mxu1 %v2946_v59  ;;  %v5347_v61 = vrot.slane %v3215_v57, %v4970_v21  ;;  %v5353_v14 = vrot.slane %v3215_v57, %v4976_v46 }
 0x668   : > { %v2924_v56 = vadd.f32 %v2923_v3, %v5303_v4  ;;  %v2940_v10 = vsub.f32 %v4338_v5, %v2922_v63  ;;  %v3243_v4 = vld [vmem:[%s5443_s14] sm:$0x3] }
 0x669   : > { %v5350_v23 = vrot.slane %v3243_v4, %v4970_v21  ;;  %v5357_v15 = vrot.slane %v3243_v4, %v4976_v46 }
 0x66a   : > { %v2941_v13 = vsub.f32 %v4340_v60, %v2924_v56  ;;  %v2948_v22 = vpack.c.bf16 %v2940_v10, %v2938_v19 }
 0x66c   : > { %v2949_v20 = vpack.c.bf16 %v2941_v13, %v2939_v12 }
 0x66e   : > { %3204 = vmatprep.mubr.bf16.mxu1 %v2949_v20 }
 0x66f   : > { %3205 = vmatmul.mubr.bf16.gmra.mxu1 %v2948_v22 }
 0x717   : > { %v3176_v25 = vpop.f32.mrf.mxu1 }
 0x718   : > { %v3227_v26 = vmul.f32 %v5347_v61, %v3176_v25 }
 0x719   : > { %v3178_v0 = vpop.f32.mrf.mxu1 }
 0x71a   : > { %v3255_v1 = vadd.f32 %v5350_v23, %v3227_v26  ;;  %v3228_v2 = vmul.f32 %v5353_v14, %v3178_v0 }
 0x71b   : > { %v3180_v16 = vpop.f32.mrf.mxu1 }
 0x71c   : > { %vm3271_vm0 = vcmp.ge.f32.partialorder %v3255_v1, 0.0  ;;  %v3287_v21 = vmul.f32 0.2, %v3255_v1  ;;  %v3256_v17 = vadd.f32 %v5357_v15, %v3228_v2  ;;  %v3229_v27 = vmul.f32 %v5347_v61, %v3180_v16 }
 0x71d   : > { %v3182_v29 = vpop.f32.mrf.mxu1 }
 0x71e   : > { %v3303_v30 = vsel %vm3271_vm0, %v3255_v1, %v3287_v21  ;;  %vm3272_vm1 = vcmp.ge.f32.partialorder %v3256_v17, 0.0  ;;  %v3288_v32 = vmul.f32 0.2, %v3256_v17  ;;  %v3257_v46 = vadd.f32 %v5350_v23, %v3229_v27 }
 0x71f   : > { %3319 = vst [vmem:[%s4498_s13] sm:$0xff] %v3303_v30  ;;  %v3230_v33 = vmul.f32 %v5353_v14, %v3182_v29  ;;  %v3186_v34 = vpop.f32.mrf.mxu1 }
 0x720   : > { %v3304_v35 = vsel %vm3272_vm1, %v3256_v17, %v3288_v32  ;;  %vm3273_vm2 = vcmp.ge.f32.partialorder %v3257_v46, 0.0  ;;  %v3289_v37 = vmul.f32 0.2, %v3257_v46  ;;  %v3231_v38 = vmul.f32 %v5347_v61, %v3186_v34 }
 0x721   : > { %3320 = vst [vmem:[%s4498_s13 + $0x8] sm:$0xff] %v3304_v35  ;;  %v3258_v40 = vadd.f32 %v5357_v15, %v3230_v33  ;;  %v3188_v41 = vpop.f32.mrf.mxu1 }
 0x722   : > { %v3305_v43 = vsel %vm3273_vm2, %v3257_v46, %v3289_v37  ;;  %v3259_v24 = vadd.f32 %v5350_v23, %v3231_v38  ;;  %v3232_v31 = vmul.f32 %v5353_v14, %v3188_v41 }
 0x723   : > { %3321 = vst [vmem:[%s4498_s13 + $0x10] sm:$0xff] %v3305_v43  ;;  %vm3274_vm3 = vcmp.ge.f32.partialorder %v3258_v40, 0.0  ;;  %v3290_v47 = vmul.f32 0.2, %v3258_v40  ;;  %v3190_v48 = vpop.f32.mrf.mxu1 }
 0x724   : > { %vm3275_vm4 = vcmp.ge.f32.partialorder %v3259_v24, 0.0  ;;  %v3291_v49 = vmul.f32 0.2, %v3259_v24  ;;  %v3260_v28 = vadd.f32 %v5357_v15, %v3232_v31  ;;  %v3233_v50 = vmul.f32 %v5347_v61, %v3190_v48 }
 0x725   : > { %v3306_v36 = vsel %vm3274_vm3, %v3258_v40, %v3290_v47  ;;  %v3192_v6 = vpop.f32.mrf.mxu1 }
 0x726   : > { %3322 = vst [vmem:[%s4498_s13 + $0x18] sm:$0xff] %v3306_v36  ;;  %v3307_v7 = vsel %vm3275_vm4, %v3259_v24, %v3291_v49  ;;  %vm3276_vm5 = vcmp.ge.f32.partialorder %v3260_v28, 0.0  ;;  %v3292_v8 = vmul.f32 0.2, %v3260_v28  ;;  %v3261_v9 = vadd.f32 %v5350_v23, %v3233_v50 }
 0x727   : > { %3323 = vst [vmem:[%s4498_s13 + $0x20] sm:$0xff] %v3307_v7  ;;  %v3234_v51 = vmul.f32 %v5353_v14, %v3192_v6  ;;  %v3196_v52 = vpop.f32.mrf.mxu1 }
 0x728   : > { %v3308_v39 = vsel %vm3276_vm5, %v3260_v28, %v3292_v8  ;;  %vm3277_vm6 = vcmp.ge.f32.partialorder %v3261_v9, 0.0  ;;  %v3293_v42 = vmul.f32 0.2, %v3261_v9  ;;  %v3235_v54 = vmul.f32 %v5347_v61, %v3196_v52 }
 0x729   : > { %3324 = vst [vmem:[%s4498_s13 + $0x28] sm:$0xff] %v3308_v39  ;;  %v3262_v55 = vadd.f32 %v5357_v15, %v3234_v51  ;;  %v3198_v44 = vpop.f32.mrf.mxu1 }
 0x72a   : > { %v3309_v45 = vsel %vm3277_vm6, %v3261_v9, %v3293_v42  ;;  %v3263_v58 = vadd.f32 %v5350_v23, %v3235_v54  ;;  %v3236_v59 = vmul.f32 %v5353_v14, %v3198_v44 }
 0x72b   : > { %3325 = vst [vmem:[%s4498_s13 + $0x30] sm:$0xff] %v3309_v45  ;;  %vm3278_vm7 = vcmp.ge.f32.partialorder %v3262_v55, 0.0  ;;  %v3294_v62 = vmul.f32 0.2, %v3262_v55  ;;  %v3200_v63 = vpop.f32.mrf.mxu1 }
 0x72c   : > { %vm3279_vm8 = vcmp.ge.f32.partialorder %v3263_v58, 0.0  ;;  %v3295_v53 = vmul.f32 0.2, %v3263_v58  ;;  %v3264_v3 = vadd.f32 %v5357_v15, %v3236_v59  ;;  %v3237_v56 = vmul.f32 %v5347_v61, %v3200_v63 }
 0x72d   : > { %v3310_v5 = vsel %vm3278_vm7, %v3262_v55, %v3294_v62  ;;  %v3202_v10 = vpop.f32.mrf.mxu1 }
 0x72e   : > { %3326 = vst [vmem:[%s4498_s13 + $0x38] sm:$0xff] %v3310_v5  ;;  %v3311_v11 = vsel %vm3279_vm8, %v3263_v58, %v3295_v53  ;;  %vm3280_vm9 = vcmp.ge.f32.partialorder %v3264_v3, 0.0  ;;  %v3296_v12 = vmul.f32 0.2, %v3264_v3  ;;  %v3265_v60 = vadd.f32 %v5350_v23, %v3237_v56 }
 0x72f   : > { %3327 = vst [vmem:[%s4498_s13 + $0x40] sm:$0xff] %v3311_v11  ;;  %v3238_v13 = vmul.f32 %v5353_v14, %v3202_v10  ;;  %v3206_v18 = vpop.f32.mrf.mxu1 }
 0x730   : > { %v3312_v19 = vsel %vm3280_vm9, %v3264_v3, %v3296_v12  ;;  %vm3281_vm10 = vcmp.ge.f32.partialorder %v3265_v60, 0.0  ;;  %v3297_v20 = vmul.f32 0.2, %v3265_v60  ;;  %v3239_v22 = vmul.f32 %v5347_v61, %v3206_v18 }
 0x731   : > { %3328 = vst [vmem:[%s4498_s13 + $0x48] sm:$0xff] %v3312_v19  ;;  %v3266_v57 = vadd.f32 %v5357_v15, %v3238_v13  ;;  %v3208_v4 = vpop.f32.mrf.mxu1 }
 0x732   : > { %v3313_v25 = vsel %vm3281_vm10, %v3265_v60, %v3297_v20  ;;  %v3267_v26 = vadd.f32 %v5350_v23, %v3239_v22  ;;  %v3240_v0 = vmul.f32 %v5353_v14, %v3208_v4 }
 0x733   : > { %3329 = vst [vmem:[%s4498_s13 + $0x50] sm:$0xff] %v3313_v25  ;;  %vm3282_vm11 = vcmp.ge.f32.partialorder %v3266_v57, 0.0  ;;  %v3298_v1 = vmul.f32 0.2, %v3266_v57  ;;  %v3210_v2 = vpop.f32.mrf.mxu1 }
 0x734   : > { %vm3283_vm12 = vcmp.ge.f32.partialorder %v3267_v26, 0.0  ;;  %v3299_v16 = vmul.f32 0.2, %v3267_v26  ;;  %v3268_v21 = vadd.f32 %v5357_v15, %v3240_v0  ;;  %v3241_v17 = vmul.f32 %v5347_v61, %v3210_v2 }
 0x735   : > { %v3314_v27 = vsel %vm3282_vm11, %v3266_v57, %v3298_v1  ;;  %v3212_v29 = vpop.f32.mrf.mxu1 }
 0x736   : > { %3330 = vst [vmem:[%s4498_s13 + $0x58] sm:$0xff] %v3314_v27  ;;  %v3315_v30 = vsel %vm3283_vm12, %v3267_v26, %v3299_v16  ;;  %vm3284_vm13 = vcmp.ge.f32.partialorder %v3268_v21, 0.0  ;;  %v3300_v32 = vmul.f32 0.2, %v3268_v21  ;;  %v3269_v46 = vadd.f32 %v5350_v23, %v3241_v17 }
 0x737   : > { %3331 = vst [vmem:[%s4498_s13 + $0x60] sm:$0xff] %v3315_v30  ;;  %v3242_v33 = vmul.f32 %v5353_v14, %v3212_v29 }
 0x738   : > { %v3316_v34 = vsel %vm3284_vm13, %v3268_v21, %v3300_v32  ;;  %vm3285_vm14 = vcmp.ge.f32.partialorder %v3269_v46, 0.0  ;;  %v3301_v35 = vmul.f32 0.2, %v3269_v46 }
 0x739   : > { %3332 = vst [vmem:[%s4498_s13 + $0x68] sm:$0xff] %v3316_v34  ;;  %v3270_v37 = vadd.f32 %v5357_v15, %v3242_v33 }
 0x73a   : > { %v3317_v61 = vsel %vm3285_vm14, %v3269_v46, %v3301_v35 }
 0x73b   : > { %3333 = vst [vmem:[%s4498_s13 + $0x70] sm:$0xff] %v3317_v61  ;;  %vm3286_vm15 = vcmp.ge.f32.partialorder %v3270_v37, 0.0  ;;  %v3302_v38 = vmul.f32 0.2, %v3270_v37 }
 0x73d   : > { %v3318_v40 = vsel %vm3286_vm15, %v3270_v37, %v3302_v38 }
 0x73e   : > { %3334 = vst [vmem:[%s4498_s13 + $0x78] sm:$0xff] %v3318_v40 }
 0x73f PF: > { %s5444_s28 = sld [smem:[#allocation6_spill]] }
 0x740   : > { %s5445_s21 = sld [smem:[#allocation4_spill]] }
 0x741   : > { %s5446_s22 = sld [smem:[#allocation5_spill]] }
 0x742   : > { %s5447_s23 = sld [smem:[#allocation7_spill]] }
 0x743   : > { %s5448_s24 = sld [smem:[#allocation8_spill]] }
 0x745   : > { %s22_s25 = sadd.s32 1, %s5444_s28  }
 0x746   : > { %p19_p8 = scmp.ge.s32.totalorder %s22_s25, 6  }
 0x748   :  { %21 = sbr.rel (!%p19_p8) target bundleno = 3 (0x3), region = 110 }

</bundles_post_ra>
